<compile_context>
chip_gen: v6e
topology: v6e:2x2x1
jax: 0.10.0
libtpu: 0.0.40
codegen_flags: <defaults>
</compile_context>

<pallas_src>
import jax
import jax.numpy as jnp
from jax.experimental import pallas as pl
from jax.experimental.pallas import tpu as pltpu

GL = 4      # leading guard cols (stencils need 2; 4 puts the pooled output at per-image
            # slot offset 2 so the wrapper unpack is a clean reshape+slice)
TRAIL = 2   # trailing guard cols per image slot


def _decoupling_block1_kernel(w1_ref, w2_ref, x_ref, o_ref):
    """One group of NB batch images per grid step, packed along the lane axis.

    w1_ref : SMEM (Cout*Cin*2,)   conv1 weights, flat index [co, ci, kh]
    w2_ref : SMEM (Cout*Cout*2,)  conv2 weights, flat index [co, ci, kw]
    x_ref  : VMEM (Cin, H+4, L0)  packed input; image b's HxW pixels live at rows
                                  [2, H+2) and cols [GL+b*WS, GL+b*WS+W); all other
                                  rows/cols are zero guards, so every tap below is a
                                  plain in-bounds static slice (no halo handling).
    o_ref  : VMEM (Cout, H, L0-4) pooled+relu output; image b at cols [2+b*WS, 2+b*WS+W)
    """
    Cin = x_ref.shape[0]
    L0 = x_ref.shape[2]
    Cout, H, _ = o_ref.shape

    # Hoist the input channel slabs once (reused by every output channel).
    xs = [x_ref[ci] for ci in range(Cin)]                       # each (H+4, L0)

    # ---- conv1 (kernel [2,1], stride 1, pad 1, no bias) + relu1, register-resident ----
    # Per output channel: sa = sum_ci w1[co,ci,0]*x[ci], sb = sum_ci w1[co,ci,1]*x[ci],
    # then the 2-tap H stencil is one shifted-slice add (guard rows supply the padding).
    # Rows 0 and H+2 of y1 are exactly the zero rows conv2's H-padding would add.
    y1 = []
    for co in range(Cout):
        sa = xs[0] * w1_ref[(co * Cin + 0) * 2 + 0]
        sb = xs[0] * w1_ref[(co * Cin + 0) * 2 + 1]
        for ci in range(1, Cin):
            sa = sa + xs[ci] * w1_ref[(co * Cin + ci) * 2 + 0]
            sb = sb + xs[ci] * w1_ref[(co * Cin + ci) * 2 + 1]
        y1.append(jnp.maximum(sa[0:H + 3, :] + sb[1:H + 4, :], 0.0))    # (H+3, L0)

    # ---- conv2 (kernel [1,2], stride 1, pad 1, no bias) -> 4x4 maxpool -> relu2 ----
    for co in range(Cout):
        acc_a = y1[0] * w2_ref[(co * Cout + 0) * 2 + 0]
        acc_b = y1[0] * w2_ref[(co * Cout + 0) * 2 + 1]
        for ci in range(1, Cout):
            acc_a = acc_a + y1[ci] * w2_ref[(co * Cout + ci) * 2 + 0]
            acc_b = acc_b + y1[ci] * w2_ref[(co * Cout + ci) * 2 + 1]
        # One lane-shifted add applies conv2's 2-tap W stencil (zero guard cols act as
        # the W padding); result covers the full padded conv2 output incl. zero borders.
        c2 = acc_a[:, 0:L0 - 1] + acc_b[:, 1:L0]                        # (H+3, L0-1)

        # Separable 4x4 stride-1 max pool: 2-level max over rows, then over cols.
        v1 = jnp.maximum(c2[0:H + 2, :], c2[1:H + 3, :])
        rmax = jnp.maximum(v1[0:H, :], v1[2:H + 2, :])                  # (H, L0-1)
        m1 = jnp.maximum(rmax[:, 0:L0 - 2], rmax[:, 1:L0 - 1])
        pooled = jnp.maximum(m1[:, 0:L0 - 4], m1[:, 2:L0 - 2])          # (H, L0-4)

        o_ref[co] = jnp.maximum(pooled, 0.0)


def decoupling_block1(x, w1, w2):
    """x: (N, Cin, H, W) f32 (NCHW, like PyTorch).
       w1: (Cout, Cin, 2, 1) conv1 weights (OIHW).
       w2: (Cout, Cout, 1, 2) conv2 weights (OIHW).
       returns (N, Cout, H, W) f32.
    """
    N, Cin, H, W = x.shape
    Cout = w1.shape[0]
    WS = W + TRAIL                       # per-image lane slot: W data + 2 zero guard cols

    # Pack as many images per grid step as keeps the packed lane width ~1 vreg wide.
    NB = 1
    for d in range(1, N + 1):
        if N % d == 0 and GL + d * WS <= 144:
            NB = d
    G = N // NB
    L0 = GL + NB * WS
    L2 = L0 - GL                         # == NB * WS  (kernel output lane width)

    # ---- lane-dense repack (layout plumbing only; guards baked in, no separate pad op) ----
    # (N, Cin, H, W) -> (G, Cin, H+4, L0)
    xg = x.astype(jnp.float32).reshape(G, NB, Cin, H, W).transpose(0, 2, 3, 1, 4)
    inner = jnp.zeros((G, Cin, H, NB, WS), jnp.float32).at[..., :W].set(xg)
    inner = inner.reshape(G, Cin, H, NB * WS)
    xp = jnp.zeros((G, Cin, H + 4, L0), jnp.float32).at[:, :, 2:H + 2, GL:].set(inner)

    # Flatten weights for SMEM scalar reads.
    w1_flat = w1.astype(jnp.float32).reshape(-1)     # (Cout*Cin*2,)
    w2_flat = w2.astype(jnp.float32).reshape(-1)     # (Cout*Cout*2,)

    grid_spec = pltpu.PrefetchScalarGridSpec(
        num_scalar_prefetch=0,
        grid=(G,),
        in_specs=[
            pl.BlockSpec(memory_space=pltpu.MemorySpace.SMEM),            # w1 scalars
            pl.BlockSpec(memory_space=pltpu.MemorySpace.SMEM),            # w2 scalars
            pl.BlockSpec((None, Cin, H + 4, L0), lambda g: (g, 0, 0, 0)),  # packed input
        ],
        out_specs=pl.BlockSpec((None, Cout, H, L2), lambda g: (g, 0, 0, 0)),
    )

    out = pl.pallas_call(
        _decoupling_block1_kernel,
        out_shape=jax.ShapeDtypeStruct((G, Cout, H, L2), jnp.float32),
        grid_spec=grid_spec,
        compiler_params=pltpu.CompilerParams(dimension_semantics=("parallel",)),
    )(w1_flat, w2_flat, xp)

    # ---- unpack: (G, Cout, H, NB*WS) -> (N, Cout, H, W); image b sits at slot cols [2, 2+W) ----
    out = out.reshape(G, Cout, H, NB, WS)[..., 2:2 + W]
    out = out.transpose(0, 3, 1, 2, 4).reshape(N, Cout, H, W)
    return out


def _reference(x, w1, w2):
    """Pure-JAX reference matching the PyTorch forward (cross-correlation convs)."""
    dn = ("NCHW", "OIHW", "NCHW")
    out = jax.lax.conv_general_dilated(x, w1, window_strides=(1, 1),
                                       padding=((1, 1), (1, 1)), dimension_numbers=dn)
    out = jnp.maximum(out, 0.0)
    out = jax.lax.conv_general_dilated(out, w2, window_strides=(1, 1),
                                       padding=((1, 1), (1, 1)), dimension_numbers=dn)
    out = jax.lax.reduce_window(out, -jnp.inf, jax.lax.max,
                                window_dimensions=(1, 1, 4, 4),
                                window_strides=(1, 1, 1, 1), padding="VALID")
    return jnp.maximum(out, 0.0)


if __name__ == "__main__":
    key = jax.random.PRNGKey(0)
    k_x, k_w1, k_w2 = jax.random.split(key, 3)

    N, Cin, Cout, H, W = 2, 4, 8, 16, 16
    x = jax.random.normal(k_x, (N, Cin, H, W), dtype=jnp.float32)
    w1 = 0.1 * jax.random.normal(k_w1, (Cout, Cin, 2, 1), dtype=jnp.float32)
    w2 = 0.1 * jax.random.normal(k_w2, (Cout, Cout, 1, 2), dtype=jnp.float32)

    out = decoupling_block1(x, w1, w2)
    out = jax.block_until_ready(out)

    ref = _reference(x, w1, w2)
    assert out.shape == (N, Cout, H, W), out.shape
    if not bool(jnp.allclose(out, ref, atol=1e-4, rtol=1e-4)):
        raise AssertionError("Pallas kernel output mismatches JAX reference")

    print("KERNEL_OK")
</pallas_src>

<mosaic_0001>
module attributes {stable_mosaic.version = 11 : i64} {
  func.func @_decoupling_block1_kernel(%arg0: i32, %arg1: memref<64xf32, #tpu.memory_space<smem>>, %arg2: memref<128xf32, #tpu.memory_space<smem>>, %arg3: memref<1x4x20x40xf32, #tpu.memory_space<vmem>>, %arg4: memref<1x8x16x36xf32, #tpu.memory_space<vmem>>) attributes {dimension_semantics = [#tpu.dimension_semantics<parallel>], iteration_bounds = array<i64: 1>, scalar_prefetch = 0 : i64, scratch_operands = 0 : i64, tpu.core_type = #tpu.core_type<tc>, window_params = [{transform_indices = @transform_0, window_bounds = array<i64: 64>}, {transform_indices = @transform_1, window_bounds = array<i64: 128>}, {transform_indices = @transform_2, window_bounds = array<i64: 1, 4, 20, 40>}, {transform_indices = @transform_3, window_bounds = array<i64: 1, 8, 16, 36>}]} {
    %c0 = arith.constant 0 : index
    %c0_0 = arith.constant 0 : index
    %c0_1 = arith.constant 0 : index
    %c0_2 = arith.constant 0 : index
    %0 = vector.load %arg3[%c0, %c0_0, %c0_1, %c0_2] : memref<1x4x20x40xf32, #tpu.memory_space<vmem>>, vector<1x1x20x40xf32>
    %1 = vector.shape_cast %0 : vector<1x1x20x40xf32> to vector<20x40xf32>
    %c0_3 = arith.constant 0 : index
    %c1 = arith.constant 1 : index
    %c0_4 = arith.constant 0 : index
    %c0_5 = arith.constant 0 : index
    %2 = vector.load %arg3[%c0_3, %c1, %c0_4, %c0_5] : memref<1x4x20x40xf32, #tpu.memory_space<vmem>>, vector<1x1x20x40xf32>
    %3 = vector.shape_cast %2 : vector<1x1x20x40xf32> to vector<20x40xf32>
    %c0_6 = arith.constant 0 : index
    %c2 = arith.constant 2 : index
    %c0_7 = arith.constant 0 : index
    %c0_8 = arith.constant 0 : index
    %4 = vector.load %arg3[%c0_6, %c2, %c0_7, %c0_8] : memref<1x4x20x40xf32, #tpu.memory_space<vmem>>, vector<1x1x20x40xf32>
    %5 = vector.shape_cast %4 : vector<1x1x20x40xf32> to vector<20x40xf32>
    %c0_9 = arith.constant 0 : index
    %c3 = arith.constant 3 : index
    %c0_10 = arith.constant 0 : index
    %c0_11 = arith.constant 0 : index
    %6 = vector.load %arg3[%c0_9, %c3, %c0_10, %c0_11] : memref<1x4x20x40xf32, #tpu.memory_space<vmem>>, vector<1x1x20x40xf32>
    %7 = vector.shape_cast %6 : vector<1x1x20x40xf32> to vector<20x40xf32>
    %c0_12 = arith.constant 0 : index
    %8 = memref.load %arg1[%c0_12] : memref<64xf32, #tpu.memory_space<smem>>
    %9 = vector.broadcast %8 : f32 to vector<20x40xf32>
    %10 = arith.mulf %1, %9 : vector<20x40xf32>
    %c1_13 = arith.constant 1 : index
    %11 = memref.load %arg1[%c1_13] : memref<64xf32, #tpu.memory_space<smem>>
    %12 = vector.broadcast %11 : f32 to vector<20x40xf32>
    %13 = arith.mulf %1, %12 : vector<20x40xf32>
    %c2_14 = arith.constant 2 : index
    %14 = memref.load %arg1[%c2_14] : memref<64xf32, #tpu.memory_space<smem>>
    %15 = vector.broadcast %14 : f32 to vector<20x40xf32>
    %16 = arith.mulf %3, %15 : vector<20x40xf32>
    %17 = arith.addf %10, %16 : vector<20x40xf32>
    %c3_15 = arith.constant 3 : index
    %18 = memref.load %arg1[%c3_15] : memref<64xf32, #tpu.memory_space<smem>>
    %19 = vector.broadcast %18 : f32 to vector<20x40xf32>
    %20 = arith.mulf %3, %19 : vector<20x40xf32>
    %21 = arith.addf %13, %20 : vector<20x40xf32>
    %c4 = arith.constant 4 : index
    %22 = memref.load %arg1[%c4] : memref<64xf32, #tpu.memory_space<smem>>
    %23 = vector.broadcast %22 : f32 to vector<20x40xf32>
    %24 = arith.mulf %5, %23 : vector<20x40xf32>
    %25 = arith.addf %17, %24 : vector<20x40xf32>
    %c5 = arith.constant 5 : index
    %26 = memref.load %arg1[%c5] : memref<64xf32, #tpu.memory_space<smem>>
    %27 = vector.broadcast %26 : f32 to vector<20x40xf32>
    %28 = arith.mulf %5, %27 : vector<20x40xf32>
    %29 = arith.addf %21, %28 : vector<20x40xf32>
    %c6 = arith.constant 6 : index
    %30 = memref.load %arg1[%c6] : memref<64xf32, #tpu.memory_space<smem>>
    %31 = vector.broadcast %30 : f32 to vector<20x40xf32>
    %32 = arith.mulf %7, %31 : vector<20x40xf32>
    %33 = arith.addf %25, %32 : vector<20x40xf32>
    %c7 = arith.constant 7 : index
    %34 = memref.load %arg1[%c7] : memref<64xf32, #tpu.memory_space<smem>>
    %35 = vector.broadcast %34 : f32 to vector<20x40xf32>
    %36 = arith.mulf %7, %35 : vector<20x40xf32>
    %37 = arith.addf %29, %36 : vector<20x40xf32>
    %38 = vector.extract_strided_slice %33 {offsets = [0, 0], sizes = [19, 40], strides = [1, 1]} : vector<20x40xf32> to vector<19x40xf32>
    %39 = vector.extract_strided_slice %37 {offsets = [1, 0], sizes = [19, 40], strides = [1, 1]} : vector<20x40xf32> to vector<19x40xf32>
    %40 = arith.addf %38, %39 : vector<19x40xf32>
    %cst = arith.constant 0.000000e+00 : f32
    %41 = vector.broadcast %cst : f32 to vector<19x40xf32>
    %42 = arith.maximumf %40, %41 : vector<19x40xf32>
    %c8 = arith.constant 8 : index
    %43 = memref.load %arg1[%c8] : memref<64xf32, #tpu.memory_space<smem>>
    %44 = vector.broadcast %43 : f32 to vector<20x40xf32>
    %45 = arith.mulf %1, %44 : vector<20x40xf32>
    %c9 = arith.constant 9 : index
    %46 = memref.load %arg1[%c9] : memref<64xf32, #tpu.memory_space<smem>>
    %47 = vector.broadcast %46 : f32 to vector<20x40xf32>
    %48 = arith.mulf %1, %47 : vector<20x40xf32>
    %c10 = arith.constant 10 : index
    %49 = memref.load %arg1[%c10] : memref<64xf32, #tpu.memory_space<smem>>
    %50 = vector.broadcast %49 : f32 to vector<20x40xf32>
    %51 = arith.mulf %3, %50 : vector<20x40xf32>
    %52 = arith.addf %45, %51 : vector<20x40xf32>
    %c11 = arith.constant 11 : index
    %53 = memref.load %arg1[%c11] : memref<64xf32, #tpu.memory_space<smem>>
    %54 = vector.broadcast %53 : f32 to vector<20x40xf32>
    %55 = arith.mulf %3, %54 : vector<20x40xf32>
    %56 = arith.addf %48, %55 : vector<20x40xf32>
    %c12 = arith.constant 12 : index
    %57 = memref.load %arg1[%c12] : memref<64xf32, #tpu.memory_space<smem>>
    %58 = vector.broadcast %57 : f32 to vector<20x40xf32>
    %59 = arith.mulf %5, %58 : vector<20x40xf32>
    %60 = arith.addf %52, %59 : vector<20x40xf32>
    %c13 = arith.constant 13 : index
    %61 = memref.load %arg1[%c13] : memref<64xf32, #tpu.memory_space<smem>>
    %62 = vector.broadcast %61 : f32 to vector<20x40xf32>
    %63 = arith.mulf %5, %62 : vector<20x40xf32>
    %64 = arith.addf %56, %63 : vector<20x40xf32>
    %c14 = arith.constant 14 : index
    %65 = memref.load %arg1[%c14] : memref<64xf32, #tpu.memory_space<smem>>
    %66 = vector.broadcast %65 : f32 to vector<20x40xf32>
    %67 = arith.mulf %7, %66 : vector<20x40xf32>
    %68 = arith.addf %60, %67 : vector<20x40xf32>
    %c15 = arith.constant 15 : index
    %69 = memref.load %arg1[%c15] : memref<64xf32, #tpu.memory_space<smem>>
    %70 = vector.broadcast %69 : f32 to vector<20x40xf32>
    %71 = arith.mulf %7, %70 : vector<20x40xf32>
    %72 = arith.addf %64, %71 : vector<20x40xf32>
    %73 = vector.extract_strided_slice %68 {offsets = [0, 0], sizes = [19, 40], strides = [1, 1]} : vector<20x40xf32> to vector<19x40xf32>
    %74 = vector.extract_strided_slice %72 {offsets = [1, 0], sizes = [19, 40], strides = [1, 1]} : vector<20x40xf32> to vector<19x40xf32>
    %75 = arith.addf %73, %74 : vector<19x40xf32>
    %cst_16 = arith.constant 0.000000e+00 : f32
    %76 = vector.broadcast %cst_16 : f32 to vector<19x40xf32>
    %77 = arith.maximumf %75, %76 : vector<19x40xf32>
    %c16 = arith.constant 16 : index
    %78 = memref.load %arg1[%c16] : memref<64xf32, #tpu.memory_space<smem>>
    %79 = vector.broadcast %78 : f32 to vector<20x40xf32>
    %80 = arith.mulf %1, %79 : vector<20x40xf32>
    %c17 = arith.constant 17 : index
    %81 = memref.load %arg1[%c17] : memref<64xf32, #tpu.memory_space<smem>>
    %82 = vector.broadcast %81 : f32 to vector<20x40xf32>
    %83 = arith.mulf %1, %82 : vector<20x40xf32>
    %c18 = arith.constant 18 : index
    %84 = memref.load %arg1[%c18] : memref<64xf32, #tpu.memory_space<smem>>
    %85 = vector.broadcast %84 : f32 to vector<20x40xf32>
    %86 = arith.mulf %3, %85 : vector<20x40xf32>
    %87 = arith.addf %80, %86 : vector<20x40xf32>
    %c19 = arith.constant 19 : index
    %88 = memref.load %arg1[%c19] : memref<64xf32, #tpu.memory_space<smem>>
    %89 = vector.broadcast %88 : f32 to vector<20x40xf32>
    %90 = arith.mulf %3, %89 : vector<20x40xf32>
    %91 = arith.addf %83, %90 : vector<20x40xf32>
    %c20 = arith.constant 20 : index
    %92 = memref.load %arg1[%c20] : memref<64xf32, #tpu.memory_space<smem>>
    %93 = vector.broadcast %92 : f32 to vector<20x40xf32>
    %94 = arith.mulf %5, %93 : vector<20x40xf32>
    %95 = arith.addf %87, %94 : vector<20x40xf32>
    %c21 = arith.constant 21 : index
    %96 = memref.load %arg1[%c21] : memref<64xf32, #tpu.memory_space<smem>>
    %97 = vector.broadcast %96 : f32 to vector<20x40xf32>
    %98 = arith.mulf %5, %97 : vector<20x40xf32>
    %99 = arith.addf %91, %98 : vector<20x40xf32>
    %c22 = arith.constant 22 : index
    %100 = memref.load %arg1[%c22] : memref<64xf32, #tpu.memory_space<smem>>
    %101 = vector.broadcast %100 : f32 to vector<20x40xf32>
    %102 = arith.mulf %7, %101 : vector<20x40xf32>
    %103 = arith.addf %95, %102 : vector<20x40xf32>
    %c23 = arith.constant 23 : index
    %104 = memref.load %arg1[%c23] : memref<64xf32, #tpu.memory_space<smem>>
    %105 = vector.broadcast %104 : f32 to vector<20x40xf32>
    %106 = arith.mulf %7, %105 : vector<20x40xf32>
    %107 = arith.addf %99, %106 : vector<20x40xf32>
    %108 = vector.extract_strided_slice %103 {offsets = [0, 0], sizes = [19, 40], strides = [1, 1]} : vector<20x40xf32> to vector<19x40xf32>
    %109 = vector.extract_strided_slice %107 {offsets = [1, 0], sizes = [19, 40], strides = [1, 1]} : vector<20x40xf32> to vector<19x40xf32>
    %110 = arith.addf %108, %109 : vector<19x40xf32>
    %cst_17 = arith.constant 0.000000e+00 : f32
    %111 = vector.broadcast %cst_17 : f32 to vector<19x40xf32>
    %112 = arith.maximumf %110, %111 : vector<19x40xf32>
    %c24 = arith.constant 24 : index
    %113 = memref.load %arg1[%c24] : memref<64xf32, #tpu.memory_space<smem>>
    %114 = vector.broadcast %113 : f32 to vector<20x40xf32>
    %115 = arith.mulf %1, %114 : vector<20x40xf32>
    %c25 = arith.constant 25 : index
    %116 = memref.load %arg1[%c25] : memref<64xf32, #tpu.memory_space<smem>>
    %117 = vector.broadcast %116 : f32 to vector<20x40xf32>
    %118 = arith.mulf %1, %117 : vector<20x40xf32>
    %c26 = arith.constant 26 : index
    %119 = memref.load %arg1[%c26] : memref<64xf32, #tpu.memory_space<smem>>
    %120 = vector.broadcast %119 : f32 to vector<20x40xf32>
    %121 = arith.mulf %3, %120 : vector<20x40xf32>
    %122 = arith.addf %115, %121 : vector<20x40xf32>
    %c27 = arith.constant 27 : index
    %123 = memref.load %arg1[%c27] : memref<64xf32, #tpu.memory_space<smem>>
    %124 = vector.broadcast %123 : f32 to vector<20x40xf32>
    %125 = arith.mulf %3, %124 : vector<20x40xf32>
    %126 = arith.addf %118, %125 : vector<20x40xf32>
    %c28 = arith.constant 28 : index
    %127 = memref.load %arg1[%c28] : memref<64xf32, #tpu.memory_space<smem>>
    %128 = vector.broadcast %127 : f32 to vector<20x40xf32>
    %129 = arith.mulf %5, %128 : vector<20x40xf32>
    %130 = arith.addf %122, %129 : vector<20x40xf32>
    %c29 = arith.constant 29 : index
    %131 = memref.load %arg1[%c29] : memref<64xf32, #tpu.memory_space<smem>>
    %132 = vector.broadcast %131 : f32 to vector<20x40xf32>
    %133 = arith.mulf %5, %132 : vector<20x40xf32>
    %134 = arith.addf %126, %133 : vector<20x40xf32>
    %c30 = arith.constant 30 : index
    %135 = memref.load %arg1[%c30] : memref<64xf32, #tpu.memory_space<smem>>
    %136 = vector.broadcast %135 : f32 to vector<20x40xf32>
    %137 = arith.mulf %7, %136 : vector<20x40xf32>
    %138 = arith.addf %130, %137 : vector<20x40xf32>
    %c31 = arith.constant 31 : index
    %139 = memref.load %arg1[%c31] : memref<64xf32, #tpu.memory_space<smem>>
    %140 = vector.broadcast %139 : f32 to vector<20x40xf32>
    %141 = arith.mulf %7, %140 : vector<20x40xf32>
    %142 = arith.addf %134, %141 : vector<20x40xf32>
    %143 = vector.extract_strided_slice %138 {offsets = [0, 0], sizes = [19, 40], strides = [1, 1]} : vector<20x40xf32> to vector<19x40xf32>
    %144 = vector.extract_strided_slice %142 {offsets = [1, 0], sizes = [19, 40], strides = [1, 1]} : vector<20x40xf32> to vector<19x40xf32>
    %145 = arith.addf %143, %144 : vector<19x40xf32>
    %cst_18 = arith.constant 0.000000e+00 : f32
    %146 = vector.broadcast %cst_18 : f32 to vector<19x40xf32>
    %147 = arith.maximumf %145, %146 : vector<19x40xf32>
    %c32 = arith.constant 32 : index
    %148 = memref.load %arg1[%c32] : memref<64xf32, #tpu.memory_space<smem>>
    %149 = vector.broadcast %148 : f32 to vector<20x40xf32>
    %150 = arith.mulf %1, %149 : vector<20x40xf32>
    %c33 = arith.constant 33 : index
    %151 = memref.load %arg1[%c33] : memref<64xf32, #tpu.memory_space<smem>>
    %152 = vector.broadcast %151 : f32 to vector<20x40xf32>
    %153 = arith.mulf %1, %152 : vector<20x40xf32>
    %c34 = arith.constant 34 : index
    %154 = memref.load %arg1[%c34] : memref<64xf32, #tpu.memory_space<smem>>
    %155 = vector.broadcast %154 : f32 to vector<20x40xf32>
    %156 = arith.mulf %3, %155 : vector<20x40xf32>
    %157 = arith.addf %150, %156 : vector<20x40xf32>
    %c35 = arith.constant 35 : index
    %158 = memref.load %arg1[%c35] : memref<64xf32, #tpu.memory_space<smem>>
    %159 = vector.broadcast %158 : f32 to vector<20x40xf32>
    %160 = arith.mulf %3, %159 : vector<20x40xf32>
    %161 = arith.addf %153, %160 : vector<20x40xf32>
    %c36 = arith.constant 36 : index
    %162 = memref.load %arg1[%c36] : memref<64xf32, #tpu.memory_space<smem>>
    %163 = vector.broadcast %162 : f32 to vector<20x40xf32>
    %164 = arith.mulf %5, %163 : vector<20x40xf32>
    %165 = arith.addf %157, %164 : vector<20x40xf32>
    %c37 = arith.constant 37 : index
    %166 = memref.load %arg1[%c37] : memref<64xf32, #tpu.memory_space<smem>>
    %167 = vector.broadcast %166 : f32 to vector<20x40xf32>
    %168 = arith.mulf %5, %167 : vector<20x40xf32>
    %169 = arith.addf %161, %168 : vector<20x40xf32>
    %c38 = arith.constant 38 : index
    %170 = memref.load %arg1[%c38] : memref<64xf32, #tpu.memory_space<smem>>
    %171 = vector.broadcast %170 : f32 to vector<20x40xf32>
    %172 = arith.mulf %7, %171 : vector<20x40xf32>
    %173 = arith.addf %165, %172 : vector<20x40xf32>
    %c39 = arith.constant 39 : index
    %174 = memref.load %arg1[%c39] : memref<64xf32, #tpu.memory_space<smem>>
    %175 = vector.broadcast %174 : f32 to vector<20x40xf32>
    %176 = arith.mulf %7, %175 : vector<20x40xf32>
    %177 = arith.addf %169, %176 : vector<20x40xf32>
    %178 = vector.extract_strided_slice %173 {offsets = [0, 0], sizes = [19, 40], strides = [1, 1]} : vector<20x40xf32> to vector<19x40xf32>
    %179 = vector.extract_strided_slice %177 {offsets = [1, 0], sizes = [19, 40], strides = [1, 1]} : vector<20x40xf32> to vector<19x40xf32>
    %180 = arith.addf %178, %179 : vector<19x40xf32>
    %cst_19 = arith.constant 0.000000e+00 : f32
    %181 = vector.broadcast %cst_19 : f32 to vector<19x40xf32>
    %182 = arith.maximumf %180, %181 : vector<19x40xf32>
    %c40 = arith.constant 40 : index
    %183 = memref.load %arg1[%c40] : memref<64xf32, #tpu.memory_space<smem>>
    %184 = vector.broadcast %183 : f32 to vector<20x40xf32>
    %185 = arith.mulf %1, %184 : vector<20x40xf32>
    %c41 = arith.constant 41 : index
    %186 = memref.load %arg1[%c41] : memref<64xf32, #tpu.memory_space<smem>>
    %187 = vector.broadcast %186 : f32 to vector<20x40xf32>
    %188 = arith.mulf %1, %187 : vector<20x40xf32>
    %c42 = arith.constant 42 : index
    %189 = memref.load %arg1[%c42] : memref<64xf32, #tpu.memory_space<smem>>
    %190 = vector.broadcast %189 : f32 to vector<20x40xf32>
    %191 = arith.mulf %3, %190 : vector<20x40xf32>
    %192 = arith.addf %185, %191 : vector<20x40xf32>
    %c43 = arith.constant 43 : index
    %193 = memref.load %arg1[%c43] : memref<64xf32, #tpu.memory_space<smem>>
    %194 = vector.broadcast %193 : f32 to vector<20x40xf32>
    %195 = arith.mulf %3, %194 : vector<20x40xf32>
    %196 = arith.addf %188, %195 : vector<20x40xf32>
    %c44 = arith.constant 44 : index
    %197 = memref.load %arg1[%c44] : memref<64xf32, #tpu.memory_space<smem>>
    %198 = vector.broadcast %197 : f32 to vector<20x40xf32>
    %199 = arith.mulf %5, %198 : vector<20x40xf32>
    %200 = arith.addf %192, %199 : vector<20x40xf32>
    %c45 = arith.constant 45 : index
    %201 = memref.load %arg1[%c45] : memref<64xf32, #tpu.memory_space<smem>>
    %202 = vector.broadcast %201 : f32 to vector<20x40xf32>
    %203 = arith.mulf %5, %202 : vector<20x40xf32>
    %204 = arith.addf %196, %203 : vector<20x40xf32>
    %c46 = arith.constant 46 : index
    %205 = memref.load %arg1[%c46] : memref<64xf32, #tpu.memory_space<smem>>
    %206 = vector.broadcast %205 : f32 to vector<20x40xf32>
    %207 = arith.mulf %7, %206 : vector<20x40xf32>
    %208 = arith.addf %200, %207 : vector<20x40xf32>
    %c47 = arith.constant 47 : index
    %209 = memref.load %arg1[%c47] : memref<64xf32, #tpu.memory_space<smem>>
    %210 = vector.broadcast %209 : f32 to vector<20x40xf32>
    %211 = arith.mulf %7, %210 : vector<20x40xf32>
    %212 = arith.addf %204, %211 : vector<20x40xf32>
    %213 = vector.extract_strided_slice %208 {offsets = [0, 0], sizes = [19, 40], strides = [1, 1]} : vector<20x40xf32> to vector<19x40xf32>
    %214 = vector.extract_strided_slice %212 {offsets = [1, 0], sizes = [19, 40], strides = [1, 1]} : vector<20x40xf32> to vector<19x40xf32>
    %215 = arith.addf %213, %214 : vector<19x40xf32>
    %cst_20 = arith.constant 0.000000e+00 : f32
    %216 = vector.broadcast %cst_20 : f32 to vector<19x40xf32>
    %217 = arith.maximumf %215, %216 : vector<19x40xf32>
    %c48 = arith.constant 48 : index
    %218 = memref.load %arg1[%c48] : memref<64xf32, #tpu.memory_space<smem>>
    %219 = vector.broadcast %218 : f32 to vector<20x40xf32>
    %220 = arith.mulf %1, %219 : vector<20x40xf32>
    %c49 = arith.constant 49 : index
    %221 = memref.load %arg1[%c49] : memref<64xf32, #tpu.memory_space<smem>>
    %222 = vector.broadcast %221 : f32 to vector<20x40xf32>
    %223 = arith.mulf %1, %222 : vector<20x40xf32>
    %c50 = arith.constant 50 : index
    %224 = memref.load %arg1[%c50] : memref<64xf32, #tpu.memory_space<smem>>
    %225 = vector.broadcast %224 : f32 to vector<20x40xf32>
    %226 = arith.mulf %3, %225 : vector<20x40xf32>
    %227 = arith.addf %220, %226 : vector<20x40xf32>
    %c51 = arith.constant 51 : index
    %228 = memref.load %arg1[%c51] : memref<64xf32, #tpu.memory_space<smem>>
    %229 = vector.broadcast %228 : f32 to vector<20x40xf32>
    %230 = arith.mulf %3, %229 : vector<20x40xf32>
    %231 = arith.addf %223, %230 : vector<20x40xf32>
    %c52 = arith.constant 52 : index
    %232 = memref.load %arg1[%c52] : memref<64xf32, #tpu.memory_space<smem>>
    %233 = vector.broadcast %232 : f32 to vector<20x40xf32>
    %234 = arith.mulf %5, %233 : vector<20x40xf32>
    %235 = arith.addf %227, %234 : vector<20x40xf32>
    %c53 = arith.constant 53 : index
    %236 = memref.load %arg1[%c53] : memref<64xf32, #tpu.memory_space<smem>>
    %237 = vector.broadcast %236 : f32 to vector<20x40xf32>
    %238 = arith.mulf %5, %237 : vector<20x40xf32>
    %239 = arith.addf %231, %238 : vector<20x40xf32>
    %c54 = arith.constant 54 : index
    %240 = memref.load %arg1[%c54] : memref<64xf32, #tpu.memory_space<smem>>
    %241 = vector.broadcast %240 : f32 to vector<20x40xf32>
    %242 = arith.mulf %7, %241 : vector<20x40xf32>
    %243 = arith.addf %235, %242 : vector<20x40xf32>
    %c55 = arith.constant 55 : index
    %244 = memref.load %arg1[%c55] : memref<64xf32, #tpu.memory_space<smem>>
    %245 = vector.broadcast %244 : f32 to vector<20x40xf32>
    %246 = arith.mulf %7, %245 : vector<20x40xf32>
    %247 = arith.addf %239, %246 : vector<20x40xf32>
    %248 = vector.extract_strided_slice %243 {offsets = [0, 0], sizes = [19, 40], strides = [1, 1]} : vector<20x40xf32> to vector<19x40xf32>
    %249 = vector.extract_strided_slice %247 {offsets = [1, 0], sizes = [19, 40], strides = [1, 1]} : vector<20x40xf32> to vector<19x40xf32>
    %250 = arith.addf %248, %249 : vector<19x40xf32>
    %cst_21 = arith.constant 0.000000e+00 : f32
    %251 = vector.broadcast %cst_21 : f32 to vector<19x40xf32>
    %252 = arith.maximumf %250, %251 : vector<19x40xf32>
    %c56 = arith.constant 56 : index
    %253 = memref.load %arg1[%c56] : memref<64xf32, #tpu.memory_space<smem>>
    %254 = vector.broadcast %253 : f32 to vector<20x40xf32>
    %255 = arith.mulf %1, %254 : vector<20x40xf32>
    %c57 = arith.constant 57 : index
    %256 = memref.load %arg1[%c57] : memref<64xf32, #tpu.memory_space<smem>>
    %257 = vector.broadcast %256 : f32 to vector<20x40xf32>
    %258 = arith.mulf %1, %257 : vector<20x40xf32>
    %c58 = arith.constant 58 : index
    %259 = memref.load %arg1[%c58] : memref<64xf32, #tpu.memory_space<smem>>
    %260 = vector.broadcast %259 : f32 to vector<20x40xf32>
    %261 = arith.mulf %3, %260 : vector<20x40xf32>
    %262 = arith.addf %255, %261 : vector<20x40xf32>
    %c59 = arith.constant 59 : index
    %263 = memref.load %arg1[%c59] : memref<64xf32, #tpu.memory_space<smem>>
    %264 = vector.broadcast %263 : f32 to vector<20x40xf32>
    %265 = arith.mulf %3, %264 : vector<20x40xf32>
    %266 = arith.addf %258, %265 : vector<20x40xf32>
    %c60 = arith.constant 60 : index
    %267 = memref.load %arg1[%c60] : memref<64xf32, #tpu.memory_space<smem>>
    %268 = vector.broadcast %267 : f32 to vector<20x40xf32>
    %269 = arith.mulf %5, %268 : vector<20x40xf32>
    %270 = arith.addf %262, %269 : vector<20x40xf32>
    %c61 = arith.constant 61 : index
    %271 = memref.load %arg1[%c61] : memref<64xf32, #tpu.memory_space<smem>>
    %272 = vector.broadcast %271 : f32 to vector<20x40xf32>
    %273 = arith.mulf %5, %272 : vector<20x40xf32>
    %274 = arith.addf %266, %273 : vector<20x40xf32>
    %c62 = arith.constant 62 : index
    %275 = memref.load %arg1[%c62] : memref<64xf32, #tpu.memory_space<smem>>
    %276 = vector.broadcast %275 : f32 to vector<20x40xf32>
    %277 = arith.mulf %7, %276 : vector<20x40xf32>
    %278 = arith.addf %270, %277 : vector<20x40xf32>
    %c63 = arith.constant 63 : index
    %279 = memref.load %arg1[%c63] : memref<64xf32, #tpu.memory_space<smem>>
    %280 = vector.broadcast %279 : f32 to vector<20x40xf32>
    %281 = arith.mulf %7, %280 : vector<20x40xf32>
    %282 = arith.addf %274, %281 : vector<20x40xf32>
    %283 = vector.extract_strided_slice %278 {offsets = [0, 0], sizes = [19, 40], strides = [1, 1]} : vector<20x40xf32> to vector<19x40xf32>
    %284 = vector.extract_strided_slice %282 {offsets = [1, 0], sizes = [19, 40], strides = [1, 1]} : vector<20x40xf32> to vector<19x40xf32>
    %285 = arith.addf %283, %284 : vector<19x40xf32>
    %cst_22 = arith.constant 0.000000e+00 : f32
    %286 = vector.broadcast %cst_22 : f32 to vector<19x40xf32>
    %287 = arith.maximumf %285, %286 : vector<19x40xf32>
    %c0_23 = arith.constant 0 : index
    %288 = memref.load %arg2[%c0_23] : memref<128xf32, #tpu.memory_space<smem>>
    %289 = vector.broadcast %288 : f32 to vector<19x40xf32>
    %290 = arith.mulf %42, %289 : vector<19x40xf32>
    %c1_24 = arith.constant 1 : index
    %291 = memref.load %arg2[%c1_24] : memref<128xf32, #tpu.memory_space<smem>>
    %292 = vector.broadcast %291 : f32 to vector<19x40xf32>
    %293 = arith.mulf %42, %292 : vector<19x40xf32>
    %c2_25 = arith.constant 2 : index
    %294 = memref.load %arg2[%c2_25] : memref<128xf32, #tpu.memory_space<smem>>
    %295 = vector.broadcast %294 : f32 to vector<19x40xf32>
    %296 = arith.mulf %77, %295 : vector<19x40xf32>
    %297 = arith.addf %290, %296 : vector<19x40xf32>
    %c3_26 = arith.constant 3 : index
    %298 = memref.load %arg2[%c3_26] : memref<128xf32, #tpu.memory_space<smem>>
    %299 = vector.broadcast %298 : f32 to vector<19x40xf32>
    %300 = arith.mulf %77, %299 : vector<19x40xf32>
    %301 = arith.addf %293, %300 : vector<19x40xf32>
    %c4_27 = arith.constant 4 : index
    %302 = memref.load %arg2[%c4_27] : memref<128xf32, #tpu.memory_space<smem>>
    %303 = vector.broadcast %302 : f32 to vector<19x40xf32>
    %304 = arith.mulf %112, %303 : vector<19x40xf32>
    %305 = arith.addf %297, %304 : vector<19x40xf32>
    %c5_28 = arith.constant 5 : index
    %306 = memref.load %arg2[%c5_28] : memref<128xf32, #tpu.memory_space<smem>>
    %307 = vector.broadcast %306 : f32 to vector<19x40xf32>
    %308 = arith.mulf %112, %307 : vector<19x40xf32>
    %309 = arith.addf %301, %308 : vector<19x40xf32>
    %c6_29 = arith.constant 6 : index
    %310 = memref.load %arg2[%c6_29] : memref<128xf32, #tpu.memory_space<smem>>
    %311 = vector.broadcast %310 : f32 to vector<19x40xf32>
    %312 = arith.mulf %147, %311 : vector<19x40xf32>
    %313 = arith.addf %305, %312 : vector<19x40xf32>
    %c7_30 = arith.constant 7 : index
    %314 = memref.load %arg2[%c7_30] : memref<128xf32, #tpu.memory_space<smem>>
    %315 = vector.broadcast %314 : f32 to vector<19x40xf32>
    %316 = arith.mulf %147, %315 : vector<19x40xf32>
    %317 = arith.addf %309, %316 : vector<19x40xf32>
    %c8_31 = arith.constant 8 : index
    %318 = memref.load %arg2[%c8_31] : memref<128xf32, #tpu.memory_space<smem>>
    %319 = vector.broadcast %318 : f32 to vector<19x40xf32>
    %320 = arith.mulf %182, %319 : vector<19x40xf32>
    %321 = arith.addf %313, %320 : vector<19x40xf32>
    %c9_32 = arith.constant 9 : index
    %322 = memref.load %arg2[%c9_32] : memref<128xf32, #tpu.memory_space<smem>>
    %323 = vector.broadcast %322 : f32 to vector<19x40xf32>
    %324 = arith.mulf %182, %323 : vector<19x40xf32>
    %325 = arith.addf %317, %324 : vector<19x40xf32>
    %c10_33 = arith.constant 10 : index
    %326 = memref.load %arg2[%c10_33] : memref<128xf32, #tpu.memory_space<smem>>
    %327 = vector.broadcast %326 : f32 to vector<19x40xf32>
    %328 = arith.mulf %217, %327 : vector<19x40xf32>
    %329 = arith.addf %321, %328 : vector<19x40xf32>
    %c11_34 = arith.constant 11 : index
    %330 = memref.load %arg2[%c11_34] : memref<128xf32, #tpu.memory_space<smem>>
    %331 = vector.broadcast %330 : f32 to vector<19x40xf32>
    %332 = arith.mulf %217, %331 : vector<19x40xf32>
    %333 = arith.addf %325, %332 : vector<19x40xf32>
    %c12_35 = arith.constant 12 : index
    %334 = memref.load %arg2[%c12_35] : memref<128xf32, #tpu.memory_space<smem>>
    %335 = vector.broadcast %334 : f32 to vector<19x40xf32>
    %336 = arith.mulf %252, %335 : vector<19x40xf32>
    %337 = arith.addf %329, %336 : vector<19x40xf32>
    %c13_36 = arith.constant 13 : index
    %338 = memref.load %arg2[%c13_36] : memref<128xf32, #tpu.memory_space<smem>>
    %339 = vector.broadcast %338 : f32 to vector<19x40xf32>
    %340 = arith.mulf %252, %339 : vector<19x40xf32>
    %341 = arith.addf %333, %340 : vector<19x40xf32>
    %c14_37 = arith.constant 14 : index
    %342 = memref.load %arg2[%c14_37] : memref<128xf32, #tpu.memory_space<smem>>
    %343 = vector.broadcast %342 : f32 to vector<19x40xf32>
    %344 = arith.mulf %287, %343 : vector<19x40xf32>
    %345 = arith.addf %337, %344 : vector<19x40xf32>
    %c15_38 = arith.constant 15 : index
    %346 = memref.load %arg2[%c15_38] : memref<128xf32, #tpu.memory_space<smem>>
    %347 = vector.broadcast %346 : f32 to vector<19x40xf32>
    %348 = arith.mulf %287, %347 : vector<19x40xf32>
    %349 = arith.addf %341, %348 : vector<19x40xf32>
    %350 = vector.extract_strided_slice %345 {offsets = [0, 0], sizes = [19, 39], strides = [1, 1]} : vector<19x40xf32> to vector<19x39xf32>
    %351 = vector.extract_strided_slice %349 {offsets = [0, 1], sizes = [19, 39], strides = [1, 1]} : vector<19x40xf32> to vector<19x39xf32>
    %352 = arith.addf %350, %351 : vector<19x39xf32>
    %353 = vector.extract_strided_slice %352 {offsets = [0, 0], sizes = [18, 39], strides = [1, 1]} : vector<19x39xf32> to vector<18x39xf32>
    %354 = vector.extract_strided_slice %352 {offsets = [1, 0], sizes = [18, 39], strides = [1, 1]} : vector<19x39xf32> to vector<18x39xf32>
    %355 = arith.maximumf %353, %354 : vector<18x39xf32>
    %356 = vector.extract_strided_slice %355 {offsets = [0, 0], sizes = [16, 39], strides = [1, 1]} : vector<18x39xf32> to vector<16x39xf32>
    %357 = vector.extract_strided_slice %355 {offsets = [2, 0], sizes = [16, 39], strides = [1, 1]} : vector<18x39xf32> to vector<16x39xf32>
    %358 = arith.maximumf %356, %357 : vector<16x39xf32>
    %359 = vector.extract_strided_slice %358 {offsets = [0, 0], sizes = [16, 38], strides = [1, 1]} : vector<16x39xf32> to vector<16x38xf32>
    %360 = vector.extract_strided_slice %358 {offsets = [0, 1], sizes = [16, 38], strides = [1, 1]} : vector<16x39xf32> to vector<16x38xf32>
    %361 = arith.maximumf %359, %360 : vector<16x38xf32>
    %362 = vector.extract_strided_slice %361 {offsets = [0, 0], sizes = [16, 36], strides = [1, 1]} : vector<16x38xf32> to vector<16x36xf32>
    %363 = vector.extract_strided_slice %361 {offsets = [0, 2], sizes = [16, 36], strides = [1, 1]} : vector<16x38xf32> to vector<16x36xf32>
    %364 = arith.maximumf %362, %363 : vector<16x36xf32>
    %cst_39 = arith.constant 0.000000e+00 : f32
    %365 = vector.broadcast %cst_39 : f32 to vector<16x36xf32>
    %366 = arith.maximumf %364, %365 : vector<16x36xf32>
    %c0_40 = arith.constant 0 : index
    %c0_41 = arith.constant 0 : index
    %c0_42 = arith.constant 0 : index
    %c0_43 = arith.constant 0 : index
    %367 = vector.load %arg4[%c0_40, %c0_41, %c0_42, %c0_43] : memref<1x8x16x36xf32, #tpu.memory_space<vmem>>, vector<1x1x16x36xf32>
    %368 = vector.shape_cast %367 : vector<1x1x16x36xf32> to vector<16x36xf32>
    %369 = vector.shape_cast %366 : vector<16x36xf32> to vector<1x1x16x36xf32>
    tpu.vector_store %arg4[%c0_40, %c0_41, %c0_42, %c0_43], %369 {strides = array<i32>} : memref<1x8x16x36xf32, #tpu.memory_space<vmem>>, vector<1x1x16x36xf32>,
    %c16_44 = arith.constant 16 : index
    %370 = memref.load %arg2[%c16_44] : memref<128xf32, #tpu.memory_space<smem>>
    %371 = vector.broadcast %370 : f32 to vector<19x40xf32>
    %372 = arith.mulf %42, %371 : vector<19x40xf32>
    %c17_45 = arith.constant 17 : index
    %373 = memref.load %arg2[%c17_45] : memref<128xf32, #tpu.memory_space<smem>>
    %374 = vector.broadcast %373 : f32 to vector<19x40xf32>
    %375 = arith.mulf %42, %374 : vector<19x40xf32>
    %c18_46 = arith.constant 18 : index
    %376 = memref.load %arg2[%c18_46] : memref<128xf32, #tpu.memory_space<smem>>
    %377 = vector.broadcast %376 : f32 to vector<19x40xf32>
    %378 = arith.mulf %77, %377 : vector<19x40xf32>
    %379 = arith.addf %372, %378 : vector<19x40xf32>
    %c19_47 = arith.constant 19 : index
    %380 = memref.load %arg2[%c19_47] : memref<128xf32, #tpu.memory_space<smem>>
    %381 = vector.broadcast %380 : f32 to vector<19x40xf32>
    %382 = arith.mulf %77, %381 : vector<19x40xf32>
    %383 = arith.addf %375, %382 : vector<19x40xf32>
    %c20_48 = arith.constant 20 : index
    %384 = memref.load %arg2[%c20_48] : memref<128xf32, #tpu.memory_space<smem>>
    %385 = vector.broadcast %384 : f32 to vector<19x40xf32>
    %386 = arith.mulf %112, %385 : vector<19x40xf32>
    %387 = arith.addf %379, %386 : vector<19x40xf32>
    %c21_49 = arith.constant 21 : index
    %388 = memref.load %arg2[%c21_49] : memref<128xf32, #tpu.memory_space<smem>>
    %389 = vector.broadcast %388 : f32 to vector<19x40xf32>
    %390 = arith.mulf %112, %389 : vector<19x40xf32>
    %391 = arith.addf %383, %390 : vector<19x40xf32>
    %c22_50 = arith.constant 22 : index
    %392 = memref.load %arg2[%c22_50] : memref<128xf32, #tpu.memory_space<smem>>
    %393 = vector.broadcast %392 : f32 to vector<19x40xf32>
    %394 = arith.mulf %147, %393 : vector<19x40xf32>
    %395 = arith.addf %387, %394 : vector<19x40xf32>
    %c23_51 = arith.constant 23 : index
    %396 = memref.load %arg2[%c23_51] : memref<128xf32, #tpu.memory_space<smem>>
    %397 = vector.broadcast %396 : f32 to vector<19x40xf32>
    %398 = arith.mulf %147, %397 : vector<19x40xf32>
    %399 = arith.addf %391, %398 : vector<19x40xf32>
    %c24_52 = arith.constant 24 : index
    %400 = memref.load %arg2[%c24_52] : memref<128xf32, #tpu.memory_space<smem>>
    %401 = vector.broadcast %400 : f32 to vector<19x40xf32>
    %402 = arith.mulf %182, %401 : vector<19x40xf32>
    %403 = arith.addf %395, %402 : vector<19x40xf32>
    %c25_53 = arith.constant 25 : index
    %404 = memref.load %arg2[%c25_53] : memref<128xf32, #tpu.memory_space<smem>>
    %405 = vector.broadcast %404 : f32 to vector<19x40xf32>
    %406 = arith.mulf %182, %405 : vector<19x40xf32>
    %407 = arith.addf %399, %406 : vector<19x40xf32>
    %c26_54 = arith.constant 26 : index
    %408 = memref.load %arg2[%c26_54] : memref<128xf32, #tpu.memory_space<smem>>
    %409 = vector.broadcast %408 : f32 to vector<19x40xf32>
    %410 = arith.mulf %217, %409 : vector<19x40xf32>
    %411 = arith.addf %403, %410 : vector<19x40xf32>
    %c27_55 = arith.constant 27 : index
    %412 = memref.load %arg2[%c27_55] : memref<128xf32, #tpu.memory_space<smem>>
    %413 = vector.broadcast %412 : f32 to vector<19x40xf32>
    %414 = arith.mulf %217, %413 : vector<19x40xf32>
    %415 = arith.addf %407, %414 : vector<19x40xf32>
    %c28_56 = arith.constant 28 : index
    %416 = memref.load %arg2[%c28_56] : memref<128xf32, #tpu.memory_space<smem>>
    %417 = vector.broadcast %416 : f32 to vector<19x40xf32>
    %418 = arith.mulf %252, %417 : vector<19x40xf32>
    %419 = arith.addf %411, %418 : vector<19x40xf32>
    %c29_57 = arith.constant 29 : index
    %420 = memref.load %arg2[%c29_57] : memref<128xf32, #tpu.memory_space<smem>>
    %421 = vector.broadcast %420 : f32 to vector<19x40xf32>
    %422 = arith.mulf %252, %421 : vector<19x40xf32>
    %423 = arith.addf %415, %422 : vector<19x40xf32>
    %c30_58 = arith.constant 30 : index
    %424 = memref.load %arg2[%c30_58] : memref<128xf32, #tpu.memory_space<smem>>
    %425 = vector.broadcast %424 : f32 to vector<19x40xf32>
    %426 = arith.mulf %287, %425 : vector<19x40xf32>
    %427 = arith.addf %419, %426 : vector<19x40xf32>
    %c31_59 = arith.constant 31 : index
    %428 = memref.load %arg2[%c31_59] : memref<128xf32, #tpu.memory_space<smem>>
    %429 = vector.broadcast %428 : f32 to vector<19x40xf32>
    %430 = arith.mulf %287, %429 : vector<19x40xf32>
    %431 = arith.addf %423, %430 : vector<19x40xf32>
    %432 = vector.extract_strided_slice %427 {offsets = [0, 0], sizes = [19, 39], strides = [1, 1]} : vector<19x40xf32> to vector<19x39xf32>
    %433 = vector.extract_strided_slice %431 {offsets = [0, 1], sizes = [19, 39], strides = [1, 1]} : vector<19x40xf32> to vector<19x39xf32>
    %434 = arith.addf %432, %433 : vector<19x39xf32>
    %435 = vector.extract_strided_slice %434 {offsets = [0, 0], sizes = [18, 39], strides = [1, 1]} : vector<19x39xf32> to vector<18x39xf32>
    %436 = vector.extract_strided_slice %434 {offsets = [1, 0], sizes = [18, 39], strides = [1, 1]} : vector<19x39xf32> to vector<18x39xf32>
    %437 = arith.maximumf %435, %436 : vector<18x39xf32>
    %438 = vector.extract_strided_slice %437 {offsets = [0, 0], sizes = [16, 39], strides = [1, 1]} : vector<18x39xf32> to vector<16x39xf32>
    %439 = vector.extract_strided_slice %437 {offsets = [2, 0], sizes = [16, 39], strides = [1, 1]} : vector<18x39xf32> to vector<16x39xf32>
    %440 = arith.maximumf %438, %439 : vector<16x39xf32>
    %441 = vector.extract_strided_slice %440 {offsets = [0, 0], sizes = [16, 38], strides = [1, 1]} : vector<16x39xf32> to vector<16x38xf32>
    %442 = vector.extract_strided_slice %440 {offsets = [0, 1], sizes = [16, 38], strides = [1, 1]} : vector<16x39xf32> to vector<16x38xf32>
    %443 = arith.maximumf %441, %442 : vector<16x38xf32>
    %444 = vector.extract_strided_slice %443 {offsets = [0, 0], sizes = [16, 36], strides = [1, 1]} : vector<16x38xf32> to vector<16x36xf32>
    %445 = vector.extract_strided_slice %443 {offsets = [0, 2], sizes = [16, 36], strides = [1, 1]} : vector<16x38xf32> to vector<16x36xf32>
    %446 = arith.maximumf %444, %445 : vector<16x36xf32>
    %cst_60 = arith.constant 0.000000e+00 : f32
    %447 = vector.broadcast %cst_60 : f32 to vector<16x36xf32>
    %448 = arith.maximumf %446, %447 : vector<16x36xf32>
    %c0_61 = arith.constant 0 : index
    %c1_62 = arith.constant 1 : index
    %c0_63 = arith.constant 0 : index
    %c0_64 = arith.constant 0 : index
    %449 = vector.load %arg4[%c0_61, %c1_62, %c0_63, %c0_64] : memref<1x8x16x36xf32, #tpu.memory_space<vmem>>, vector<1x1x16x36xf32>
    %450 = vector.shape_cast %449 : vector<1x1x16x36xf32> to vector<16x36xf32>
    %451 = vector.shape_cast %448 : vector<16x36xf32> to vector<1x1x16x36xf32>
    tpu.vector_store %arg4[%c0_61, %c1_62, %c0_63, %c0_64], %451 {strides = array<i32>} : memref<1x8x16x36xf32, #tpu.memory_space<vmem>>, vector<1x1x16x36xf32>,
    %c32_65 = arith.constant 32 : index
    %452 = memref.load %arg2[%c32_65] : memref<128xf32, #tpu.memory_space<smem>>
    %453 = vector.broadcast %452 : f32 to vector<19x40xf32>
    %454 = arith.mulf %42, %453 : vector<19x40xf32>
    %c33_66 = arith.constant 33 : index
    %455 = memref.load %arg2[%c33_66] : memref<128xf32, #tpu.memory_space<smem>>
    %456 = vector.broadcast %455 : f32 to vector<19x40xf32>
    %457 = arith.mulf %42, %456 : vector<19x40xf32>
    %c34_67 = arith.constant 34 : index
    %458 = memref.load %arg2[%c34_67] : memref<128xf32, #tpu.memory_space<smem>>
    %459 = vector.broadcast %458 : f32 to vector<19x40xf32>
    %460 = arith.mulf %77, %459 : vector<19x40xf32>
    %461 = arith.addf %454, %460 : vector<19x40xf32>
    %c35_68 = arith.constant 35 : index
    %462 = memref.load %arg2[%c35_68] : memref<128xf32, #tpu.memory_space<smem>>
    %463 = vector.broadcast %462 : f32 to vector<19x40xf32>
    %464 = arith.mulf %77, %463 : vector<19x40xf32>
    %465 = arith.addf %457, %464 : vector<19x40xf32>
    %c36_69 = arith.constant 36 : index
    %466 = memref.load %arg2[%c36_69] : memref<128xf32, #tpu.memory_space<smem>>
    %467 = vector.broadcast %466 : f32 to vector<19x40xf32>
    %468 = arith.mulf %112, %467 : vector<19x40xf32>
    %469 = arith.addf %461, %468 : vector<19x40xf32>
    %c37_70 = arith.constant 37 : index
    %470 = memref.load %arg2[%c37_70] : memref<128xf32, #tpu.memory_space<smem>>
    %471 = vector.broadcast %470 : f32 to vector<19x40xf32>
    %472 = arith.mulf %112, %471 : vector<19x40xf32>
    %473 = arith.addf %465, %472 : vector<19x40xf32>
    %c38_71 = arith.constant 38 : index
    %474 = memref.load %arg2[%c38_71] : memref<128xf32, #tpu.memory_space<smem>>
    %475 = vector.broadcast %474 : f32 to vector<19x40xf32>
    %476 = arith.mulf %147, %475 : vector<19x40xf32>
    %477 = arith.addf %469, %476 : vector<19x40xf32>
    %c39_72 = arith.constant 39 : index
    %478 = memref.load %arg2[%c39_72] : memref<128xf32, #tpu.memory_space<smem>>
    %479 = vector.broadcast %478 : f32 to vector<19x40xf32>
    %480 = arith.mulf %147, %479 : vector<19x40xf32>
    %481 = arith.addf %473, %480 : vector<19x40xf32>
    %c40_73 = arith.constant 40 : index
    %482 = memref.load %arg2[%c40_73] : memref<128xf32, #tpu.memory_space<smem>>
    %483 = vector.broadcast %482 : f32 to vector<19x40xf32>
    %484 = arith.mulf %182, %483 : vector<19x40xf32>
    %485 = arith.addf %477, %484 : vector<19x40xf32>
    %c41_74 = arith.constant 41 : index
    %486 = memref.load %arg2[%c41_74] : memref<128xf32, #tpu.memory_space<smem>>
    %487 = vector.broadcast %486 : f32 to vector<19x40xf32>
    %488 = arith.mulf %182, %487 : vector<19x40xf32>
    %489 = arith.addf %481, %488 : vector<19x40xf32>
    %c42_75 = arith.constant 42 : index
    %490 = memref.load %arg2[%c42_75] : memref<128xf32, #tpu.memory_space<smem>>
    %491 = vector.broadcast %490 : f32 to vector<19x40xf32>
    %492 = arith.mulf %217, %491 : vector<19x40xf32>
    %493 = arith.addf %485, %492 : vector<19x40xf32>
    %c43_76 = arith.constant 43 : index
    %494 = memref.load %arg2[%c43_76] : memref<128xf32, #tpu.memory_space<smem>>
    %495 = vector.broadcast %494 : f32 to vector<19x40xf32>
    %496 = arith.mulf %217, %495 : vector<19x40xf32>
    %497 = arith.addf %489, %496 : vector<19x40xf32>
    %c44_77 = arith.constant 44 : index
    %498 = memref.load %arg2[%c44_77] : memref<128xf32, #tpu.memory_space<smem>>
    %499 = vector.broadcast %498 : f32 to vector<19x40xf32>
    %500 = arith.mulf %252, %499 : vector<19x40xf32>
    %501 = arith.addf %493, %500 : vector<19x40xf32>
    %c45_78 = arith.constant 45 : index
    %502 = memref.load %arg2[%c45_78] : memref<128xf32, #tpu.memory_space<smem>>
    %503 = vector.broadcast %502 : f32 to vector<19x40xf32>
    %504 = arith.mulf %252, %503 : vector<19x40xf32>
    %505 = arith.addf %497, %504 : vector<19x40xf32>
    %c46_79 = arith.constant 46 : index
    %506 = memref.load %arg2[%c46_79] : memref<128xf32, #tpu.memory_space<smem>>
    %507 = vector.broadcast %506 : f32 to vector<19x40xf32>
    %508 = arith.mulf %287, %507 : vector<19x40xf32>
    %509 = arith.addf %501, %508 : vector<19x40xf32>
    %c47_80 = arith.constant 47 : index
    %510 = memref.load %arg2[%c47_80] : memref<128xf32, #tpu.memory_space<smem>>
    %511 = vector.broadcast %510 : f32 to vector<19x40xf32>
    %512 = arith.mulf %287, %511 : vector<19x40xf32>
    %513 = arith.addf %505, %512 : vector<19x40xf32>
    %514 = vector.extract_strided_slice %509 {offsets = [0, 0], sizes = [19, 39], strides = [1, 1]} : vector<19x40xf32> to vector<19x39xf32>
    %515 = vector.extract_strided_slice %513 {offsets = [0, 1], sizes = [19, 39], strides = [1, 1]} : vector<19x40xf32> to vector<19x39xf32>
    %516 = arith.addf %514, %515 : vector<19x39xf32>
    %517 = vector.extract_strided_slice %516 {offsets = [0, 0], sizes = [18, 39], strides = [1, 1]} : vector<19x39xf32> to vector<18x39xf32>
    %518 = vector.extract_strided_slice %516 {offsets = [1, 0], sizes = [18, 39], strides = [1, 1]} : vector<19x39xf32> to vector<18x39xf32>
    %519 = arith.maximumf %517, %518 : vector<18x39xf32>
    %520 = vector.extract_strided_slice %519 {offsets = [0, 0], sizes = [16, 39], strides = [1, 1]} : vector<18x39xf32> to vector<16x39xf32>
    %521 = vector.extract_strided_slice %519 {offsets = [2, 0], sizes = [16, 39], strides = [1, 1]} : vector<18x39xf32> to vector<16x39xf32>
    %522 = arith.maximumf %520, %521 : vector<16x39xf32>
    %523 = vector.extract_strided_slice %522 {offsets = [0, 0], sizes = [16, 38], strides = [1, 1]} : vector<16x39xf32> to vector<16x38xf32>
    %524 = vector.extract_strided_slice %522 {offsets = [0, 1], sizes = [16, 38], strides = [1, 1]} : vector<16x39xf32> to vector<16x38xf32>
    %525 = arith.maximumf %523, %524 : vector<16x38xf32>
    %526 = vector.extract_strided_slice %525 {offsets = [0, 0], sizes = [16, 36], strides = [1, 1]} : vector<16x38xf32> to vector<16x36xf32>
    %527 = vector.extract_strided_slice %525 {offsets = [0, 2], sizes = [16, 36], strides = [1, 1]} : vector<16x38xf32> to vector<16x36xf32>
    %528 = arith.maximumf %526, %527 : vector<16x36xf32>
    %cst_81 = arith.constant 0.000000e+00 : f32
    %529 = vector.broadcast %cst_81 : f32 to vector<16x36xf32>
    %530 = arith.maximumf %528, %529 : vector<16x36xf32>
    %c0_82 = arith.constant 0 : index
    %c2_83 = arith.constant 2 : index
    %c0_84 = arith.constant 0 : index
    %c0_85 = arith.constant 0 : index
    %531 = vector.load %arg4[%c0_82, %c2_83, %c0_84, %c0_85] : memref<1x8x16x36xf32, #tpu.memory_space<vmem>>, vector<1x1x16x36xf32>
    %532 = vector.shape_cast %531 : vector<1x1x16x36xf32> to vector<16x36xf32>
    %533 = vector.shape_cast %530 : vector<16x36xf32> to vector<1x1x16x36xf32>
    tpu.vector_store %arg4[%c0_82, %c2_83, %c0_84, %c0_85], %533 {strides = array<i32>} : memref<1x8x16x36xf32, #tpu.memory_space<vmem>>, vector<1x1x16x36xf32>,
    %c48_86 = arith.constant 48 : index
    %534 = memref.load %arg2[%c48_86] : memref<128xf32, #tpu.memory_space<smem>>
    %535 = vector.broadcast %534 : f32 to vector<19x40xf32>
    %536 = arith.mulf %42, %535 : vector<19x40xf32>
    %c49_87 = arith.constant 49 : index
    %537 = memref.load %arg2[%c49_87] : memref<128xf32, #tpu.memory_space<smem>>
    %538 = vector.broadcast %537 : f32 to vector<19x40xf32>
    %539 = arith.mulf %42, %538 : vector<19x40xf32>
    %c50_88 = arith.constant 50 : index
    %540 = memref.load %arg2[%c50_88] : memref<128xf32, #tpu.memory_space<smem>>
    %541 = vector.broadcast %540 : f32 to vector<19x40xf32>
    %542 = arith.mulf %77, %541 : vector<19x40xf32>
    %543 = arith.addf %536, %542 : vector<19x40xf32>
    %c51_89 = arith.constant 51 : index
    %544 = memref.load %arg2[%c51_89] : memref<128xf32, #tpu.memory_space<smem>>
    %545 = vector.broadcast %544 : f32 to vector<19x40xf32>
    %546 = arith.mulf %77, %545 : vector<19x40xf32>
    %547 = arith.addf %539, %546 : vector<19x40xf32>
    %c52_90 = arith.constant 52 : index
    %548 = memref.load %arg2[%c52_90] : memref<128xf32, #tpu.memory_space<smem>>
    %549 = vector.broadcast %548 : f32 to vector<19x40xf32>
    %550 = arith.mulf %112, %549 : vector<19x40xf32>
    %551 = arith.addf %543, %550 : vector<19x40xf32>
    %c53_91 = arith.constant 53 : index
    %552 = memref.load %arg2[%c53_91] : memref<128xf32, #tpu.memory_space<smem>>
    %553 = vector.broadcast %552 : f32 to vector<19x40xf32>
    %554 = arith.mulf %112, %553 : vector<19x40xf32>
    %555 = arith.addf %547, %554 : vector<19x40xf32>
    %c54_92 = arith.constant 54 : index
    %556 = memref.load %arg2[%c54_92] : memref<128xf32, #tpu.memory_space<smem>>
    %557 = vector.broadcast %556 : f32 to vector<19x40xf32>
    %558 = arith.mulf %147, %557 : vector<19x40xf32>
    %559 = arith.addf %551, %558 : vector<19x40xf32>
    %c55_93 = arith.constant 55 : index
    %560 = memref.load %arg2[%c55_93] : memref<128xf32, #tpu.memory_space<smem>>
    %561 = vector.broadcast %560 : f32 to vector<19x40xf32>
    %562 = arith.mulf %147, %561 : vector<19x40xf32>
    %563 = arith.addf %555, %562 : vector<19x40xf32>
    %c56_94 = arith.constant 56 : index
    %564 = memref.load %arg2[%c56_94] : memref<128xf32, #tpu.memory_space<smem>>
    %565 = vector.broadcast %564 : f32 to vector<19x40xf32>
    %566 = arith.mulf %182, %565 : vector<19x40xf32>
    %567 = arith.addf %559, %566 : vector<19x40xf32>
    %c57_95 = arith.constant 57 : index
    %568 = memref.load %arg2[%c57_95] : memref<128xf32, #tpu.memory_space<smem>>
    %569 = vector.broadcast %568 : f32 to vector<19x40xf32>
    %570 = arith.mulf %182, %569 : vector<19x40xf32>
    %571 = arith.addf %563, %570 : vector<19x40xf32>
    %c58_96 = arith.constant 58 : index
    %572 = memref.load %arg2[%c58_96] : memref<128xf32, #tpu.memory_space<smem>>
    %573 = vector.broadcast %572 : f32 to vector<19x40xf32>
    %574 = arith.mulf %217, %573 : vector<19x40xf32>
    %575 = arith.addf %567, %574 : vector<19x40xf32>
    %c59_97 = arith.constant 59 : index
    %576 = memref.load %arg2[%c59_97] : memref<128xf32, #tpu.memory_space<smem>>
    %577 = vector.broadcast %576 : f32 to vector<19x40xf32>
    %578 = arith.mulf %217, %577 : vector<19x40xf32>
    %579 = arith.addf %571, %578 : vector<19x40xf32>
    %c60_98 = arith.constant 60 : index
    %580 = memref.load %arg2[%c60_98] : memref<128xf32, #tpu.memory_space<smem>>
    %581 = vector.broadcast %580 : f32 to vector<19x40xf32>
    %582 = arith.mulf %252, %581 : vector<19x40xf32>
    %583 = arith.addf %575, %582 : vector<19x40xf32>
    %c61_99 = arith.constant 61 : index
    %584 = memref.load %arg2[%c61_99] : memref<128xf32, #tpu.memory_space<smem>>
    %585 = vector.broadcast %584 : f32 to vector<19x40xf32>
    %586 = arith.mulf %252, %585 : vector<19x40xf32>
    %587 = arith.addf %579, %586 : vector<19x40xf32>
    %c62_100 = arith.constant 62 : index
    %588 = memref.load %arg2[%c62_100] : memref<128xf32, #tpu.memory_space<smem>>
    %589 = vector.broadcast %588 : f32 to vector<19x40xf32>
    %590 = arith.mulf %287, %589 : vector<19x40xf32>
    %591 = arith.addf %583, %590 : vector<19x40xf32>
    %c63_101 = arith.constant 63 : index
    %592 = memref.load %arg2[%c63_101] : memref<128xf32, #tpu.memory_space<smem>>
    %593 = vector.broadcast %592 : f32 to vector<19x40xf32>
    %594 = arith.mulf %287, %593 : vector<19x40xf32>
    %595 = arith.addf %587, %594 : vector<19x40xf32>
    %596 = vector.extract_strided_slice %591 {offsets = [0, 0], sizes = [19, 39], strides = [1, 1]} : vector<19x40xf32> to vector<19x39xf32>
    %597 = vector.extract_strided_slice %595 {offsets = [0, 1], sizes = [19, 39], strides = [1, 1]} : vector<19x40xf32> to vector<19x39xf32>
    %598 = arith.addf %596, %597 : vector<19x39xf32>
    %599 = vector.extract_strided_slice %598 {offsets = [0, 0], sizes = [18, 39], strides = [1, 1]} : vector<19x39xf32> to vector<18x39xf32>
    %600 = vector.extract_strided_slice %598 {offsets = [1, 0], sizes = [18, 39], strides = [1, 1]} : vector<19x39xf32> to vector<18x39xf32>
    %601 = arith.maximumf %599, %600 : vector<18x39xf32>
    %602 = vector.extract_strided_slice %601 {offsets = [0, 0], sizes = [16, 39], strides = [1, 1]} : vector<18x39xf32> to vector<16x39xf32>
    %603 = vector.extract_strided_slice %601 {offsets = [2, 0], sizes = [16, 39], strides = [1, 1]} : vector<18x39xf32> to vector<16x39xf32>
    %604 = arith.maximumf %602, %603 : vector<16x39xf32>
    %605 = vector.extract_strided_slice %604 {offsets = [0, 0], sizes = [16, 38], strides = [1, 1]} : vector<16x39xf32> to vector<16x38xf32>
    %606 = vector.extract_strided_slice %604 {offsets = [0, 1], sizes = [16, 38], strides = [1, 1]} : vector<16x39xf32> to vector<16x38xf32>
    %607 = arith.maximumf %605, %606 : vector<16x38xf32>
    %608 = vector.extract_strided_slice %607 {offsets = [0, 0], sizes = [16, 36], strides = [1, 1]} : vector<16x38xf32> to vector<16x36xf32>
    %609 = vector.extract_strided_slice %607 {offsets = [0, 2], sizes = [16, 36], strides = [1, 1]} : vector<16x38xf32> to vector<16x36xf32>
    %610 = arith.maximumf %608, %609 : vector<16x36xf32>
    %cst_102 = arith.constant 0.000000e+00 : f32
    %611 = vector.broadcast %cst_102 : f32 to vector<16x36xf32>
    %612 = arith.maximumf %610, %611 : vector<16x36xf32>
    %c0_103 = arith.constant 0 : index
    %c3_104 = arith.constant 3 : index
    %c0_105 = arith.constant 0 : index
    %c0_106 = arith.constant 0 : index
    %613 = vector.load %arg4[%c0_103, %c3_104, %c0_105, %c0_106] : memref<1x8x16x36xf32, #tpu.memory_space<vmem>>, vector<1x1x16x36xf32>
    %614 = vector.shape_cast %613 : vector<1x1x16x36xf32> to vector<16x36xf32>
    %615 = vector.shape_cast %612 : vector<16x36xf32> to vector<1x1x16x36xf32>
    tpu.vector_store %arg4[%c0_103, %c3_104, %c0_105, %c0_106], %615 {strides = array<i32>} : memref<1x8x16x36xf32, #tpu.memory_space<vmem>>, vector<1x1x16x36xf32>,
    %c64 = arith.constant 64 : index
    %616 = memref.load %arg2[%c64] : memref<128xf32, #tpu.memory_space<smem>>
    %617 = vector.broadcast %616 : f32 to vector<19x40xf32>
    %618 = arith.mulf %42, %617 : vector<19x40xf32>
    %c65 = arith.constant 65 : index
    %619 = memref.load %arg2[%c65] : memref<128xf32, #tpu.memory_space<smem>>
    %620 = vector.broadcast %619 : f32 to vector<19x40xf32>
    %621 = arith.mulf %42, %620 : vector<19x40xf32>
    %c66 = arith.constant 66 : index
    %622 = memref.load %arg2[%c66] : memref<128xf32, #tpu.memory_space<smem>>
    %623 = vector.broadcast %622 : f32 to vector<19x40xf32>
    %624 = arith.mulf %77, %623 : vector<19x40xf32>
    %625 = arith.addf %618, %624 : vector<19x40xf32>
    %c67 = arith.constant 67 : index
    %626 = memref.load %arg2[%c67] : memref<128xf32, #tpu.memory_space<smem>>
    %627 = vector.broadcast %626 : f32 to vector<19x40xf32>
    %628 = arith.mulf %77, %627 : vector<19x40xf32>
    %629 = arith.addf %621, %628 : vector<19x40xf32>
    %c68 = arith.constant 68 : index
    %630 = memref.load %arg2[%c68] : memref<128xf32, #tpu.memory_space<smem>>
    %631 = vector.broadcast %630 : f32 to vector<19x40xf32>
    %632 = arith.mulf %112, %631 : vector<19x40xf32>
    %633 = arith.addf %625, %632 : vector<19x40xf32>
    %c69 = arith.constant 69 : index
    %634 = memref.load %arg2[%c69] : memref<128xf32, #tpu.memory_space<smem>>
    %635 = vector.broadcast %634 : f32 to vector<19x40xf32>
    %636 = arith.mulf %112, %635 : vector<19x40xf32>
    %637 = arith.addf %629, %636 : vector<19x40xf32>
    %c70 = arith.constant 70 : index
    %638 = memref.load %arg2[%c70] : memref<128xf32, #tpu.memory_space<smem>>
    %639 = vector.broadcast %638 : f32 to vector<19x40xf32>
    %640 = arith.mulf %147, %639 : vector<19x40xf32>
    %641 = arith.addf %633, %640 : vector<19x40xf32>
    %c71 = arith.constant 71 : index
    %642 = memref.load %arg2[%c71] : memref<128xf32, #tpu.memory_space<smem>>
    %643 = vector.broadcast %642 : f32 to vector<19x40xf32>
    %644 = arith.mulf %147, %643 : vector<19x40xf32>
    %645 = arith.addf %637, %644 : vector<19x40xf32>
    %c72 = arith.constant 72 : index
    %646 = memref.load %arg2[%c72] : memref<128xf32, #tpu.memory_space<smem>>
    %647 = vector.broadcast %646 : f32 to vector<19x40xf32>
    %648 = arith.mulf %182, %647 : vector<19x40xf32>
    %649 = arith.addf %641, %648 : vector<19x40xf32>
    %c73 = arith.constant 73 : index
    %650 = memref.load %arg2[%c73] : memref<128xf32, #tpu.memory_space<smem>>
    %651 = vector.broadcast %650 : f32 to vector<19x40xf32>
    %652 = arith.mulf %182, %651 : vector<19x40xf32>
    %653 = arith.addf %645, %652 : vector<19x40xf32>
    %c74 = arith.constant 74 : index
    %654 = memref.load %arg2[%c74] : memref<128xf32, #tpu.memory_space<smem>>
    %655 = vector.broadcast %654 : f32 to vector<19x40xf32>
    %656 = arith.mulf %217, %655 : vector<19x40xf32>
    %657 = arith.addf %649, %656 : vector<19x40xf32>
    %c75 = arith.constant 75 : index
    %658 = memref.load %arg2[%c75] : memref<128xf32, #tpu.memory_space<smem>>
    %659 = vector.broadcast %658 : f32 to vector<19x40xf32>
    %660 = arith.mulf %217, %659 : vector<19x40xf32>
    %661 = arith.addf %653, %660 : vector<19x40xf32>
    %c76 = arith.constant 76 : index
    %662 = memref.load %arg2[%c76] : memref<128xf32, #tpu.memory_space<smem>>
    %663 = vector.broadcast %662 : f32 to vector<19x40xf32>
    %664 = arith.mulf %252, %663 : vector<19x40xf32>
    %665 = arith.addf %657, %664 : vector<19x40xf32>
    %c77 = arith.constant 77 : index
    %666 = memref.load %arg2[%c77] : memref<128xf32, #tpu.memory_space<smem>>
    %667 = vector.broadcast %666 : f32 to vector<19x40xf32>
    %668 = arith.mulf %252, %667 : vector<19x40xf32>
    %669 = arith.addf %661, %668 : vector<19x40xf32>
    %c78 = arith.constant 78 : index
    %670 = memref.load %arg2[%c78] : memref<128xf32, #tpu.memory_space<smem>>
    %671 = vector.broadcast %670 : f32 to vector<19x40xf32>
    %672 = arith.mulf %287, %671 : vector<19x40xf32>
    %673 = arith.addf %665, %672 : vector<19x40xf32>
    %c79 = arith.constant 79 : index
    %674 = memref.load %arg2[%c79] : memref<128xf32, #tpu.memory_space<smem>>
    %675 = vector.broadcast %674 : f32 to vector<19x40xf32>
    %676 = arith.mulf %287, %675 : vector<19x40xf32>
    %677 = arith.addf %669, %676 : vector<19x40xf32>
    %678 = vector.extract_strided_slice %673 {offsets = [0, 0], sizes = [19, 39], strides = [1, 1]} : vector<19x40xf32> to vector<19x39xf32>
    %679 = vector.extract_strided_slice %677 {offsets = [0, 1], sizes = [19, 39], strides = [1, 1]} : vector<19x40xf32> to vector<19x39xf32>
    %680 = arith.addf %678, %679 : vector<19x39xf32>
    %681 = vector.extract_strided_slice %680 {offsets = [0, 0], sizes = [18, 39], strides = [1, 1]} : vector<19x39xf32> to vector<18x39xf32>
    %682 = vector.extract_strided_slice %680 {offsets = [1, 0], sizes = [18, 39], strides = [1, 1]} : vector<19x39xf32> to vector<18x39xf32>
    %683 = arith.maximumf %681, %682 : vector<18x39xf32>
    %684 = vector.extract_strided_slice %683 {offsets = [0, 0], sizes = [16, 39], strides = [1, 1]} : vector<18x39xf32> to vector<16x39xf32>
    %685 = vector.extract_strided_slice %683 {offsets = [2, 0], sizes = [16, 39], strides = [1, 1]} : vector<18x39xf32> to vector<16x39xf32>
    %686 = arith.maximumf %684, %685 : vector<16x39xf32>
    %687 = vector.extract_strided_slice %686 {offsets = [0, 0], sizes = [16, 38], strides = [1, 1]} : vector<16x39xf32> to vector<16x38xf32>
    %688 = vector.extract_strided_slice %686 {offsets = [0, 1], sizes = [16, 38], strides = [1, 1]} : vector<16x39xf32> to vector<16x38xf32>
    %689 = arith.maximumf %687, %688 : vector<16x38xf32>
    %690 = vector.extract_strided_slice %689 {offsets = [0, 0], sizes = [16, 36], strides = [1, 1]} : vector<16x38xf32> to vector<16x36xf32>
    %691 = vector.extract_strided_slice %689 {offsets = [0, 2], sizes = [16, 36], strides = [1, 1]} : vector<16x38xf32> to vector<16x36xf32>
    %692 = arith.maximumf %690, %691 : vector<16x36xf32>
    %cst_107 = arith.constant 0.000000e+00 : f32
    %693 = vector.broadcast %cst_107 : f32 to vector<16x36xf32>
    %694 = arith.maximumf %692, %693 : vector<16x36xf32>
    %c0_108 = arith.constant 0 : index
    %c4_109 = arith.constant 4 : index
    %c0_110 = arith.constant 0 : index
    %c0_111 = arith.constant 0 : index
    %695 = vector.load %arg4[%c0_108, %c4_109, %c0_110, %c0_111] : memref<1x8x16x36xf32, #tpu.memory_space<vmem>>, vector<1x1x16x36xf32>
    %696 = vector.shape_cast %695 : vector<1x1x16x36xf32> to vector<16x36xf32>
    %697 = vector.shape_cast %694 : vector<16x36xf32> to vector<1x1x16x36xf32>
    tpu.vector_store %arg4[%c0_108, %c4_109, %c0_110, %c0_111], %697 {strides = array<i32>} : memref<1x8x16x36xf32, #tpu.memory_space<vmem>>, vector<1x1x16x36xf32>,
    %c80 = arith.constant 80 : index
    %698 = memref.load %arg2[%c80] : memref<128xf32, #tpu.memory_space<smem>>
    %699 = vector.broadcast %698 : f32 to vector<19x40xf32>
    %700 = arith.mulf %42, %699 : vector<19x40xf32>
    %c81 = arith.constant 81 : index
    %701 = memref.load %arg2[%c81] : memref<128xf32, #tpu.memory_space<smem>>
    %702 = vector.broadcast %701 : f32 to vector<19x40xf32>
    %703 = arith.mulf %42, %702 : vector<19x40xf32>
    %c82 = arith.constant 82 : index
    %704 = memref.load %arg2[%c82] : memref<128xf32, #tpu.memory_space<smem>>
    %705 = vector.broadcast %704 : f32 to vector<19x40xf32>
    %706 = arith.mulf %77, %705 : vector<19x40xf32>
    %707 = arith.addf %700, %706 : vector<19x40xf32>
    %c83 = arith.constant 83 : index
    %708 = memref.load %arg2[%c83] : memref<128xf32, #tpu.memory_space<smem>>
    %709 = vector.broadcast %708 : f32 to vector<19x40xf32>
    %710 = arith.mulf %77, %709 : vector<19x40xf32>
    %711 = arith.addf %703, %710 : vector<19x40xf32>
    %c84 = arith.constant 84 : index
    %712 = memref.load %arg2[%c84] : memref<128xf32, #tpu.memory_space<smem>>
    %713 = vector.broadcast %712 : f32 to vector<19x40xf32>
    %714 = arith.mulf %112, %713 : vector<19x40xf32>
    %715 = arith.addf %707, %714 : vector<19x40xf32>
    %c85 = arith.constant 85 : index
    %716 = memref.load %arg2[%c85] : memref<128xf32, #tpu.memory_space<smem>>
    %717 = vector.broadcast %716 : f32 to vector<19x40xf32>
    %718 = arith.mulf %112, %717 : vector<19x40xf32>
    %719 = arith.addf %711, %718 : vector<19x40xf32>
    %c86 = arith.constant 86 : index
    %720 = memref.load %arg2[%c86] : memref<128xf32, #tpu.memory_space<smem>>
    %721 = vector.broadcast %720 : f32 to vector<19x40xf32>
    %722 = arith.mulf %147, %721 : vector<19x40xf32>
    %723 = arith.addf %715, %722 : vector<19x40xf32>
    %c87 = arith.constant 87 : index
    %724 = memref.load %arg2[%c87] : memref<128xf32, #tpu.memory_space<smem>>
    %725 = vector.broadcast %724 : f32 to vector<19x40xf32>
    %726 = arith.mulf %147, %725 : vector<19x40xf32>
    %727 = arith.addf %719, %726 : vector<19x40xf32>
    %c88 = arith.constant 88 : index
    %728 = memref.load %arg2[%c88] : memref<128xf32, #tpu.memory_space<smem>>
    %729 = vector.broadcast %728 : f32 to vector<19x40xf32>
    %730 = arith.mulf %182, %729 : vector<19x40xf32>
    %731 = arith.addf %723, %730 : vector<19x40xf32>
    %c89 = arith.constant 89 : index
    %732 = memref.load %arg2[%c89] : memref<128xf32, #tpu.memory_space<smem>>
    %733 = vector.broadcast %732 : f32 to vector<19x40xf32>
    %734 = arith.mulf %182, %733 : vector<19x40xf32>
    %735 = arith.addf %727, %734 : vector<19x40xf32>
    %c90 = arith.constant 90 : index
    %736 = memref.load %arg2[%c90] : memref<128xf32, #tpu.memory_space<smem>>
    %737 = vector.broadcast %736 : f32 to vector<19x40xf32>
    %738 = arith.mulf %217, %737 : vector<19x40xf32>
    %739 = arith.addf %731, %738 : vector<19x40xf32>
    %c91 = arith.constant 91 : index
    %740 = memref.load %arg2[%c91] : memref<128xf32, #tpu.memory_space<smem>>
    %741 = vector.broadcast %740 : f32 to vector<19x40xf32>
    %742 = arith.mulf %217, %741 : vector<19x40xf32>
    %743 = arith.addf %735, %742 : vector<19x40xf32>
    %c92 = arith.constant 92 : index
    %744 = memref.load %arg2[%c92] : memref<128xf32, #tpu.memory_space<smem>>
    %745 = vector.broadcast %744 : f32 to vector<19x40xf32>
    %746 = arith.mulf %252, %745 : vector<19x40xf32>
    %747 = arith.addf %739, %746 : vector<19x40xf32>
    %c93 = arith.constant 93 : index
    %748 = memref.load %arg2[%c93] : memref<128xf32, #tpu.memory_space<smem>>
    %749 = vector.broadcast %748 : f32 to vector<19x40xf32>
    %750 = arith.mulf %252, %749 : vector<19x40xf32>
    %751 = arith.addf %743, %750 : vector<19x40xf32>
    %c94 = arith.constant 94 : index
    %752 = memref.load %arg2[%c94] : memref<128xf32, #tpu.memory_space<smem>>
    %753 = vector.broadcast %752 : f32 to vector<19x40xf32>
    %754 = arith.mulf %287, %753 : vector<19x40xf32>
    %755 = arith.addf %747, %754 : vector<19x40xf32>
    %c95 = arith.constant 95 : index
    %756 = memref.load %arg2[%c95] : memref<128xf32, #tpu.memory_space<smem>>
    %757 = vector.broadcast %756 : f32 to vector<19x40xf32>
    %758 = arith.mulf %287, %757 : vector<19x40xf32>
    %759 = arith.addf %751, %758 : vector<19x40xf32>
    %760 = vector.extract_strided_slice %755 {offsets = [0, 0], sizes = [19, 39], strides = [1, 1]} : vector<19x40xf32> to vector<19x39xf32>
    %761 = vector.extract_strided_slice %759 {offsets = [0, 1], sizes = [19, 39], strides = [1, 1]} : vector<19x40xf32> to vector<19x39xf32>
    %762 = arith.addf %760, %761 : vector<19x39xf32>
    %763 = vector.extract_strided_slice %762 {offsets = [0, 0], sizes = [18, 39], strides = [1, 1]} : vector<19x39xf32> to vector<18x39xf32>
    %764 = vector.extract_strided_slice %762 {offsets = [1, 0], sizes = [18, 39], strides = [1, 1]} : vector<19x39xf32> to vector<18x39xf32>
    %765 = arith.maximumf %763, %764 : vector<18x39xf32>
    %766 = vector.extract_strided_slice %765 {offsets = [0, 0], sizes = [16, 39], strides = [1, 1]} : vector<18x39xf32> to vector<16x39xf32>
    %767 = vector.extract_strided_slice %765 {offsets = [2, 0], sizes = [16, 39], strides = [1, 1]} : vector<18x39xf32> to vector<16x39xf32>
    %768 = arith.maximumf %766, %767 : vector<16x39xf32>
    %769 = vector.extract_strided_slice %768 {offsets = [0, 0], sizes = [16, 38], strides = [1, 1]} : vector<16x39xf32> to vector<16x38xf32>
    %770 = vector.extract_strided_slice %768 {offsets = [0, 1], sizes = [16, 38], strides = [1, 1]} : vector<16x39xf32> to vector<16x38xf32>
    %771 = arith.maximumf %769, %770 : vector<16x38xf32>
    %772 = vector.extract_strided_slice %771 {offsets = [0, 0], sizes = [16, 36], strides = [1, 1]} : vector<16x38xf32> to vector<16x36xf32>
    %773 = vector.extract_strided_slice %771 {offsets = [0, 2], sizes = [16, 36], strides = [1, 1]} : vector<16x38xf32> to vector<16x36xf32>
    %774 = arith.maximumf %772, %773 : vector<16x36xf32>
    %cst_112 = arith.constant 0.000000e+00 : f32
    %775 = vector.broadcast %cst_112 : f32 to vector<16x36xf32>
    %776 = arith.maximumf %774, %775 : vector<16x36xf32>
    %c0_113 = arith.constant 0 : index
    %c5_114 = arith.constant 5 : index
    %c0_115 = arith.constant 0 : index
    %c0_116 = arith.constant 0 : index
    %777 = vector.load %arg4[%c0_113, %c5_114, %c0_115, %c0_116] : memref<1x8x16x36xf32, #tpu.memory_space<vmem>>, vector<1x1x16x36xf32>
    %778 = vector.shape_cast %777 : vector<1x1x16x36xf32> to vector<16x36xf32>
    %779 = vector.shape_cast %776 : vector<16x36xf32> to vector<1x1x16x36xf32>
    tpu.vector_store %arg4[%c0_113, %c5_114, %c0_115, %c0_116], %779 {strides = array<i32>} : memref<1x8x16x36xf32, #tpu.memory_space<vmem>>, vector<1x1x16x36xf32>,
    %c96 = arith.constant 96 : index
    %780 = memref.load %arg2[%c96] : memref<128xf32, #tpu.memory_space<smem>>
    %781 = vector.broadcast %780 : f32 to vector<19x40xf32>
    %782 = arith.mulf %42, %781 : vector<19x40xf32>
    %c97 = arith.constant 97 : index
    %783 = memref.load %arg2[%c97] : memref<128xf32, #tpu.memory_space<smem>>
    %784 = vector.broadcast %783 : f32 to vector<19x40xf32>
    %785 = arith.mulf %42, %784 : vector<19x40xf32>
    %c98 = arith.constant 98 : index
    %786 = memref.load %arg2[%c98] : memref<128xf32, #tpu.memory_space<smem>>
    %787 = vector.broadcast %786 : f32 to vector<19x40xf32>
    %788 = arith.mulf %77, %787 : vector<19x40xf32>
    %789 = arith.addf %782, %788 : vector<19x40xf32>
    %c99 = arith.constant 99 : index
    %790 = memref.load %arg2[%c99] : memref<128xf32, #tpu.memory_space<smem>>
    %791 = vector.broadcast %790 : f32 to vector<19x40xf32>
    %792 = arith.mulf %77, %791 : vector<19x40xf32>
    %793 = arith.addf %785, %792 : vector<19x40xf32>
    %c100 = arith.constant 100 : index
    %794 = memref.load %arg2[%c100] : memref<128xf32, #tpu.memory_space<smem>>
    %795 = vector.broadcast %794 : f32 to vector<19x40xf32>
    %796 = arith.mulf %112, %795 : vector<19x40xf32>
    %797 = arith.addf %789, %796 : vector<19x40xf32>
    %c101 = arith.constant 101 : index
    %798 = memref.load %arg2[%c101] : memref<128xf32, #tpu.memory_space<smem>>
    %799 = vector.broadcast %798 : f32 to vector<19x40xf32>
    %800 = arith.mulf %112, %799 : vector<19x40xf32>
    %801 = arith.addf %793, %800 : vector<19x40xf32>
    %c102 = arith.constant 102 : index
    %802 = memref.load %arg2[%c102] : memref<128xf32, #tpu.memory_space<smem>>
    %803 = vector.broadcast %802 : f32 to vector<19x40xf32>
    %804 = arith.mulf %147, %803 : vector<19x40xf32>
    %805 = arith.addf %797, %804 : vector<19x40xf32>
    %c103 = arith.constant 103 : index
    %806 = memref.load %arg2[%c103] : memref<128xf32, #tpu.memory_space<smem>>
    %807 = vector.broadcast %806 : f32 to vector<19x40xf32>
    %808 = arith.mulf %147, %807 : vector<19x40xf32>
    %809 = arith.addf %801, %808 : vector<19x40xf32>
    %c104 = arith.constant 104 : index
    %810 = memref.load %arg2[%c104] : memref<128xf32, #tpu.memory_space<smem>>
    %811 = vector.broadcast %810 : f32 to vector<19x40xf32>
    %812 = arith.mulf %182, %811 : vector<19x40xf32>
    %813 = arith.addf %805, %812 : vector<19x40xf32>
    %c105 = arith.constant 105 : index
    %814 = memref.load %arg2[%c105] : memref<128xf32, #tpu.memory_space<smem>>
    %815 = vector.broadcast %814 : f32 to vector<19x40xf32>
    %816 = arith.mulf %182, %815 : vector<19x40xf32>
    %817 = arith.addf %809, %816 : vector<19x40xf32>
    %c106 = arith.constant 106 : index
    %818 = memref.load %arg2[%c106] : memref<128xf32, #tpu.memory_space<smem>>
    %819 = vector.broadcast %818 : f32 to vector<19x40xf32>
    %820 = arith.mulf %217, %819 : vector<19x40xf32>
    %821 = arith.addf %813, %820 : vector<19x40xf32>
    %c107 = arith.constant 107 : index
    %822 = memref.load %arg2[%c107] : memref<128xf32, #tpu.memory_space<smem>>
    %823 = vector.broadcast %822 : f32 to vector<19x40xf32>
    %824 = arith.mulf %217, %823 : vector<19x40xf32>
    %825 = arith.addf %817, %824 : vector<19x40xf32>
    %c108 = arith.constant 108 : index
    %826 = memref.load %arg2[%c108] : memref<128xf32, #tpu.memory_space<smem>>
    %827 = vector.broadcast %826 : f32 to vector<19x40xf32>
    %828 = arith.mulf %252, %827 : vector<19x40xf32>
    %829 = arith.addf %821, %828 : vector<19x40xf32>
    %c109 = arith.constant 109 : index
    %830 = memref.load %arg2[%c109] : memref<128xf32, #tpu.memory_space<smem>>
    %831 = vector.broadcast %830 : f32 to vector<19x40xf32>
    %832 = arith.mulf %252, %831 : vector<19x40xf32>
    %833 = arith.addf %825, %832 : vector<19x40xf32>
    %c110 = arith.constant 110 : index
    %834 = memref.load %arg2[%c110] : memref<128xf32, #tpu.memory_space<smem>>
    %835 = vector.broadcast %834 : f32 to vector<19x40xf32>
    %836 = arith.mulf %287, %835 : vector<19x40xf32>
    %837 = arith.addf %829, %836 : vector<19x40xf32>
    %c111 = arith.constant 111 : index
    %838 = memref.load %arg2[%c111] : memref<128xf32, #tpu.memory_space<smem>>
    %839 = vector.broadcast %838 : f32 to vector<19x40xf32>
    %840 = arith.mulf %287, %839 : vector<19x40xf32>
    %841 = arith.addf %833, %840 : vector<19x40xf32>
    %842 = vector.extract_strided_slice %837 {offsets = [0, 0], sizes = [19, 39], strides = [1, 1]} : vector<19x40xf32> to vector<19x39xf32>
    %843 = vector.extract_strided_slice %841 {offsets = [0, 1], sizes = [19, 39], strides = [1, 1]} : vector<19x40xf32> to vector<19x39xf32>
    %844 = arith.addf %842, %843 : vector<19x39xf32>
    %845 = vector.extract_strided_slice %844 {offsets = [0, 0], sizes = [18, 39], strides = [1, 1]} : vector<19x39xf32> to vector<18x39xf32>
    %846 = vector.extract_strided_slice %844 {offsets = [1, 0], sizes = [18, 39], strides = [1, 1]} : vector<19x39xf32> to vector<18x39xf32>
    %847 = arith.maximumf %845, %846 : vector<18x39xf32>
    %848 = vector.extract_strided_slice %847 {offsets = [0, 0], sizes = [16, 39], strides = [1, 1]} : vector<18x39xf32> to vector<16x39xf32>
    %849 = vector.extract_strided_slice %847 {offsets = [2, 0], sizes = [16, 39], strides = [1, 1]} : vector<18x39xf32> to vector<16x39xf32>
    %850 = arith.maximumf %848, %849 : vector<16x39xf32>
    %851 = vector.extract_strided_slice %850 {offsets = [0, 0], sizes = [16, 38], strides = [1, 1]} : vector<16x39xf32> to vector<16x38xf32>
    %852 = vector.extract_strided_slice %850 {offsets = [0, 1], sizes = [16, 38], strides = [1, 1]} : vector<16x39xf32> to vector<16x38xf32>
    %853 = arith.maximumf %851, %852 : vector<16x38xf32>
    %854 = vector.extract_strided_slice %853 {offsets = [0, 0], sizes = [16, 36], strides = [1, 1]} : vector<16x38xf32> to vector<16x36xf32>
    %855 = vector.extract_strided_slice %853 {offsets = [0, 2], sizes = [16, 36], strides = [1, 1]} : vector<16x38xf32> to vector<16x36xf32>
    %856 = arith.maximumf %854, %855 : vector<16x36xf32>
    %cst_117 = arith.constant 0.000000e+00 : f32
    %857 = vector.broadcast %cst_117 : f32 to vector<16x36xf32>
    %858 = arith.maximumf %856, %857 : vector<16x36xf32>
    %c0_118 = arith.constant 0 : index
    %c6_119 = arith.constant 6 : index
    %c0_120 = arith.constant 0 : index
    %c0_121 = arith.constant 0 : index
    %859 = vector.load %arg4[%c0_118, %c6_119, %c0_120, %c0_121] : memref<1x8x16x36xf32, #tpu.memory_space<vmem>>, vector<1x1x16x36xf32>
    %860 = vector.shape_cast %859 : vector<1x1x16x36xf32> to vector<16x36xf32>
    %861 = vector.shape_cast %858 : vector<16x36xf32> to vector<1x1x16x36xf32>
    tpu.vector_store %arg4[%c0_118, %c6_119, %c0_120, %c0_121], %861 {strides = array<i32>} : memref<1x8x16x36xf32, #tpu.memory_space<vmem>>, vector<1x1x16x36xf32>,
    %c112 = arith.constant 112 : index
    %862 = memref.load %arg2[%c112] : memref<128xf32, #tpu.memory_space<smem>>
    %863 = vector.broadcast %862 : f32 to vector<19x40xf32>
    %864 = arith.mulf %42, %863 : vector<19x40xf32>
    %c113 = arith.constant 113 : index
    %865 = memref.load %arg2[%c113] : memref<128xf32, #tpu.memory_space<smem>>
    %866 = vector.broadcast %865 : f32 to vector<19x40xf32>
    %867 = arith.mulf %42, %866 : vector<19x40xf32>
    %c114 = arith.constant 114 : index
    %868 = memref.load %arg2[%c114] : memref<128xf32, #tpu.memory_space<smem>>
    %869 = vector.broadcast %868 : f32 to vector<19x40xf32>
    %870 = arith.mulf %77, %869 : vector<19x40xf32>
    %871 = arith.addf %864, %870 : vector<19x40xf32>
    %c115 = arith.constant 115 : index
    %872 = memref.load %arg2[%c115] : memref<128xf32, #tpu.memory_space<smem>>
    %873 = vector.broadcast %872 : f32 to vector<19x40xf32>
    %874 = arith.mulf %77, %873 : vector<19x40xf32>
    %875 = arith.addf %867, %874 : vector<19x40xf32>
    %c116 = arith.constant 116 : index
    %876 = memref.load %arg2[%c116] : memref<128xf32, #tpu.memory_space<smem>>
    %877 = vector.broadcast %876 : f32 to vector<19x40xf32>
    %878 = arith.mulf %112, %877 : vector<19x40xf32>
    %879 = arith.addf %871, %878 : vector<19x40xf32>
    %c117 = arith.constant 117 : index
    %880 = memref.load %arg2[%c117] : memref<128xf32, #tpu.memory_space<smem>>
    %881 = vector.broadcast %880 : f32 to vector<19x40xf32>
    %882 = arith.mulf %112, %881 : vector<19x40xf32>
    %883 = arith.addf %875, %882 : vector<19x40xf32>
    %c118 = arith.constant 118 : index
    %884 = memref.load %arg2[%c118] : memref<128xf32, #tpu.memory_space<smem>>
    %885 = vector.broadcast %884 : f32 to vector<19x40xf32>
    %886 = arith.mulf %147, %885 : vector<19x40xf32>
    %887 = arith.addf %879, %886 : vector<19x40xf32>
    %c119 = arith.constant 119 : index
    %888 = memref.load %arg2[%c119] : memref<128xf32, #tpu.memory_space<smem>>
    %889 = vector.broadcast %888 : f32 to vector<19x40xf32>
    %890 = arith.mulf %147, %889 : vector<19x40xf32>
    %891 = arith.addf %883, %890 : vector<19x40xf32>
    %c120 = arith.constant 120 : index
    %892 = memref.load %arg2[%c120] : memref<128xf32, #tpu.memory_space<smem>>
    %893 = vector.broadcast %892 : f32 to vector<19x40xf32>
    %894 = arith.mulf %182, %893 : vector<19x40xf32>
    %895 = arith.addf %887, %894 : vector<19x40xf32>
    %c121 = arith.constant 121 : index
    %896 = memref.load %arg2[%c121] : memref<128xf32, #tpu.memory_space<smem>>
    %897 = vector.broadcast %896 : f32 to vector<19x40xf32>
    %898 = arith.mulf %182, %897 : vector<19x40xf32>
    %899 = arith.addf %891, %898 : vector<19x40xf32>
    %c122 = arith.constant 122 : index
    %900 = memref.load %arg2[%c122] : memref<128xf32, #tpu.memory_space<smem>>
    %901 = vector.broadcast %900 : f32 to vector<19x40xf32>
    %902 = arith.mulf %217, %901 : vector<19x40xf32>
    %903 = arith.addf %895, %902 : vector<19x40xf32>
    %c123 = arith.constant 123 : index
    %904 = memref.load %arg2[%c123] : memref<128xf32, #tpu.memory_space<smem>>
    %905 = vector.broadcast %904 : f32 to vector<19x40xf32>
    %906 = arith.mulf %217, %905 : vector<19x40xf32>
    %907 = arith.addf %899, %906 : vector<19x40xf32>
    %c124 = arith.constant 124 : index
    %908 = memref.load %arg2[%c124] : memref<128xf32, #tpu.memory_space<smem>>
    %909 = vector.broadcast %908 : f32 to vector<19x40xf32>
    %910 = arith.mulf %252, %909 : vector<19x40xf32>
    %911 = arith.addf %903, %910 : vector<19x40xf32>
    %c125 = arith.constant 125 : index
    %912 = memref.load %arg2[%c125] : memref<128xf32, #tpu.memory_space<smem>>
    %913 = vector.broadcast %912 : f32 to vector<19x40xf32>
    %914 = arith.mulf %252, %913 : vector<19x40xf32>
    %915 = arith.addf %907, %914 : vector<19x40xf32>
    %c126 = arith.constant 126 : index
    %916 = memref.load %arg2[%c126] : memref<128xf32, #tpu.memory_space<smem>>
    %917 = vector.broadcast %916 : f32 to vector<19x40xf32>
    %918 = arith.mulf %287, %917 : vector<19x40xf32>
    %919 = arith.addf %911, %918 : vector<19x40xf32>
    %c127 = arith.constant 127 : index
    %920 = memref.load %arg2[%c127] : memref<128xf32, #tpu.memory_space<smem>>
    %921 = vector.broadcast %920 : f32 to vector<19x40xf32>
    %922 = arith.mulf %287, %921 : vector<19x40xf32>
    %923 = arith.addf %915, %922 : vector<19x40xf32>
    %924 = vector.extract_strided_slice %919 {offsets = [0, 0], sizes = [19, 39], strides = [1, 1]} : vector<19x40xf32> to vector<19x39xf32>
    %925 = vector.extract_strided_slice %923 {offsets = [0, 1], sizes = [19, 39], strides = [1, 1]} : vector<19x40xf32> to vector<19x39xf32>
    %926 = arith.addf %924, %925 : vector<19x39xf32>
    %927 = vector.extract_strided_slice %926 {offsets = [0, 0], sizes = [18, 39], strides = [1, 1]} : vector<19x39xf32> to vector<18x39xf32>
    %928 = vector.extract_strided_slice %926 {offsets = [1, 0], sizes = [18, 39], strides = [1, 1]} : vector<19x39xf32> to vector<18x39xf32>
    %929 = arith.maximumf %927, %928 : vector<18x39xf32>
    %930 = vector.extract_strided_slice %929 {offsets = [0, 0], sizes = [16, 39], strides = [1, 1]} : vector<18x39xf32> to vector<16x39xf32>
    %931 = vector.extract_strided_slice %929 {offsets = [2, 0], sizes = [16, 39], strides = [1, 1]} : vector<18x39xf32> to vector<16x39xf32>
    %932 = arith.maximumf %930, %931 : vector<16x39xf32>
    %933 = vector.extract_strided_slice %932 {offsets = [0, 0], sizes = [16, 38], strides = [1, 1]} : vector<16x39xf32> to vector<16x38xf32>
    %934 = vector.extract_strided_slice %932 {offsets = [0, 1], sizes = [16, 38], strides = [1, 1]} : vector<16x39xf32> to vector<16x38xf32>
    %935 = arith.maximumf %933, %934 : vector<16x38xf32>
    %936 = vector.extract_strided_slice %935 {offsets = [0, 0], sizes = [16, 36], strides = [1, 1]} : vector<16x38xf32> to vector<16x36xf32>
    %937 = vector.extract_strided_slice %935 {offsets = [0, 2], sizes = [16, 36], strides = [1, 1]} : vector<16x38xf32> to vector<16x36xf32>
    %938 = arith.maximumf %936, %937 : vector<16x36xf32>
    %cst_122 = arith.constant 0.000000e+00 : f32
    %939 = vector.broadcast %cst_122 : f32 to vector<16x36xf32>
    %940 = arith.maximumf %938, %939 : vector<16x36xf32>
    %c0_123 = arith.constant 0 : index
    %c7_124 = arith.constant 7 : index
    %c0_125 = arith.constant 0 : index
    %c0_126 = arith.constant 0 : index
    %941 = vector.load %arg4[%c0_123, %c7_124, %c0_125, %c0_126] : memref<1x8x16x36xf32, #tpu.memory_space<vmem>>, vector<1x1x16x36xf32>
    %942 = vector.shape_cast %941 : vector<1x1x16x36xf32> to vector<16x36xf32>
    %943 = vector.shape_cast %940 : vector<16x36xf32> to vector<1x1x16x36xf32>
    tpu.vector_store %arg4[%c0_123, %c7_124, %c0_125, %c0_126], %943 {strides = array<i32>} : memref<1x8x16x36xf32, #tpu.memory_space<vmem>>, vector<1x1x16x36xf32>,
    return
  }
  func.func @transform_0(%arg0: i32) -> i32 {
    %c0_i32 = arith.constant 0 : i32
    %c0_i32_0 = arith.constant 0 : i32
    return %c0_i32 : i32
  }
  func.func @transform_1(%arg0: i32) -> i32 {
    %c0_i32 = arith.constant 0 : i32
    %c0_i32_0 = arith.constant 0 : i32
    return %c0_i32 : i32
  }
  func.func @transform_2(%arg0: i32) -> (i32, i32, i32, i32) {
    %c0_i32 = arith.constant 0 : i32
    %c0_i32_0 = arith.constant 0 : i32
    %c0_i32_1 = arith.constant 0 : i32
    %c0_i32_2 = arith.constant 0 : i32
    return %arg0, %c0_i32, %c0_i32_0, %c0_i32_1 : i32, i32, i32, i32
  }
  func.func @transform_3(%arg0: i32) -> (i32, i32, i32, i32) {
    %c0_i32 = arith.constant 0 : i32
    %c0_i32_0 = arith.constant 0 : i32
    %c0_i32_1 = arith.constant 0 : i32
    %c0_i32_2 = arith.constant 0 : i32
    return %arg0, %c0_i32, %c0_i32_0, %c0_i32_1 : i32, i32, i32, i32
  }
}

</mosaic_0001>

<bundles_post_ra>
// kernel: tpu_custom_call.1
= control target key start
LH: loop header
LB: loop body
LE: loop exit
PB: predicated region body
PF: predicated region fallthrough
CT: control target
= control target key end

     0   :  { %8 = vsyncpa [#allocation4], 0  ;;  %s5006_s0 = inlined_call_operand.vmem [shape: f32[64], index: 0, kind: input, shape index: {}]   ;;  %s5007_s1 = inlined_call_operand.vmem [shape: f32[128], index: 1, kind: input, shape index: {}]   ;;  %s5008_s2 = inlined_call_operand.vmem [shape: f32[1,4,20,40], index: 2, kind: input, shape index: {}]   ;;  %s5009_s3 = inlined_call_operand.hbm [shape: f32[1,8,16,36], index: 3, kind: output, shape index: {}]  }
   0x1   :  { %9 = vsyncpa [#allocation6], 0 }
   0x2   :  { %10 = vsyncpa [#allocation3], 0  ;;  %s17_s14 = sshll.u32 %s5006_s0, 4  ;;  %s27_s17 = sshll.u32 %s5007_s1, 4  ;;  %s18_s14 = int_to_ptr.vmem [resolvable:$true] %s17_s14  ;;  %s28_s17 = int_to_ptr.vmem [resolvable:$true] %s27_s17 }
   0x3   :  { %s2393_s18 = scalar_lea.vmem %s18_s14, 16  ;;  %p2398_p1 = scmp.lt.s32.totalorder %s18_s14, %s18_s14 }
   0x4   :  { %p2394_p0 = scmp.ne.s32.totalorder %s18_s14, %s2393_s18  ;;  %p2399_p2 = scmp.lt.s32.totalorder %s2393_s18, %s2393_s18 }
   0x6   :  { %p2400_p3 = por %p2399_p2, %p2398_p1 }
   0x8   :  { %p2401_p4 = pnand %p2400_p3, %p2394_p0 }
   0xa   :  { %2404 = shalt.err (!%p2401_p4)
}
   0xb   :  { %s2443_s19 = smov [#allocation2]   ;;  %s2405_s20 = scalar_lea.vmem %s28_s17, 16 }
   0xc   :  { %20 = dma.vmem_to_smem %s18_s14, 16, %s2443_s19, [#allocation4]  }
   0xd   :  { %p2406_p5 = scmp.ne.s32.totalorder %s28_s17, %s2405_s20  ;;  %p2410_p6 = scmp.lt.s32.totalorder %s28_s17, %s28_s17 }
   0xe   :  { %p2411_p7 = scmp.lt.s32.totalorder %s2405_s20, %s2405_s20 }
  0x10   :  { %p2412_p8 = por %p2411_p7, %p2410_p6 }
  0x12   :  { %p2413_p9 = pnand %p2412_p8, %p2406_p5 }
  0x14   :  { %2416 = shalt.err (!%p2413_p9)
}
  0x15   :  { %s2444_s0 = smov [#allocation5]  }
  0x16   :  { %30 = dma.vmem_to_smem %s28_s17, 16, %s2444_s0, [#allocation6]  }
  0x17   :  { %2437 = dma.done.wait [#allocation4], 16  }
  0x18   :  { %2438 = vsyncadd [#allocation4], 4294967280 }
  0x19   :  { %2439 = dma.done.wait [#allocation6], 16  }
  0x1a   :  { %2440 = vsyncadd [#allocation6], 4294967280 }
  0x1b   :  { %39 = sfence }
  0x1c   :  { %s55_s1 = sld [smem:[#allocation2]]  ;;  %v2479_v0 = vld [vmem:[%s5008_s2 + $0x10] sm:$0xf]  ;;  %v2486_v1 = vld [vmem:[%s5008_s2] sm:$0xff]  ;;  %v2493_v3 = vld [vmem:[%s5008_s2 + $0x8] sm:$0xff]  ;;  %vm116_vm0 = vcmask 1046528  }
  0x1d   :  { %s2188_s21 = sld [smem:[#allocation2 + $0x1]]  ;;  %v2498_v4 = vld [vmem:[%s5008_s2 + $0x18] sm:$0xff]  ;;  %v2503_v5 = vld [vmem:[%s5008_s2 + $0x28] sm:$0xf]  ;;  %v2512_v9 = vld [vmem:[%s5008_s2 + $0x20] sm:$0xff]  ;;  %vm810_vm1 = vcmask 1045504  }
  0x1e   :  { %s2189_s22 = sld [smem:[#allocation2 + $0x2]]  ;;  %v2524_v14 = vld [vmem:[%s5008_s2 + $0x30] sm:$0xff]  ;;  %v2529_v15 = vld [vmem:[%s5008_s2 + $0x40] sm:$0xf]  ;;  %v2539_v20 = vld [vmem:[%s5008_s2 + $0x38] sm:$0xff]  ;;  %vm842_vm2 = vcmask 293888  }
  0x1f   :  { %s2190_s23 = sld [smem:[#allocation2 + $0x3]]  ;;  %v2553_v25 = vld [vmem:[%s5008_s2 + $0x48] sm:$0xff]  ;;  %v2564_v30 = vld [vmem:[%s5008_s2 + $0x50] sm:$0xff]  ;;  %v2569_v31 = vld [vmem:[%s5008_s2 + $0x58] sm:$0xf] }
  0x20   :  { %s2191_s24 = sld [smem:[#allocation2 + $0x4]] }
  0x21   :  { %s2481_s27 = sld [smem:[#allocation2 + $0x5]] }
  0x22   :  { %v56_v2 = vstv %s55_s1  ;;  %s2488_s30 = sld [smem:[#allocation2 + $0x6]] }
  0x23   :  { %v59_v6 = vmul.f32 %v56_v2, %v2479_v0  ;;  %v61_v7 = vstv %s2188_s21  ;;  %s2506_s10 = sld [smem:[#allocation2 + $0x7]]  ;;  %v57_v8 = vmul.f32 %v56_v2, %v2486_v1  ;;  %v2519_v13 = vmul.f32 %v56_v2, %v2493_v3 }
  0x24   :  { %v64_v10 = vmul.f32 %v61_v7, %v2479_v0  ;;  %v66_v11 = vstv %s2189_s22  ;;  %s2515_s13 = sld [smem:[#allocation2 + $0x8]]  ;;  %v62_v12 = vmul.f32 %v61_v7, %v2486_v1  ;;  %v63_v18 = vmul.f32 %v61_v7, %v2493_v3 }
  0x25   :  { %5260 = vst [vmem:[#allocation11_spill] sm:$0xff] %v2519_v13  ;;  %v69_v16 = vmul.f32 %v2503_v5, %v66_v11  ;;  %v74_v17 = vstv %s2190_s23  ;;  %s2532_s18 = sld [smem:[#allocation2 + $0x9]]  ;;  %v67_v19 = vmul.f32 %v2498_v4, %v66_v11  ;;  %v2548_v24 = vmul.f32 %v2512_v9, %v66_v11 }
  0x26   :  { %v75_v21 = vmul.f32 %v2498_v4, %v74_v17  ;;  %v77_v22 = vmul.f32 %v2503_v5, %v74_v17  ;;  %v2543_v23 = vstv %s2191_s24  ;;  %s2545_s0 = sld [smem:[#allocation2 + $0xa]]  ;;  %v76_v27 = vmul.f32 %v2512_v9, %v74_v17 }
  0x27   :  { %5261 = vst [vmem:[#allocation12_spill] sm:$0xff] %v2543_v23  ;;  %5262 = vst [vmem:[#allocation13_spill] sm:$0xff] %v2548_v24  ;;  %v72_v26 = vadd.f32 %v69_v16, %v59_v6  ;;  %v85_v28 = vmul.f32 %v2529_v15, %v2543_v23  ;;  %v90_v29 = vstv %s2481_s27  ;;  %s2559_s22 = sld [smem:[#allocation2 + $0xb]]  ;;  %v2575_v35 = vadd.f32 %v67_v19, %v57_v8 }
  0x28   :  { %v80_v32 = vadd.f32 %v77_v22, %v64_v10  ;;  %v2572_v33 = vmul.f32 %v2524_v14, %v90_v29  ;;  %v93_v34 = vmul.f32 %v2529_v15, %v90_v29  ;;  %s2199_s27 = sld [smem:[#allocation2 + $0xc]]  ;;  %v2578_v37 = vmul.f32 %v2539_v20, %v90_v29 }
  0x29   :  { %v88_v36 = vadd.f32 %v85_v28, %v72_v26  ;;  %v2581_v38 = vstv %s2488_s30  ;;  %v106_v39 = vstv %s2506_s10  ;;  %s2200_s28 = sld [smem:[#allocation2 + $0xd]]  ;;  %v2591_v43 = vadd.f32 %v75_v21, %v62_v12 }
  0x2a   :  { %5263 = vst [vmem:[#allocation14_spill] sm:$0xff] %v2581_v38  ;;  %v96_v40 = vadd.f32 %v93_v34, %v80_v32  ;;  %v101_v41 = vmul.f32 %v2569_v31, %v2581_v38  ;;  %v2587_v42 = vmul.f32 %v2553_v25, %v106_v39  ;;  %s2589_s29 = sld [smem:[#allocation2 + $0xe]]  ;;  %v2594_v44 = vmul.f32 %v2564_v30, %v106_v39 }
  0x2b   :  { %v109_v45 = vmul.f32 %v2569_v31, %v106_v39  ;;  %v2598_v46 = vstv %s2515_s13  ;;  %v137_v47 = vstv %s2532_s18  ;;  %s2202_s30 = sld [smem:[#allocation2 + $0xf]]  ;;  %v2609_v51 = vadd.f32 %v76_v27, %v63_v18 }
  0x2c   :  { %v135_v48 = vmul.f32 %v2598_v46, %v2479_v0  ;;  %v140_v49 = vmul.f32 %v137_v47, %v2479_v0  ;;  %v2605_v50 = vstv %s2545_s0  ;;  %s2607_s4 = sld [smem:[#allocation2 + $0x10]]  ;;  %v104_v52 = vadd.f32 %v101_v41, %v88_v36 }
  0x2d   :  { %v2611_v53 = vadd.f32 %v109_v45, %v96_v40  ;;  %v145_v54 = vmul.f32 %v2503_v5, %v2605_v50  ;;  %v150_v55 = vstv %s2559_s22  ;;  %s2204_s5 = sld [smem:[#allocation2 + $0x11]]  ;;  %v2623_v59 = vmul.f32 %v137_v47, %v2486_v1 }
  0x2e   :  { %v2617_v56 = vmul.f32 %v2498_v4, %v150_v55  ;;  %v153_v57 = vmul.f32 %v2503_v5, %v150_v55  ;;  %v2620_v58 = vstv %s2199_s27  ;;  %s2205_s6 = sld [smem:[#allocation2 + $0x12]]  ;;  %v2629_v2 = vmul.f32 %v2512_v9, %v150_v55 }
  0x2f   :  { %5264 = vst [vmem:[#allocation15_spill] sm:$0xff] %v2611_v53  ;;  %v5011_v60 = vrot.slane %v2611_v53, 1  ;;  %v148_v61 = vadd.f32 %v145_v54, %v135_v48  ;;  %v161_v62 = vmul.f32 %v2529_v15, %v2620_v58  ;;  %v166_v63 = vstv %s2200_s28  ;;  %s2206_s7 = sld [smem:[#allocation2 + $0x13]] }
  0x30   :  { %v156_v6 = vadd.f32 %v153_v57, %v140_v49  ;;  %v2632_v7 = vmul.f32 %v2524_v14, %v166_v63  ;;  %v169_v8 = vmul.f32 %v2529_v15, %v166_v63  ;;  %s2207_s8 = sld [smem:[#allocation2 + $0x14]]  ;;  %v2638_v12 = vstv %s2589_s29 }
  0x31   :  { %v127_v10 = vadd.f32 %v5011_v60, %v104_v52  ;;  %v164_v11 = vadd.f32 %v161_v62, %v148_v61  ;;  %v182_v16 = vstv %s2202_s30  ;;  %s2208_s9 = sld [smem:[#allocation2 + $0x15]]  ;;  %v2641_v17 = vmul.f32 %v2539_v20, %v166_v63 }
  0x32   :  { %v172_v18 = vadd.f32 %v169_v8, %v156_v6  ;;  %v177_v19 = vmul.f32 %v2569_v31, %v2638_v12  ;;  %v2646_v21 = vmul.f32 %v2553_v25, %v182_v16  ;;  %s2648_s10 = sld [smem:[#allocation2 + $0x16]]  ;;  %v2651_v22 = vmul.f32 %v2564_v30, %v182_v16 }
  0x33   :  { %v185_v26 = vmul.f32 %v2569_v31, %v182_v16  ;;  %v2655_v27 = vstv %s2607_s4  ;;  %v2657_v28 = vstv %s2204_s5  ;;  %s2210_s11 = sld [smem:[#allocation2 + $0x17]]  ;;  %v2659_v29 = vmax.f32 %v127_v10, 0.0 }
  0x34   :  { %v210_v32 = vmul.f32 %v2655_v27, %v2479_v0  ;;  %v215_v34 = vmul.f32 %v2657_v28, %v2479_v0  ;;  %v2665_v36 = vstv %s2205_s6  ;;  %s2667_s12 = sld [smem:[#allocation2 + $0x18]]  ;;  %v180_v39 = vadd.f32 %v177_v19, %v164_v11 }
  0x35   :  { %5265 = vst [vmem:[#allocation16_spill] sm:$0xff] %v2659_v29  ;;  %v2669_v40 = vadd.f32 %v185_v26, %v172_v18  ;;  %v220_v41 = vmul.f32 %v2503_v5, %v2665_v36  ;;  %v225_v45 = vstv %s2206_s7  ;;  %s2212_s13 = sld [smem:[#allocation2 + $0x19]]  ;;  %v2680_v54 = vmul.f32 %v137_v47, %v2493_v3 }
  0x36   :  { %v2674_v48 = vmul.f32 %v2498_v4, %v225_v45  ;;  %v228_v49 = vmul.f32 %v2503_v5, %v225_v45  ;;  %v2677_v52 = vstv %s2207_s8  ;;  %s2213_s14 = sld [smem:[#allocation2 + $0x1a]]  ;;  %v2686_v63 = vmul.f32 %v2512_v9, %v225_v45 }
  0x37   :  { %5266 = vst [vmem:[#allocation17_spill] sm:$0xff] %v2669_v40  ;;  %5267 = vst [vmem:[#allocation18_spill] sm:$0xff] %v2677_v52  ;;  %v5010_v55 = vrot.slane %v2669_v40, 1  ;;  %v223_v57 = vadd.f32 %v220_v41, %v210_v32  ;;  %v236_v61 = vmul.f32 %v2529_v15, %v2677_v52  ;;  %v241_v62 = vstv %s2208_s9  ;;  %s2214_s15 = sld [smem:[#allocation2 + $0x1b]] }
  0x38   :  { %5268 = vst [vmem:[#allocation19_spill] sm:$0xff] %v2686_v63  ;;  %v231_v6 = vadd.f32 %v228_v49, %v215_v34  ;;  %v2689_v8 = vmul.f32 %v2524_v14, %v241_v62  ;;  %v244_v10 = vmul.f32 %v2529_v15, %v241_v62  ;;  %s2215_s16 = sld [smem:[#allocation2 + $0x1c]]  ;;  %v2695_v16 = vstv %s2648_s10 }
  0x39   :  { %v202_v47 = vadd.f32 %v5010_v55, %v180_v39  ;;  %v239_v11 = vadd.f32 %v236_v61, %v223_v57  ;;  %5270 = vst [vmem:[#allocation21_spill] sm:$0xff] %v2695_v16  ;;  %v257_v18 = vstv %s2210_s11  ;;  %s2216_s17 = sld [smem:[#allocation2 + $0x1d]]  ;;  %v2698_v19 = vmul.f32 %v2539_v20, %v241_v62 }
  0x3a   :  { %5269 = vst [vmem:[#allocation20_spill] sm:$0xff] %v2689_v8  ;;  %v247_v26 = vadd.f32 %v244_v10, %v231_v6  ;;  %v252_v32 = vmul.f32 %v2569_v31, %v2695_v16  ;;  %v2703_v34 = vmul.f32 %v2553_v25, %v257_v18  ;;  %s2705_s18 = sld [smem:[#allocation2 + $0x1e]]  ;;  %v2708_v41 = vmul.f32 %v2564_v30, %v257_v18 }
  0x3b   :  { %5271 = vst [vmem:[#allocation22_spill] sm:$0xff] %v2698_v19  ;;  %v260_v39 = vmul.f32 %v2569_v31, %v257_v18  ;;  %v2712_v45 = vstv %s2667_s12  ;;  %v2714_v49 = vstv %s2212_s13  ;;  %s2218_s19 = sld [smem:[#allocation2 + $0x1f]]  ;;  %v2716_v57 = vmax.f32 %v202_v47, 0.0 }
  0x3c   :  { %5272 = vst [vmem:[#allocation23_spill] sm:$0xff] %v2703_v34  ;;  %5273 = vst [vmem:[#allocation24_spill] sm:$0xff] %v2708_v41  ;;  %v285_v61 = vmul.f32 %v2712_v45, %v2479_v0  ;;  %v290_v62 = vmul.f32 %v2714_v49, %v2479_v0  ;;  %v2722_v6 = vstv %s2213_s14  ;;  %s2724_s20 = sld [smem:[#allocation2 + $0x20]]  ;;  %v255_v10 = vadd.f32 %v252_v32, %v239_v11 }
  0x3d   :  { %5274 = vst [vmem:[#allocation25_spill] sm:$0xff] %v2712_v45  ;;  %5275 = vst [vmem:[#allocation26_spill] sm:$0xff] %v2716_v57  ;;  %v2726_v55 = vadd.f32 %v260_v39, %v247_v26  ;;  %v295_v18 = vmul.f32 %v2503_v5, %v2722_v6  ;;  %v300_v60 = vstv %s2214_s15  ;;  %s2220_s0 = sld [smem:[#allocation2 + $0x21]]  ;;  %v2738_v24 = vmul.f32 %v2657_v28, %v2486_v1 }
  0x3e   :  { %5276 = vst [vmem:[#allocation27_spill] sm:$0xff] %v2722_v6  ;;  %v2731_v47 = vmul.f32 %v2498_v4, %v300_v60  ;;  %v303_v40 = vmul.f32 %v2503_v5, %v300_v60  ;;  %v2734_v53 = vstv %s2215_s16  ;;  %s2221_s1 = sld [smem:[#allocation2 + $0x22]]  ;;  %v2744_v13 = vmul.f32 %v2512_v9, %v300_v60 }
  0x3f   :  { %5277 = vst [vmem:[#allocation28_spill] sm:$0xff] %v2726_v55  ;;  %5279 = vst [vmem:[#allocation30_spill] sm:$0xff] %v2734_v53  ;;  %v5021_v11 = vrot.slane %v2726_v55, 1  ;;  %v298_v26 = vadd.f32 %v295_v18, %v285_v61  ;;  %v311_v32 = vmul.f32 %v2529_v15, %v2734_v53  ;;  %v316_v39 = vstv %s2216_s17  ;;  %s2222_s21 = sld [smem:[#allocation2 + $0x23]] }
  0x40   :  { %5278 = vst [vmem:[#allocation29_spill] sm:$0xff] %v2731_v47  ;;  %5280 = vst [vmem:[#allocation31_spill] sm:$0xff] %v2744_v13  ;;  %v306_v41 = vadd.f32 %v303_v40, %v290_v62  ;;  %v2747_v47 = vmul.f32 %v2524_v14, %v316_v39  ;;  %v319_v34 = vmul.f32 %v2529_v15, %v316_v39  ;;  %s2223_s22 = sld [smem:[#allocation2 + $0x24]]  ;;  %v2753_v18 = vstv %s2705_s18 }
  0x41   :  { %v277_v6 = vadd.f32 %v5021_v11, %v255_v10  ;;  %v314_v61 = vadd.f32 %v311_v32, %v298_v26  ;;  %5282 = vst [vmem:[#allocation33_spill] sm:$0xff] %v2753_v18  ;;  %v332_v53 = vstv %s2218_s19  ;;  %s2224_s23 = sld [smem:[#allocation2 + $0x25]]  ;;  %v2756_v45 = vmul.f32 %v2539_v20, %v316_v39 }
  0x42   :  { %5281 = vst [vmem:[#allocation32_spill] sm:$0xff] %v2747_v47  ;;  %v322_v60 = vadd.f32 %v319_v34, %v306_v41  ;;  %v327_v40 = vmul.f32 %v2569_v31, %v2753_v18  ;;  %v2761_v62 = vmul.f32 %v2553_v25, %v332_v53  ;;  %s2763_s24 = sld [smem:[#allocation2 + $0x26]]  ;;  %v2766_v55 = vmul.f32 %v2564_v30, %v332_v53 }
  0x43   :  { %5283 = vst [vmem:[#allocation34_spill] sm:$0xff] %v2756_v45  ;;  %v335_v10 = vmul.f32 %v2569_v31, %v332_v53  ;;  %v2770_v26 = vstv %s2724_s20  ;;  %v2772_v32 = vstv %s2220_s0  ;;  %s2226_s25 = sld [smem:[#allocation2 + $0x27]]  ;;  %v2774_v39 = vmax.f32 %v277_v6, 0.0 }
  0x44   :  { %5284 = vst [vmem:[#allocation35_spill] sm:$0xff] %v2761_v62  ;;  %5285 = vst [vmem:[#allocation36_spill] sm:$0xff] %v2766_v55  ;;  %v360_v34 = vmul.f32 %v2770_v26, %v2479_v0  ;;  %v365_v41 = vmul.f32 %v2772_v32, %v2479_v0  ;;  %v2780_v11 = vstv %s2221_s1  ;;  %s2782_s26 = sld [smem:[#allocation2 + $0x28]]  ;;  %v330_v55 = vadd.f32 %v327_v40, %v314_v61 }
  0x45   :  { %5286 = vst [vmem:[#allocation37_spill] sm:$0xff] %v2770_v26  ;;  %5287 = vst [vmem:[#allocation38_spill] sm:$0xff] %v2774_v39  ;;  %v2784_v62 = vadd.f32 %v335_v10, %v322_v60  ;;  %v370_v53 = vmul.f32 %v2503_v5, %v2780_v11  ;;  %v375_v18 = vstv %s2222_s21  ;;  %s2228_s27 = sld [smem:[#allocation2 + $0x29]]  ;;  %v2796_v47 = vmul.f32 %v2657_v28, %v2493_v3 }
  0x46   :  { %5288 = vst [vmem:[#allocation39_spill] sm:$0xff] %v2780_v11  ;;  %v2789_v6 = vmul.f32 %v2498_v4, %v375_v18  ;;  %v378_v26 = vmul.f32 %v2503_v5, %v375_v18  ;;  %v2792_v45 = vstv %s2223_s22  ;;  %s2229_s28 = sld [smem:[#allocation2 + $0x2a]] }
  0x47   :  { %5289 = vst [vmem:[#allocation40_spill] sm:$0xff] %v2784_v62  ;;  %5291 = vst [vmem:[#allocation42_spill] sm:$0xff] %v2792_v45  ;;  %v5033_v61 = vrot.slane %v2784_v62, 1  ;;  %v373_v60 = vadd.f32 %v370_v53, %v360_v34  ;;  %v386_v40 = vmul.f32 %v2529_v15, %v2792_v45  ;;  %v391_v10 = vstv %s2224_s23  ;;  %s2230_s29 = sld [smem:[#allocation2 + $0x2b]] }
  0x48   :  { %5290 = vst [vmem:[#allocation41_spill] sm:$0xff] %v2789_v6  ;;  %v2802_v6 = vmul.f32 %v2512_v9, %v375_v18  ;;  %v381_v11 = vadd.f32 %v378_v26, %v365_v41  ;;  %v2805_v13 = vmul.f32 %v2524_v14, %v391_v10  ;;  %v394_v19 = vmul.f32 %v2529_v15, %v391_v10  ;;  %s2231_s30 = sld [smem:[#allocation2 + $0x2c]] }
  0x49   :  { %v352_v28 = vadd.f32 %v5033_v61, %v330_v55  ;;  %v389_v34 = vadd.f32 %v386_v40, %v373_v60  ;;  %v2811_v53 = vstv %s2763_s24  ;;  %v407_v45 = vstv %s2226_s25  ;;  %s2232_s4 = sld [smem:[#allocation2 + $0x2d]] }
  0x4a   :  { %5292 = vst [vmem:[#allocation43_spill] sm:$0xff] %v2802_v6  ;;  %5293 = vst [vmem:[#allocation44_spill] sm:$0xff] %v2805_v13  ;;  %v2814_v16 = vmul.f32 %v2539_v20, %v391_v10  ;;  %v397_v18 = vadd.f32 %v394_v19, %v381_v11  ;;  %v402_v26 = vmul.f32 %v2569_v31, %v2811_v53  ;;  %s2821_s5 = sld [smem:[#allocation2 + $0x2e]]  ;;  %v2828_v60 = vstv %s2782_s26 }
  0x4b   :  { %5294 = vst [vmem:[#allocation45_spill] sm:$0xff] %v2811_v53  ;;  %v2819_v41 = vmul.f32 %v2553_v25, %v407_v45  ;;  %v2824_v62 = vmul.f32 %v2564_v30, %v407_v45  ;;  %v410_v55 = vmul.f32 %v2569_v31, %v407_v45  ;;  %5298 = vst [vmem:[#allocation49_spill] sm:$0xff] %v2828_v60  ;;  %v2830_v40 = vstv %s2228_s27  ;;  %s2234_s6 = sld [smem:[#allocation2 + $0x2f]] }
  0x4c   :  { %5295 = vst [vmem:[#allocation46_spill] sm:$0xff] %v2814_v16  ;;  %v2832_v10 = vmax.f32 %v352_v28, 0.0  ;;  %v435_v19 = vmul.f32 %v2828_v60, %v2479_v0  ;;  %v440_v11 = vmul.f32 %v2830_v40, %v2479_v0  ;;  %v2838_v61 = vstv %s2229_s28  ;;  %s2840_s7 = sld [smem:[#allocation2 + $0x30]] }
  0x4d   :  { %5296 = vst [vmem:[#allocation47_spill] sm:$0xff] %v2819_v41  ;;  %5297 = vst [vmem:[#allocation48_spill] sm:$0xff] %v2824_v62  ;;  %v405_v62 = vadd.f32 %v402_v26, %v389_v34  ;;  %v2842_v41 = vadd.f32 %v410_v55, %v397_v18  ;;  %v445_v45 = vmul.f32 %v2503_v5, %v2838_v61  ;;  %v450_v16 = vstv %s2230_s29  ;;  %s2236_s8 = sld [smem:[#allocation2 + $0x31]] }
  0x4e   :  { %5299 = vst [vmem:[#allocation50_spill] sm:$0xff] %v2832_v10  ;;  %5300 = vst [vmem:[#allocation51_spill] sm:$0xff] %v2838_v61  ;;  %v2847_v28 = vmul.f32 %v2498_v4, %v450_v16  ;;  %v453_v60 = vmul.f32 %v2503_v5, %v450_v16  ;;  %v2850_v53 = vstv %s2231_s30  ;;  %s2237_s9 = sld [smem:[#allocation2 + $0x32]]  ;;  %v2854_v13 = vmul.f32 %v2714_v49, %v2486_v1 }
  0x4f   :  { %5301 = vst [vmem:[#allocation52_spill] sm:$0xff] %v2842_v41  ;;  %5303 = vst [vmem:[#allocation54_spill] sm:$0xff] %v2850_v53  ;;  %v5045_v34 = vrot.slane %v2842_v41, 1  ;;  %v448_v18 = vadd.f32 %v445_v45, %v435_v19  ;;  %v461_v26 = vmul.f32 %v2529_v15, %v2850_v53  ;;  %v466_v55 = vstv %s2232_s4  ;;  %s2238_s10 = sld [smem:[#allocation2 + $0x33]] }
  0x50   :  { %5302 = vst [vmem:[#allocation53_spill] sm:$0xff] %v2847_v28  ;;  %5304 = vst [vmem:[#allocation55_spill] sm:$0xff] %v2854_v13  ;;  %v2860_v28 = vmul.f32 %v2512_v9, %v450_v16  ;;  %v456_v61 = vadd.f32 %v453_v60, %v440_v11  ;;  %v2863_v6 = vmul.f32 %v2524_v14, %v466_v55  ;;  %s2239_s11 = sld [smem:[#allocation2 + $0x34]]  ;;  %v2869_v45 = vstv %s2821_s5 }
  0x51   :  { %v469_v8 = vmul.f32 %v2529_v15, %v466_v55  ;;  %v427_v13 = vadd.f32 %v5045_v34, %v405_v62  ;;  %v464_v19 = vadd.f32 %v461_v26, %v448_v18  ;;  %5307 = vst [vmem:[#allocation58_spill] sm:$0xff] %v2869_v45  ;;  %v482_v53 = vstv %s2234_s6  ;;  %s2240_s12 = sld [smem:[#allocation2 + $0x35]] }
  0x52   :  { %5305 = vst [vmem:[#allocation56_spill] sm:$0xff] %v2860_v28  ;;  %5306 = vst [vmem:[#allocation57_spill] sm:$0xff] %v2863_v6  ;;  %v2872_v52 = vmul.f32 %v2539_v20, %v466_v55  ;;  %v477_v60 = vmul.f32 %v2569_v31, %v2869_v45  ;;  %v2877_v11 = vmul.f32 %v2553_v25, %v482_v53  ;;  %s2879_s13 = sld [smem:[#allocation2 + $0x36]]  ;;  %v2886_v18 = vstv %s2840_s7 }
  0x53   :  { %v472_v16 = vadd.f32 %v469_v8, %v456_v61  ;;  %v2882_v41 = vmul.f32 %v2564_v30, %v482_v53  ;;  %v485_v62 = vmul.f32 %v2569_v31, %v482_v53  ;;  %5311 = vst [vmem:[#allocation62_spill] sm:$0xff] %v2886_v18  ;;  %v2888_v26 = vstv %s2236_s8  ;;  %s2242_s14 = sld [smem:[#allocation2 + $0x37]] }
  0x54   :  { %5308 = vst [vmem:[#allocation59_spill] sm:$0xff] %v2872_v52  ;;  %5309 = vst [vmem:[#allocation60_spill] sm:$0xff] %v2877_v11  ;;  %v2890_v55 = vmax.f32 %v427_v13, 0.0  ;;  %v510_v8 = vmul.f32 %v2886_v18, %v2479_v0  ;;  %v515_v61 = vmul.f32 %v2888_v26, %v2479_v0  ;;  %v2896_v34 = vstv %s2237_s9  ;;  %s2898_s15 = sld [smem:[#allocation2 + $0x38]] }
  0x55   :  { %5310 = vst [vmem:[#allocation61_spill] sm:$0xff] %v2882_v41  ;;  %5313 = vst [vmem:[#allocation64_spill] sm:$0xff] %v2896_v34  ;;  %v480_v41 = vadd.f32 %v477_v60, %v464_v19  ;;  %v2900_v11 = vadd.f32 %v485_v62, %v472_v16  ;;  %v520_v53 = vmul.f32 %v2503_v5, %v2896_v34  ;;  %v525_v45 = vstv %s2238_s10  ;;  %s2244_s16 = sld [smem:[#allocation2 + $0x39]] }
  0x56   :  { %5312 = vst [vmem:[#allocation63_spill] sm:$0xff] %v2890_v55  ;;  %v2905_v13 = vmul.f32 %v2498_v4, %v525_v45  ;;  %v528_v18 = vmul.f32 %v2503_v5, %v525_v45  ;;  %v2908_v52 = vstv %s2239_s11  ;;  %s2245_s17 = sld [smem:[#allocation2 + $0x3a]]  ;;  %v2912_v6 = vmul.f32 %v2714_v49, %v2493_v3 }
  0x57   :  { %5314 = vst [vmem:[#allocation65_spill] sm:$0xff] %v2900_v11  ;;  %5316 = vst [vmem:[#allocation67_spill] sm:$0xff] %v2908_v52  ;;  %v5055_v19 = vrot.slane %v2900_v11, 1  ;;  %v523_v16 = vadd.f32 %v520_v53, %v510_v8  ;;  %v536_v60 = vmul.f32 %v2529_v15, %v2908_v52  ;;  %v541_v62 = vstv %s2240_s12  ;;  %s2246_s18 = sld [smem:[#allocation2 + $0x3b]] }
  0x58   :  { %5315 = vst [vmem:[#allocation66_spill] sm:$0xff] %v2905_v13  ;;  %5317 = vst [vmem:[#allocation68_spill] sm:$0xff] %v2912_v6  ;;  %v2918_v13 = vmul.f32 %v2512_v9, %v525_v45  ;;  %v531_v34 = vadd.f32 %v528_v18, %v515_v61  ;;  %v2921_v28 = vmul.f32 %v2524_v14, %v541_v62  ;;  %s2247_s19 = sld [smem:[#allocation2 + $0x3c]]  ;;  %v2927_v53 = vstv %s2879_s13 }
  0x59   :  { %v544_v63 = vmul.f32 %v2529_v15, %v541_v62  ;;  %v502_v49 = vadd.f32 %v5055_v19, %v480_v41  ;;  %v539_v8 = vadd.f32 %v536_v60, %v523_v16  ;;  %5320 = vst [vmem:[#allocation71_spill] sm:$0xff] %v2927_v53  ;;  %v557_v52 = vstv %s2242_s14  ;;  %s2248_s20 = sld [smem:[#allocation2 + $0x3d]] }
  0x5a   :  { %5318 = vst [vmem:[#allocation69_spill] sm:$0xff] %v2918_v13  ;;  %5319 = vst [vmem:[#allocation70_spill] sm:$0xff] %v2921_v28  ;;  %v2930_v6 = vmul.f32 %v2539_v20, %v541_v62  ;;  %v552_v18 = vmul.f32 %v2569_v31, %v2927_v53  ;;  %v2935_v61 = vmul.f32 %v2553_v25, %v557_v52  ;;  %s2937_s0 = sld [smem:[#allocation2 + $0x3e]]  ;;  %v2944_v16 = vstv %s2898_s15 }
  0x5b   :  { %v547_v45 = vadd.f32 %v544_v63, %v531_v34  ;;  %v2940_v11 = vmul.f32 %v2564_v30, %v557_v52  ;;  %v560_v41 = vmul.f32 %v2569_v31, %v557_v52  ;;  %5324 = vst [vmem:[#allocation75_spill] sm:$0xff] %v2944_v16  ;;  %v2946_v60 = vstv %s2244_s16  ;;  %s2250_s1 = sld [smem:[#allocation2 + $0x3f]] }
  0x5c   :  { %5321 = vst [vmem:[#allocation72_spill] sm:$0xff] %v2930_v6  ;;  %5322 = vst [vmem:[#allocation73_spill] sm:$0xff] %v2935_v61  ;;  %v2948_v62 = vmax.f32 %v502_v49, 0.0  ;;  %v585_v63 = vmul.f32 %v2944_v16, %v2479_v0  ;;  %v590_v34 = vmul.f32 %v2946_v60, %v2479_v0  ;;  %v2954_v19 = vstv %s2245_s17  ;;  %s2956_s21 = sld [smem:[#allocation5 + $0x21]] }
  0x5d   :  { %5323 = vst [vmem:[#allocation74_spill] sm:$0xff] %v2940_v11  ;;  %5326 = vst [vmem:[#allocation77_spill] sm:$0xff] %v2954_v19  ;;  %v555_v11 = vadd.f32 %v552_v18, %v539_v8  ;;  %v2958_v61 = vadd.f32 %v560_v41, %v547_v45  ;;  %v595_v52 = vmul.f32 %v2503_v5, %v2954_v19  ;;  %v600_v53 = vstv %s2246_s18  ;;  %s2285_s22 = sld [smem:[#allocation5 + $0x23]]  ;;  %s2445_s18 = smov 127  }
  0x5e   :  { %5325 = vst [vmem:[#allocation76_spill] sm:$0xff] %v2948_v62  ;;  %v2963_v49 = vmul.f32 %v2498_v4, %v600_v53  ;;  %v603_v16 = vmul.f32 %v2503_v5, %v600_v53  ;;  %v2966_v6 = vstv %s2247_s19  ;;  %s2287_s23 = sld [smem:[#allocation5 + $0x25]]  ;;  %v2970_v0 = vmul.f32 %v2772_v32, %v2486_v1 }
  0x5f   :  { %5327 = vst [vmem:[#allocation78_spill] sm:$0xff] %v2958_v61  ;;  %5329 = vst [vmem:[#allocation80_spill] sm:$0xff] %v2966_v6  ;;  %v5064_v8 = vrot.slane %v2958_v61, 1  ;;  %v598_v45 = vadd.f32 %v595_v52, %v585_v63  ;;  %v611_v18 = vmul.f32 %v2529_v15, %v2966_v6  ;;  %v616_v41 = vstv %s2248_s20  ;;  %s2289_s24 = sld [smem:[#allocation5 + $0x27]] }
  0x60   :  { %5328 = vst [vmem:[#allocation79_spill] sm:$0xff] %v2963_v49  ;;  %5330 = vst [vmem:[#allocation81_spill] sm:$0xff] %v2970_v0  ;;  %v2976_v49 = vmul.f32 %v2512_v9, %v600_v53  ;;  %v606_v5 = vadd.f32 %v603_v16, %v590_v34  ;;  %v2979_v19 = vmul.f32 %v2524_v14, %v616_v41  ;;  %s2291_s25 = sld [smem:[#allocation5 + $0x29]]  ;;  %v2985_v52 = vstv %s2937_s0 }
  0x61   :  { %v619_v28 = vmul.f32 %v2529_v15, %v616_v41  ;;  %v577_v13 = vadd.f32 %v5064_v8, %v555_v11  ;;  %v614_v63 = vadd.f32 %v611_v18, %v598_v45  ;;  %5331 = vst [vmem:[#allocation82_spill] sm:$0xff] %v2985_v52  ;;  %v632_v6 = vstv %s2250_s1  ;;  %s2293_s26 = sld [smem:[#allocation5 + $0x2b]] }
  0x62   :  { %v2988_v0 = vmul.f32 %v2539_v20, %v616_v41  ;;  %v627_v53 = vmul.f32 %v2569_v31, %v2985_v52  ;;  %v2993_v16 = vmul.f32 %v2553_v25, %v632_v6  ;;  %s2295_s27 = sld [smem:[#allocation5 + $0x2d]]  ;;  %v2996_v15 = vmul.f32 %v2564_v30, %v632_v6 }
  0x63   :  { %v622_v9 = vadd.f32 %v619_v28, %v606_v5  ;;  %v635_v11 = vmul.f32 %v2569_v31, %v632_v6  ;;  %v3000_v34 = vstv %s2956_s21  ;;  %v3002_v45 = vstv %s2285_s22  ;;  %s2297_s28 = sld [smem:[#allocation5 + $0x2f]] }
  0x64   :  { %5332 = vst [vmem:[#allocation83_spill] sm:$0xff] %v2988_v0  ;;  %5333 = vst [vmem:[#allocation84_spill] sm:$0xff] %v2993_v16  ;;  %v3004_v20 = vmax.f32 %v577_v13, 0.0  ;;  %v1042_v28 = vmul.f32 %v3000_v34, %v2659_v29  ;;  %v1055_v18 = vmul.f32 %v3002_v45, %v2716_v57  ;;  %v3010_v41 = vstv %s2287_s23  ;;  %s2251_s29 = sld [smem:[#allocation5 + $0x1]] }
  0x65   :  { %5334 = vst [vmem:[#allocation85_spill] sm:$0xff] %v2996_v15  ;;  %5335 = vst [vmem:[#allocation86_spill] sm:$0xff] %v3000_v34  ;;  %v630_v30 = vadd.f32 %v627_v53, %v614_v63  ;;  %v3012_v5 = vadd.f32 %v635_v11, %v622_v9  ;;  %v1071_v31 = vmul.f32 %v3010_v41, %v2774_v39  ;;  %v3016_v6 = vstv %s2289_s24  ;;  %s2253_s30 = sld [smem:[#allocation5 + $0x3]] }
  0x66   :  { %5336 = vst [vmem:[#allocation87_spill] sm:$0xff] %v3002_v45  ;;  %5337 = vst [vmem:[#allocation88_spill] sm:$0xff] %v3004_v20  ;;  %v1058_v13 = vadd.f32 %v1055_v18, %v1042_v28  ;;  %v1087_v8 = vmul.f32 %v3016_v6, %v2832_v10  ;;  %v3020_v34 = vstv %s2291_s25  ;;  %v3024_v45 = vmul.f32 %v2772_v32, %v2493_v3  ;;  %s2255_s4 = sld [smem:[#allocation5 + $0x5]] }
  0x67   :  { %5338 = vst [vmem:[#allocation89_spill] sm:$0xff] %v3010_v41  ;;  %5339 = vst [vmem:[#allocation90_spill] sm:$0xff] %v3012_v5  ;;  %v5078_v63 = vrot.slane %v3012_v5, 1  ;;  %v1103_v9 = vmul.f32 %v3020_v34, %v2890_v55  ;;  %v3029_v53 = vstv %s2293_s26  ;;  %v3033_v11 = vmul.f32 %v2830_v40, %v2486_v1  ;;  %s2257_s5 = sld [smem:[#allocation5 + $0x7]] }
  0x68   :  { %5340 = vst [vmem:[#allocation91_spill] sm:$0xff] %v3016_v6  ;;  %5341 = vst [vmem:[#allocation92_spill] sm:$0xff] %v3020_v34  ;;  %v1074_v28 = vadd.f32 %v1071_v31, %v1058_v13  ;;  %v1119_v18 = vmul.f32 %v3029_v53, %v2948_v62  ;;  %v3037_v6 = vstv %s2295_s27  ;;  %v3041_v32 = vmul.f32 %v2830_v40, %v2493_v3  ;;  %s2259_s6 = sld [smem:[#allocation5 + $0x9]] }
  0x69   :  { %5342 = vst [vmem:[#allocation93_spill] sm:$0xff] %v3029_v53  ;;  %5343 = vst [vmem:[#allocation94_spill] sm:$0xff] %v3037_v6  ;;  %v652_v34 = vadd.f32 %v5078_v63, %v630_v30  ;;  %v1135_v41 = vmul.f32 %v3037_v6, %v3004_v20  ;;  %v3047_v61 = vstv %s2297_s28  ;;  %v3051_v31 = vmul.f32 %v2888_v26, %v2486_v1  ;;  %s2261_s7 = sld [smem:[#allocation5 + $0xb]] }
  0x6a   :  { %5344 = vst [vmem:[#allocation95_spill] sm:$0xff] %v3047_v61  ;;  %v1090_v13 = vadd.f32 %v1087_v8, %v1074_v28  ;;  %v3055_v53 = vmul.f32 %v2888_v26, %v2493_v3  ;;  %v3059_v40 = vmul.f32 %v2946_v60, %v2486_v1  ;;  %v3061_v30 = vstv %s2251_s29  ;;  %s2263_s8 = sld [smem:[#allocation5 + $0xd]] }
  0x6b   :  { %5345 = vst [vmem:[#allocation96_spill] sm:$0xff] %v3061_v30  ;;  %v3063_v63 = vmax.f32 %v652_v34, 0.0  ;;  %v665_v6 = vmul.f32 %v3061_v30, %v2659_v29  ;;  %v3067_v5 = vstv %s2253_s30  ;;  %s2265_s9 = sld [smem:[#allocation5 + $0xf]]  ;;  %v83_v8 = vmul.f32 %v2524_v14, %v2543_v23 }
  0x6c   :  { %5347 = vst [vmem:[#allocation98_spill] sm:$0xff] %v3067_v5  ;;  %v1106_v26 = vadd.f32 %v1103_v9, %v1090_v13  ;;  %v678_v28 = vmul.f32 %v3067_v5, %v2716_v57  ;;  %v3073_v15 = vstv %s2255_s4  ;;  %s3075_s10 = sld [smem:[#allocation5 + $0x41]]  ;;  %v94_v34 = vadd.f32 %v2572_v33, %v2591_v43 }
  0x6d   :  { %5346 = vst [vmem:[#allocation97_spill] sm:$0xff] %v3063_v63  ;;  %v1151_v16 = vmul.f32 %v3047_v61, %v3063_v63  ;;  %v694_v0 = vmul.f32 %v3073_v15, %v2774_v39  ;;  %v3083_v30 = vstv %s2257_s5  ;;  %s2317_s11 = sld [smem:[#allocation5 + $0x43]]  ;;  %v86_v9 = vadd.f32 %v83_v8, %v2575_v35 }
  0x6e   :  { %v1122_v13 = vadd.f32 %v1119_v18, %v1106_v26  ;;  %v681_v23 = vadd.f32 %v678_v28, %v665_v6  ;;  %v710_v5 = vmul.f32 %v3083_v30, %v2832_v10  ;;  %v3088_v52 = vstv %s2259_s6  ;;  %s2319_s12 = sld [smem:[#allocation5 + $0x45]] }
  0x6f   :  { %5348 = vst [vmem:[#allocation99_spill] sm:$0xff] %v3088_v52  ;;  %v726_v33 = vmul.f32 %v3088_v52, %v2890_v55  ;;  %v3092_v43 = vstv %s2261_s7  ;;  %s3094_s13 = sld [smem:[#allocation5 + $0x47]]  ;;  %v95_v61 = vadd.f32 %v2578_v37, %v2609_v51  ;;  %v99_v35 = vmul.f32 %v2553_v25, %v2581_v38 }
  0x70   :  { %v1138_v6 = vadd.f32 %v1135_v41, %v1122_v13  ;;  %v697_v18 = vadd.f32 %v694_v0, %v681_v23  ;;  %v742_v8 = vmul.f32 %v3092_v43, %v2948_v62  ;;  %v3102_v26 = vstv %s2263_s8  ;;  %s3104_s14 = sld [smem:[#allocation5 + $0x49]] }
  0x71   :  { %5349 = vst [vmem:[#allocation100_spill] sm:$0xff] %v3102_v26  ;;  %v758_v28 = vmul.f32 %v3102_v26, %v3004_v20  ;;  %v3108_v52 = vstv %s2265_s9  ;;  %s3110_s15 = sld [smem:[#allocation5 + $0x4b]]  ;;  %v102_v37 = vadd.f32 %v99_v35, %v86_v9  ;;  %v110_v51 = vadd.f32 %v2587_v42, %v94_v34 }
  0x72   :  { %v1154_v38 = vadd.f32 %v1151_v16, %v1138_v6  ;;  %v713_v41 = vadd.f32 %v710_v5, %v697_v18  ;;  %v774_v23 = vmul.f32 %v3108_v52, %v3063_v63  ;;  %v3116_v0 = vstv %s3075_s10  ;;  %s2327_s16 = sld [smem:[#allocation5 + $0x4d]] }
  0x73   :  { %5350 = vst [vmem:[#allocation101_spill] sm:$0xff] %v3116_v0  ;;  %v1418_v13 = vmul.f32 %v3116_v0, %v2659_v29  ;;  %v3120_v26 = vstv %s2317_s11  ;;  %s3122_s17 = sld [smem:[#allocation5 + $0x4f]]  ;;  %v3125_v9 = vadd.f32 %v2594_v44, %v95_v61  ;;  %v117_v42 = vrot.slane %v110_v51, 1 }
  0x74   :  { %5351 = vst [vmem:[#allocation102_spill] sm:$0xff] %v3120_v26  ;;  %1162 = vrot.lane.b32.xlu0 %v1154_v38, %s2445_s18  ;;  %v729_v16 = vadd.f32 %v726_v33, %v713_v41  ;;  %v1431_v5 = vmul.f32 %v3120_v26, %v2716_v57  ;;  %v3130_v34 = vstv %s2319_s12  ;;  %s2267_s19 = sld [smem:[#allocation5 + $0x11]]  ;;  %v133_v35 = vmul.f32 %v2598_v46, %v2486_v1 }
  0x75   :  { %5352 = vst [vmem:[#allocation103_spill] sm:$0xff] %v3125_v9  ;;  %5353 = vst [vmem:[#allocation104_spill] sm:$0xff] %v3130_v34  ;;  %v1447_v44 = vmul.f32 %v3130_v34, %v2774_v39  ;;  %v3137_v61 = vstv %s3094_s13  ;;  %s2269_s20 = sld [smem:[#allocation5 + $0x13]]  ;;  %v143_v38 = vmul.f32 %v2498_v4, %v2605_v50  ;;  %v3149_v34 = vmul.f32 %v2946_v60, %v2493_v3 }
  0x76   :  { %5354 = vst [vmem:[#allocation105_spill] sm:$0xff] %v3137_v61  ;;  %v745_v33 = vadd.f32 %v742_v8, %v729_v16  ;;  %v1434_v18 = vadd.f32 %v1431_v5, %v1418_v13  ;;  %v1463_v51 = vmul.f32 %v3137_v61, %v2832_v10  ;;  %v3145_v41 = vstv %s3104_s14  ;;  %s2271_s0 = sld [smem:[#allocation5 + $0x15]] }
  0x77   :  { %5355 = vst [vmem:[#allocation106_spill] sm:$0xff] %v3145_v41  ;;  %v1479_v26 = vmul.f32 %v3145_v41, %v2890_v55  ;;  %v3154_v6 = vstv %s3110_s15  ;;  %s2273_s1 = sld [smem:[#allocation5 + $0x17]]  ;;  %v5357_v8 = vrot.slane %v3125_v9, 1  ;;  %v146_v0 = vadd.f32 %v143_v38, %v133_v35 }
  0x78   :  { %5356 = vst [vmem:[#allocation107_spill] sm:$0xff] %v3154_v6  ;;  %v761_v16 = vadd.f32 %v758_v28, %v745_v33  ;;  %v1450_v5 = vadd.f32 %v1447_v44, %v1434_v18  ;;  %v3159_v61 = vstv %s2327_s16  ;;  %s3161_s21 = sld [smem:[#allocation5 + $0x19]]  ;;  %v1495_v3 = vmul.f32 %v3154_v6, %v2948_v62 }
  0x79   :  { %v119_v13 = vsel %vm116_vm0, %v117_v42, %v5357_v8  ;;  %5358 = vst [vmem:[#allocation108_spill] sm:$0xff] %v3159_v61  ;;  %v1511_v60 = vmul.f32 %v3159_v61, %v3004_v20  ;;  %v3168_v41 = vstv %s3122_s17  ;;  %s2277_s22 = sld [smem:[#allocation5 + $0x1b]]  ;;  %v154_v9 = vadd.f32 %v2617_v56, %v2623_v59 }
  0x7a   :  { %5359 = vst [vmem:[#allocation109_spill] sm:$0xff] %v3168_v41  ;;  %v777_v42 = vadd.f32 %v774_v23, %v761_v16  ;;  %v1466_v28 = vadd.f32 %v1463_v51, %v1450_v5  ;;  %v3172_v44 = vstv %s2267_s19  ;;  %s3174_s23 = sld [smem:[#allocation5 + $0x1d]]  ;;  %v125_v33 = vadd.f32 %v119_v13, %v102_v37 }
  0x7b   :  { %5360 = vst [vmem:[#allocation110_spill] sm:$0xff] %v3172_v44  ;;  %v1527_v35 = vmul.f32 %v3168_v41, %v3063_v63  ;;  %v854_v38 = vmul.f32 %v3172_v44, %v2659_v29  ;;  %v3180_v18 = vstv %s2269_s20  ;;  %s2281_s24 = sld [smem:[#allocation5 + $0x1f]]  ;;  %v155_v56 = vadd.f32 %v2629_v2, %v2680_v54 }
  0x7c   :  { %5361 = vst [vmem:[#allocation111_spill] sm:$0xff] %v3180_v18  ;;  %785 = vrot.lane.b32.xlu1 %v777_v42, %s2445_s18  ;;  %v1482_v59 = vadd.f32 %v1479_v26, %v1466_v28  ;;  %v867_v23 = vmul.f32 %v3180_v18, %v2716_v57  ;;  %v3187_v37 = vstv %s2271_s0  ;;  %s2299_s25 = sld [smem:[#allocation5 + $0x31]]  ;;  %v159_v51 = vmul.f32 %v2524_v14, %v2620_v58 }
  0x7d   :  { %5362 = vst [vmem:[#allocation112_spill] sm:$0xff] %v3187_v37  ;;  %v883_v8 = vmul.f32 %v3187_v37, %v2774_v39  ;;  %v3193_v13 = vstv %s2273_s1  ;;  %s2301_s26 = sld [smem:[#allocation5 + $0x33]]  ;;  %v170_v2 = vadd.f32 %v2632_v7, %v154_v9  ;;  %v171_v54 = vadd.f32 %v2641_v17, %v155_v56  ;;  %v5389_v37 = vld [vmem:[#allocation30_spill] sm:$0xff] }
  0x7e   :  { %5363 = vst [vmem:[#allocation113_spill] sm:$0xff] %v3193_v13  ;;  %v1498_v26 = vadd.f32 %v1495_v3, %v1482_v59  ;;  %v870_v16 = vadd.f32 %v867_v23, %v854_v38  ;;  %v899_v5 = vmul.f32 %v3193_v13, %v2832_v10  ;;  %v3200_v42 = vstv %s3161_s21  ;;  %s2303_s27 = sld [smem:[#allocation5 + $0x35]] }
  0x7f   :  { %5364 = vst [vmem:[#allocation114_spill] sm:$0xff] %v3200_v42  ;;  %v915_v14 = vmul.f32 %v3200_v42, %v2890_v55  ;;  %v3204_v28 = vstv %s2277_s22  ;;  %s2305_s28 = sld [smem:[#allocation5 + $0x37]]  ;;  %v162_v41 = vadd.f32 %v159_v51, %v146_v0  ;;  %v175_v7 = vmul.f32 %v2553_v25, %v2638_v12 }
  0x80   :  { %5365 = vst [vmem:[#allocation115_spill] sm:$0xff] %v3204_v28  ;;  %v1514_v9 = vadd.f32 %v1511_v60, %v1498_v26  ;;  %v886_v17 = vadd.f32 %v883_v8, %v870_v16  ;;  %v931_v3 = vmul.f32 %v3204_v28, %v2948_v62  ;;  %v3211_v38 = vstv %s3174_s23  ;;  %s2307_s29 = sld [smem:[#allocation5 + $0x39]]  ;;  %v5388_v28 = vld [vmem:[#allocation24_spill] sm:$0xff] }
  0x81   :  { %5366 = vst [vmem:[#allocation116_spill] sm:$0xff] %v3211_v38  ;;  %v947_v56 = vmul.f32 %v3211_v38, %v3004_v20  ;;  %v3215_v59 = vstv %s2281_s24  ;;  %s2309_s30 = sld [smem:[#allocation5 + $0x3b]]  ;;  %v178_v23 = vadd.f32 %v175_v7, %v162_v41  ;;  %v186_v0 = vadd.f32 %v2646_v21, %v170_v2 }
  0x82   :  { %5367 = vst [vmem:[#allocation117_spill] sm:$0xff] %v3215_v59  ;;  %v1530_v51 = vadd.f32 %v1527_v35, %v1514_v9  ;;  %v902_v61 = vadd.f32 %v899_v5, %v886_v17  ;;  %v963_v60 = vmul.f32 %v3215_v59, %v3063_v63  ;;  %v3220_v8 = vstv %s2299_s25  ;;  %s2311_s4 = sld [smem:[#allocation5 + $0x3d]] }
  0x83   :  { %5368 = vst [vmem:[#allocation118_spill] sm:$0xff] %v3220_v8  ;;  %v1230_v26 = vmul.f32 %v3220_v8, %v2659_v29  ;;  %v3224_v16 = vstv %s2301_s26  ;;  %s2313_s5 = sld [smem:[#allocation5 + $0x3f]]  ;;  %v3227_v6 = vadd.f32 %v2651_v22, %v171_v54  ;;  %v192_v41 = vrot.slane %v186_v0, 1 }
  0x84   :  { %5369 = vst [vmem:[#allocation119_spill] sm:$0xff] %v3224_v16  ;;  %1538 = vrot.lane.b32.xlu0 %v1530_v51, %s2445_s18  ;;  %v918_v21 = vadd.f32 %v915_v14, %v902_v61  ;;  %v1243_v35 = vmul.f32 %v3224_v16, %v2716_v57  ;;  %v3232_v2 = vstv %s2303_s27  ;;  %v208_v5 = vmul.f32 %v2655_v27, %v2486_v1  ;;  %s3385_s14 = sld [smem:[#allocation5 + $0x51]] }
  0x85   :  { %5370 = vst [vmem:[#allocation120_spill] sm:$0xff] %v3232_v2  ;;  %v1259_v7 = vmul.f32 %v3232_v2, %v2774_v39  ;;  %v3238_v9 = vstv %s2305_s28  ;;  %v5127_v22 = vrot.slane %v3227_v6, 1  ;;  %v218_v54 = vmul.f32 %v2498_v4, %v2665_v36  ;;  %s3392_s15 = sld [smem:[#allocation5 + $0x53]] }
  0x86   :  { %5371 = vst [vmem:[#allocation121_spill] sm:$0xff] %v3238_v9  ;;  %v934_v17 = vadd.f32 %v931_v3, %v918_v21  ;;  %v1246_v61 = vadd.f32 %v1243_v35, %v1230_v26  ;;  %v1275_v14 = vmul.f32 %v3238_v9, %v2832_v10  ;;  %v3245_v0 = vstv %s2307_s29  ;;  %s3404_s16 = sld [smem:[#allocation5 + $0x55]] }
  0x87   :  { %5372 = vst [vmem:[#allocation122_spill] sm:$0xff] %v3245_v0  ;;  %v1291_v1 = vmul.f32 %v3245_v0, %v2890_v55  ;;  %v3249_v51 = vstv %s2309_s30  ;;  %v3251_v2 = vmax.f32 %v125_v33, 0.0  ;;  %v194_v16 = vsel %vm116_vm0, %v192_v41, %v5127_v22  ;;  %s3408_s17 = sld [smem:[#allocation5 + $0x57]] }
  0x88   :  { %5373 = vst [vmem:[#allocation123_spill] sm:$0xff] %v3249_v51  ;;  %v950_v8 = vadd.f32 %v947_v56, %v934_v17  ;;  %v1262_v4 = vadd.f32 %v1259_v7, %v1246_v61  ;;  %v3256_v3 = vstv %s2311_s4  ;;  %v221_v26 = vadd.f32 %v218_v54, %v208_v5  ;;  %v5376_v56 = vld [vmem:[#allocation19_spill] sm:$0xff]  ;;  %v3273_v7 = vld [vmem:[%s5008_s2 + $0x30] sm:$0xff]  ;;  %v5377_v54 = vld [vmem:[#allocation18_spill] sm:$0xff]  ;;  %s3415_s19 = sld [smem:[#allocation5 + $0x59]] }
  0x89   :  { %5374 = vst [vmem:[#allocation124_spill] sm:$0xff] %v3256_v3  ;;  %v1307_v21 = vmul.f32 %v3249_v51, %v2948_v62  ;;  %v1323_v35 = vmul.f32 %v3256_v3, %v3004_v20  ;;  %v3262_v0 = vstv %s2313_s5  ;;  %v229_v33 = vadd.f32 %v2674_v48, %v2738_v24  ;;  %v5378_v61 = vld [vmem:[#allocation20_spill] sm:$0xff]  ;;  %v5379_v24 = vld [vmem:[#allocation21_spill] sm:$0xff]  ;;  %s3424_s20 = sld [smem:[#allocation5 + $0x5b]] }
  0x8a   :  { %5375 = vst [vmem:[#allocation125_spill] sm:$0xff] %v3262_v0  ;;  %v966_v9 = vadd.f32 %v963_v60, %v950_v8  ;;  %v1278_v59 = vadd.f32 %v1275_v14, %v1262_v4  ;;  %v200_v38 = vadd.f32 %v194_v16, %v178_v23  ;;  %v230_v41 = vadd.f32 %v5376_v56, %v2796_v47  ;;  %v5380_v47 = vld [vmem:[#allocation22_spill] sm:$0xff]  ;;  %v3285_v8 = vld [vmem:[%s5008_s2] sm:$0xff]  ;;  %v5381_v16 = vld [vmem:[#allocation25_spill] sm:$0xff]  ;;  %s3432_s0 = sld [smem:[#allocation5 + $0x5d]] }
  0x8b   :  { %v1339_v5 = vmul.f32 %v3262_v0, %v3063_v63  ;;  %v234_v17 = vmul.f32 %v3273_v7, %v5377_v54  ;;  %v245_v22 = vadd.f32 %v5378_v61, %v229_v33  ;;  %v250_v48 = vmul.f32 %v2553_v25, %v5379_v24  ;;  %v3292_v4 = vld [vmem:[%s5008_s2 + $0x18] sm:$0xff]  ;;  %v5382_v33 = vld [vmem:[#allocation27_spill] sm:$0xff]  ;;  %s3439_s1 = sld [smem:[#allocation5 + $0x5f]] }
  0x8c   :  { %974 = vrot.lane.b32.xlu1 %v966_v9, %s2445_s18  ;;  %v1294_v23 = vadd.f32 %v1291_v1, %v1278_v59  ;;  %v246_v60 = vadd.f32 %v5380_v47, %v230_v41  ;;  %v283_v14 = vmul.f32 %v3285_v8, %v5381_v16  ;;  %v293_v25 = vmul.f32 %v3292_v4, %v5382_v33  ;;  %v5383_v59 = vld [vmem:[#allocation23_spill] sm:$0xff]  ;;  %v5385_v41 = vld [vmem:[#allocation29_spill] sm:$0xff]  ;;  %v5386_v47 = vld [vmem:[#allocation68_spill] sm:$0xff]  ;;  %s3776_s29 = sld [smem:[#allocation5 + $0x63]] }
  0x8d   :  { %v237_v9 = vadd.f32 %v234_v17, %v221_v26  ;;  %v261_v1 = vadd.f32 %v5383_v59, %v245_v22  ;;  %v5384_v56 = vld [vmem:[#allocation55_spill] sm:$0xff]  ;;  %v309_v18 = vmul.f32 %v3273_v7, %v5389_v37  ;;  %v5390_v33 = vld [vmem:[#allocation32_spill] sm:$0xff]  ;;  %v5391_v17 = vld [vmem:[#allocation34_spill] sm:$0xff]  ;;  %s3784_s30 = sld [smem:[#allocation5 + $0x65]] }
  0x8e   :  { %v304_v61 = vadd.f32 %v5385_v41, %v5384_v56  ;;  %v5387_v0 = vld [vmem:[#allocation31_spill] sm:$0xff]  ;;  %v1310_v51 = vadd.f32 %v1307_v21, %v1294_v23  ;;  %v3302_v42 = vadd.f32 %v5388_v28, %v246_v60  ;;  %v296_v13 = vadd.f32 %v293_v25, %v283_v14  ;;  %v5392_v28 = vld [vmem:[#allocation33_spill] sm:$0xff]  ;;  %s3788_s4 = sld [smem:[#allocation5 + $0x67]] }
  0x8f   :  { %v305_v3 = vadd.f32 %v5387_v0, %v5386_v47  ;;  %v253_v44 = vadd.f32 %v250_v48, %v237_v9  ;;  %v267_v16 = vrot.slane %v261_v1, 1  ;;  %v3312_v0 = vld [vmem:[%s5008_s2 + $0x48] sm:$0xff]  ;;  %v5393_v23 = vld [vmem:[#allocation35_spill] sm:$0xff]  ;;  %v5398_v9 = vld [vmem:[#allocation81_spill] sm:$0xff]  ;;  %s3799_s5 = sld [smem:[#allocation5 + $0x69]] }
  0x90   :  { %v320_v26 = vadd.f32 %v5390_v33, %v304_v61  ;;  %v1326_v59 = vadd.f32 %v1323_v35, %v1310_v51  ;;  %v5146_v56 = vrot.slane %v3302_v42, 1  ;;  %v312_v41 = vadd.f32 %v309_v18, %v296_v13  ;;  %v5394_v48 = vld [vmem:[#allocation36_spill] sm:$0xff]  ;;  %v5396_v33 = vld [vmem:[#allocation37_spill] sm:$0xff]  ;;  %v5397_v51 = vld [vmem:[#allocation39_spill] sm:$0xff]  ;;  %s3809_s6 = sld [smem:[#allocation5 + $0x6b]] }
  0x91   :  { %v321_v22 = vadd.f32 %v5391_v17, %v305_v3  ;;  %v325_v21 = vmul.f32 %v3312_v0, %v5392_v28  ;;  %v358_v3 = vmul.f32 %v3285_v8, %v5396_v33  ;;  %v368_v35 = vmul.f32 %v3292_v4, %v5397_v51  ;;  %v5399_v1 = vld [vmem:[#allocation41_spill] sm:$0xff]  ;;  %v5401_v51 = vld [vmem:[#allocation42_spill] sm:$0xff]  ;;  %s3814_s7 = sld [smem:[#allocation5 + $0x6d]] }
  0x92   :  { %v336_v60 = vadd.f32 %v5393_v23, %v320_v26  ;;  %v1342_v18 = vadd.f32 %v1339_v5, %v1326_v59  ;;  %v269_v13 = vsel %vm116_vm0, %v267_v16, %v5146_v56  ;;  %v379_v61 = vadd.f32 %v5399_v1, %v5398_v9  ;;  %v5400_v23 = vld [vmem:[#allocation43_spill] sm:$0xff]  ;;  %v5402_v59 = vld [vmem:[#allocation44_spill] sm:$0xff]  ;;  %v5403_v16 = vld [vmem:[#allocation45_spill] sm:$0xff]  ;;  %s3822_s8 = sld [smem:[#allocation5 + $0x6f]] }
  0x93   :  { %v3318_v14 = vadd.f32 %v5394_v48, %v321_v22  ;;  %v328_v25 = vadd.f32 %v325_v21, %v312_v41  ;;  %v275_v47 = vadd.f32 %v269_v13, %v253_v44  ;;  %v371_v22 = vadd.f32 %v368_v35, %v358_v3  ;;  %v5405_v35 = vld [vmem:[#allocation51_spill] sm:$0xff]  ;;  %v5406_v9 = vld [vmem:[#allocation46_spill] sm:$0xff]  ;;  %s3834_s9 = sld [smem:[#allocation5 + $0x71]] }
  0x94   :  { %v342_v26 = vrot.slane %v336_v60, 1  ;;  %1350 = vrot.lane.b32.xlu1 %v1342_v18, %s2445_s18  ;;  %v380_v48 = vadd.f32 %v5400_v23, %v3024_v45  ;;  %v384_v5 = vmul.f32 %v3273_v7, %v5401_v51  ;;  %v395_v33 = vadd.f32 %v5402_v59, %v379_v61  ;;  %v5404_v60 = vld [vmem:[#allocation49_spill] sm:$0xff]  ;;  %v5407_v61 = vld [vmem:[#allocation47_spill] sm:$0xff]  ;;  %s3841_s10 = sld [smem:[#allocation5 + $0x73]] }
  0x95   :  { %5395 = vst [vmem:[#allocation19_spill] sm:$0xff] %v3318_v14  ;;  %v5147_v17 = vrot.slane %v3318_v14, 1  ;;  %v400_v41 = vmul.f32 %v3312_v0, %v5403_v16  ;;  %v3338_v21 = vmax.f32 %v200_v38, 0.0  ;;  %v433_v3 = vmul.f32 %v3285_v8, %v5404_v60  ;;  %v5408_v38 = vld [vmem:[#allocation53_spill] sm:$0xff]  ;;  %v5409_v16 = vld [vmem:[#allocation56_spill] sm:$0xff]  ;;  %s3852_s11 = sld [smem:[#allocation5 + $0x75]] }
  0x96   :  { %v443_v45 = vmul.f32 %v3292_v4, %v5405_v35  ;;  %v3347_v18 = vmax.f32 %v275_v47, 0.0  ;;  %v387_v13 = vadd.f32 %v384_v5, %v371_v22  ;;  %v396_v1 = vadd.f32 %v5406_v9, %v380_v48  ;;  %v5411_v35 = vld [vmem:[#allocation48_spill] sm:$0xff]  ;;  %v5412_v48 = vld [vmem:[#allocation57_spill] sm:$0xff]  ;;  %s3856_s12 = sld [smem:[#allocation5 + $0x77]] }
  0x97   :  { %v344_v44 = vsel %vm116_vm0, %v342_v26, %v5147_v17  ;;  %v411_v23 = vadd.f32 %v5407_v61, %v395_v33  ;;  %v454_v56 = vadd.f32 %v5408_v38, %v3033_v11  ;;  %v455_v26 = vadd.f32 %v5409_v16, %v3041_v32  ;;  %v5410_v17 = vld [vmem:[#allocation54_spill] sm:$0xff]  ;;  %v5413_v33 = vld [vmem:[#allocation59_spill] sm:$0xff]  ;;  %v5416_v38 = vld [vmem:[#allocation64_spill] sm:$0xff]  ;;  %s3865_s13 = sld [smem:[#allocation5 + $0x79]] }
  0x98   :  { %v446_v59 = vadd.f32 %v443_v45, %v433_v3  ;;  %v459_v60 = vmul.f32 %v3273_v7, %v5410_v17  ;;  %v350_v51 = vadd.f32 %v344_v44, %v328_v25  ;;  %v403_v14 = vadd.f32 %v400_v41, %v387_v13  ;;  %v5414_v45 = vld [vmem:[#allocation58_spill] sm:$0xff]  ;;  %s3943_s21 = sld [smem:[#allocation5 + $0x2a]] }
  0x99   :  { %v3358_v47 = vadd.f32 %v5411_v35, %v396_v1  ;;  %v417_v22 = vrot.slane %v411_v23, 1  ;;  %v470_v9 = vadd.f32 %v5412_v48, %v454_v56  ;;  %v471_v3 = vadd.f32 %v5413_v33, %v455_v26  ;;  %v5415_v32 = vld [vmem:[#allocation62_spill] sm:$0xff]  ;;  %v5419_v56 = vld [vmem:[#allocation61_spill] sm:$0xff]  ;;  %v5421_v33 = vld [vmem:[#allocation67_spill] sm:$0xff]  ;;  %s3952_s22 = sld [smem:[#allocation5 + $0x2c]] }
  0x9a   :  { %v462_v5 = vadd.f32 %v459_v60, %v446_v59  ;;  %v475_v11 = vmul.f32 %v3312_v0, %v5414_v45  ;;  %v508_v16 = vmul.f32 %v3285_v8, %v5415_v32  ;;  %v518_v25 = vmul.f32 %v3292_v4, %v5416_v38  ;;  %v5417_v41 = vld [vmem:[#allocation66_spill] sm:$0xff]  ;;  %v5418_v60 = vld [vmem:[#allocation60_spill] sm:$0xff]  ;;  %v5420_v23 = vld [vmem:[#allocation69_spill] sm:$0xff]  ;;  %s3959_s23 = sld [smem:[#allocation5 + $0x2e]] }
  0x9b   :  { %v5151_v61 = vrot.slane %v3358_v47, 1  ;;  %v529_v44 = vadd.f32 %v5417_v41, %v3051_v31  ;;  %v486_v13 = vadd.f32 %v5418_v60, %v470_v9  ;;  %v3373_v1 = vadd.f32 %v5419_v56, %v471_v3  ;;  %v5422_v32 = vld [vmem:[#allocation70_spill] sm:$0xff]  ;;  %v5425_v56 = vld [vmem:[#allocation73_spill] sm:$0xff]  ;;  %s3966_s24 = sld [smem:[#allocation5]] }
  0x9c   :  { %v478_v35 = vadd.f32 %v475_v11, %v462_v5  ;;  %v530_v59 = vadd.f32 %v5420_v23, %v3055_v53  ;;  %v521_v48 = vadd.f32 %v518_v25, %v508_v16  ;;  %v534_v38 = vmul.f32 %v3273_v7, %v5421_v33  ;;  %v5423_v11 = vld [vmem:[#allocation72_spill] sm:$0xff]  ;;  %v5424_v53 = vld [vmem:[#allocation71_spill] sm:$0xff]  ;;  %s3972_s25 = sld [smem:[#allocation5 + $0x2]] }
  0x9d   :  { %v419_v26 = vsel %vm116_vm0, %v417_v22, %v5151_v61  ;;  %v545_v45 = vadd.f32 %v5422_v32, %v529_v44  ;;  %v492_v5 = vrot.slane %v486_v13, 1  ;;  %v5150_v9 = vrot.slane %v3373_v1, 1  ;;  %v5426_v16 = vld [vmem:[#allocation75_spill] sm:$0xff]  ;;  %v5427_v44 = vld [vmem:[#allocation74_spill] sm:$0xff]  ;;  %s3979_s26 = sld [smem:[#allocation5 + $0x4]] }
  0x9e   :  { %v425_v31 = vadd.f32 %v419_v26, %v403_v14  ;;  %v546_v3 = vadd.f32 %v5423_v11, %v530_v59  ;;  %v537_v41 = vadd.f32 %v534_v38, %v521_v48  ;;  %v550_v60 = vmul.f32 %v3312_v0, %v5424_v53  ;;  %v5428_v38 = vld [vmem:[#allocation77_spill] sm:$0xff]  ;;  %s3985_s27 = sld [smem:[#allocation5 + $0x6]] }
  0x9f   :  { %v561_v22 = vadd.f32 %v5425_v56, %v545_v45  ;;  %v583_v25 = vmul.f32 %v3285_v8, %v5426_v16  ;;  %v3394_v32 = vmax.f32 %v350_v51, 0.0  ;;  %v494_v14 = vsel %vm116_vm0, %v492_v5, %v5150_v9  ;;  %v5429_v8 = vld [vmem:[#allocation79_spill] sm:$0xff]  ;;  %s3991_s28 = sld [smem:[#allocation5 + $0x8]] }
  0xa0   :  { %v3400_v13 = vadd.f32 %v5427_v44, %v546_v3  ;;  %v593_v23 = vmul.f32 %v3292_v4, %v5428_v38  ;;  %v500_v45 = vadd.f32 %v494_v14, %v478_v35  ;;  %v553_v59 = vadd.f32 %v550_v60, %v537_v41  ;;  %v5430_v3 = vld [vmem:[#allocation80_spill] sm:$0xff]  ;;  %v5431_v41 = vld [vmem:[#allocation82_spill] sm:$0xff] }
  0xa1   :  { %v567_v26 = vrot.slane %v561_v22, 1  ;;  %v604_v48 = vadd.f32 %v5429_v8, %v3059_v40  ;;  %v605_v5 = vadd.f32 %v2976_v49, %v3149_v34  ;;  %v609_v56 = vmul.f32 %v3273_v7, %v5430_v3  ;;  %v5432_v60 = vld [vmem:[#allocation96_spill] sm:$0xff]  ;;  %v5433_v7 = vld [vmem:[#allocation83_spill] sm:$0xff] }
  0xa2   :  { %v5149_v51 = vrot.slane %v3400_v13, 1  ;;  %v596_v11 = vadd.f32 %v593_v23, %v583_v25  ;;  %v3417_v4 = vmax.f32 %v425_v31, 0.0  ;;  %v625_v40 = vmul.f32 %v3312_v0, %v5431_v41  ;;  %v5434_v31 = vld [vmem:[#allocation98_spill] sm:$0xff]  ;;  %v5436_v44 = vld [vmem:[#allocation84_spill] sm:$0xff] }
  0xa3   :  { %v620_v35 = vadd.f32 %v2979_v19, %v604_v48  ;;  %v663_v22 = vmul.f32 %v5432_v60, %v3251_v2  ;;  %v621_v25 = vadd.f32 %v5433_v7, %v605_v5  ;;  %v676_v14 = vmul.f32 %v5434_v31, %v3338_v21  ;;  %v5437_v48 = vld [vmem:[#allocation85_spill] sm:$0xff] }
  0xa4   :  { %v569_v49 = vsel %vm116_vm0, %v567_v26, %v5149_v51  ;;  %v612_v34 = vadd.f32 %v609_v56, %v596_v11  ;;  %v3434_v19 = vmax.f32 %v500_v45, 0.0  ;;  %v692_v8 = vmul.f32 %v3073_v15, %v3347_v18 }
  0xa5   :  { %v575_v0 = vadd.f32 %v569_v49, %v553_v59  ;;  %v636_v23 = vadd.f32 %v5436_v44, %v620_v35  ;;  %v3442_v11 = vadd.f32 %v5437_v48, %v621_v25  ;;  %v679_v5 = vadd.f32 %v676_v14, %v663_v22  ;;  %v5438_v35 = vld [vmem:[#allocation99_spill] sm:$0xff] }
  0xa6   :  { %5435 = vst [vmem:[#allocation18_spill] sm:$0xff] %v3434_v19  ;;  %v628_v26 = vadd.f32 %v625_v40, %v612_v34  ;;  %v708_v45 = vmul.f32 %v3083_v30, %v3394_v32  ;;  %v724_v49 = vmul.f32 %v5438_v35, %v3417_v4  ;;  %v3451_v7 = vstv %s3385_s14  ;;  %s3880_s14 = sld [smem:[#allocation5 + $0x7b]] }
  0xa7   :  { %v3446_v56 = vmax.f32 %v575_v0, 0.0  ;;  %v642_v59 = vrot.slane %v636_v23, 1  ;;  %5439 = vst [vmem:[#allocation20_spill] sm:$0xff] %v3451_v7  ;;  %v5162_v44 = vrot.slane %v3442_v11, 1  ;;  %v695_v40 = vadd.f32 %v692_v8, %v679_v5 }
  0xa8   :  { %v1606_v34 = vmul.f32 %v3451_v7, %v2659_v29  ;;  %v3457_v22 = vstv %s3392_s15  ;;  %v740_v25 = vmul.f32 %v3092_v43, %v3434_v19  ;;  %v3464_v0 = vstv %s3404_s16  ;;  %v5445_v7 = vld [vmem:[#allocation100_spill] sm:$0xff]  ;;  %s3890_s15 = sld [smem:[#allocation5 + $0x7d]] }
  0xa9   :  { %5440 = vst [vmem:[#allocation21_spill] sm:$0xff] %v3457_v22  ;;  %v1619_v14 = vmul.f32 %v3457_v22, %v2716_v57  ;;  %5441 = vst [vmem:[#allocation22_spill] sm:$0xff] %v3464_v0  ;;  %v3467_v23 = vstv %s3408_s17  ;;  %v644_v8 = vsel %vm116_vm0, %v642_v59, %v5162_v44  ;;  %v711_v48 = vadd.f32 %v708_v45, %v695_v40  ;;  %s3897_s16 = sld [smem:[#allocation5 + $0x7f]] }
  0xaa   :  { %5442 = vst [vmem:[#allocation23_spill] sm:$0xff] %v3467_v23  ;;  %v1635_v5 = vmul.f32 %v3464_v0, %v2774_v39  ;;  %v1651_v51 = vmul.f32 %v3467_v23, %v2832_v10  ;;  %v650_v9 = vadd.f32 %v644_v8, %v628_v26  ;;  %v3477_v29 = vstv %s3415_s19  ;;  %v5448_v8 = vld [vmem:[#allocation11_spill] sm:$0xff]  ;;  %s3907_s17 = sld [smem:[#allocation5 + $0x20]] }
  0xab   :  { %v1622_v61 = vadd.f32 %v1619_v14, %v1606_v34  ;;  %5443 = vst [vmem:[#allocation55_spill] sm:$0xff] %v3477_v29  ;;  %v3480_v57 = vstv %s3424_s20  ;;  %v727_v22 = vadd.f32 %v724_v49, %v711_v48  ;;  %v756_v19 = vmul.f32 %v5445_v7, %v3446_v56  ;;  %v5449_v48 = vld [vmem:[#allocation13_spill] sm:$0xff]  ;;  %s3913_s19 = sld [smem:[#allocation5 + $0x22]] }
  0xac   :  { %5444 = vst [vmem:[#allocation29_spill] sm:$0xff] %v3480_v57  ;;  %v1667_v59 = vmul.f32 %v3477_v29, %v2890_v55  ;;  %v3487_v45 = vstv %s3432_s0  ;;  %v3489_v40 = vmax.f32 %v650_v9, 0.0  ;;  %v1683_v26 = vmul.f32 %v3480_v57, %v2948_v62  ;;  %v3503_v55 = vld [vmem:[%s5008_s2 + $0x38] sm:$0xff]  ;;  %v5450_v9 = vld [vmem:[#allocation12_spill] sm:$0xff]  ;;  %s3925_s20 = sld [smem:[#allocation5 + $0x24]] }
  0xad   :  { %5446 = vst [vmem:[#allocation68_spill] sm:$0xff] %v3487_v45  ;;  %v1638_v44 = vadd.f32 %v1635_v5, %v1622_v61  ;;  %v3494_v34 = vstv %s3439_s1  ;;  %v743_v14 = vadd.f32 %v740_v25, %v727_v22  ;;  %v1699_v49 = vmul.f32 %v3487_v45, %v3004_v20  ;;  %v3514_v25 = vld [vmem:[%s5008_s2 + $0x50] sm:$0xff]  ;;  %v5452_v45 = vld [vmem:[#allocation15_spill] sm:$0xff]  ;;  %s3928_s0 = sld [smem:[#allocation5 + $0x26]] }
  0xae   :  { %5447 = vst [vmem:[#allocation31_spill] sm:$0xff] %v3494_v34  ;;  %v71_v10 = vadd.f32 %v5449_v48, %v5448_v8  ;;  %v84_v61 = vmul.f32 %v3503_v55, %v5450_v9  ;;  %v772_v5 = vmul.f32 %v3108_v52, %v3489_v40  ;;  %v1715_v22 = vmul.f32 %v3494_v34, %v3063_v63  ;;  %v5451_v8 = vld [vmem:[#allocation14_spill] sm:$0xff]  ;;  %v3521_v9 = vld [vmem:[%s5008_s2 + $0x8] sm:$0xff]  ;;  %s3939_s1 = sld [smem:[#allocation5 + $0x28]] }
  0xaf   :  { %v1654_v62 = vadd.f32 %v1651_v51, %v1638_v44  ;;  %v100_v48 = vmul.f32 %v3514_v25, %v5451_v8  ;;  %v759_v20 = vadd.f32 %v756_v19, %v743_v14  ;;  %v134_v51 = vmul.f32 %v3521_v9, %v2598_v46  ;;  %v2392_v44 = vld [vmem:[%s5008_s2 + $0x20] sm:$0xff]  ;;  %s3772_s2 = sld [smem:[#allocation5 + $0x61]] }
  0xb0   :  { %v87_v39 = vadd.f32 %v84_v61, %v71_v10  ;;  %v144_v63 = vmul.f32 %v2392_v44, %v2605_v50  ;;  %v5453_v57 = vrot.slane %v5452_v45, 1  ;;  %v5454_v8 = vld [vmem:[#allocation103_spill] sm:$0xff]  ;;  %v160_v14 = vmul.f32 %v3503_v55, %v2620_v58 }
  0xb1   :  { %v1670_v34 = vadd.f32 %v1667_v59, %v1654_v62  ;;  %v5455_v19 = vrot.slane %v5454_v8, 1  ;;  %v176_v61 = vmul.f32 %v3514_v25, %v2638_v12  ;;  %v775_v46 = vadd.f32 %v772_v5, %v759_v20  ;;  %v5456_v62 = vld [vmem:[#allocation17_spill] sm:$0xff] }
  0xb2   :  { %v103_v29 = vadd.f32 %v100_v48, %v87_v39  ;;  %v147_v23 = vadd.f32 %v144_v63, %v134_v51  ;;  %v209_v0 = vmul.f32 %v3521_v9, %v2655_v27  ;;  %v5457_v59 = vrot.slane %v5456_v62, 1  ;;  %v5459_v27 = vld [vmem:[#allocation25_spill] sm:$0xff]  ;;  %v5461_v51 = vld [vmem:[#allocation28_spill] sm:$0xff] }
  0xb3   :  { %v121_v10 = vsel %vm116_vm0, %v5455_v19, %v5453_v57  ;;  %v1686_v50 = vadd.f32 %v1683_v26, %v1670_v34  ;;  %v5458_v45 = vrot.slane %v3227_v6, 1  ;;  %v219_v57 = vmul.f32 %v2392_v44, %v2665_v36  ;;  %781 = vrot.lane.b32.xlu0 %v775_v46, %s2445_s18  ;;  %v5460_v6 = vld [vmem:[#allocation27_spill] sm:$0xff] }
  0xb4   :  { %v235_v58 = vmul.f32 %v3503_v55, %v5377_v54  ;;  %v126_v12 = vadd.f32 %v121_v10, %v103_v29  ;;  %v163_v39 = vadd.f32 %v160_v14, %v147_v23  ;;  %v251_v20 = vmul.f32 %v3514_v25, %v5379_v24  ;;  %v5464_v14 = vld [vmem:[#allocation37_spill] sm:$0xff] }
  0xb5   :  { %v196_v8 = vsel %vm116_vm0, %v5458_v45, %v5457_v59  ;;  %v284_v63 = vmul.f32 %v3521_v9, %v5459_v27  ;;  %v1702_v26 = vadd.f32 %v1699_v49, %v1686_v50  ;;  %v222_v34 = vadd.f32 %v219_v57, %v209_v0  ;;  %v5467_v59 = vld [vmem:[#allocation19_spill] sm:$0xff] }
  0xb6   :  { %v294_v5 = vmul.f32 %v2392_v44, %v5460_v6  ;;  %v310_v36 = vmul.f32 %v3503_v55, %v5389_v37  ;;  %v3556_v48 = vmax.f32 %v126_v12, 0.0  ;;  %v179_v54 = vadd.f32 %v176_v61, %v163_v39  ;;  %v5465_v37 = vld [vmem:[#allocation40_spill] sm:$0xff]  ;;  %v5469_v57 = vld [vmem:[#allocation39_spill] sm:$0xff]  ;;  %v5470_v12 = vld [vmem:[#allocation42_spill] sm:$0xff] }
  0xb7   :  { %v5462_v19 = vrot.slane %v5461_v51, 1  ;;  %v5463_v29 = vrot.slane %v3302_v42, 1  ;;  %v326_v24 = vmul.f32 %v3514_v25, %v5392_v28  ;;  %v1718_v10 = vadd.f32 %v1715_v22, %v1702_v26  ;;  %v5476_v51 = vld [vmem:[#allocation51_spill] sm:$0xff] }
  0xb8   :  { %v238_v49 = vadd.f32 %v235_v58, %v222_v34  ;;  %v297_v0 = vadd.f32 %v294_v5, %v284_v63  ;;  %v359_v46 = vmul.f32 %v3521_v9, %v5464_v14  ;;  %v201_v50 = vadd.f32 %v196_v8, %v179_v54  ;;  %v5471_v58 = vld [vmem:[#allocation45_spill] sm:$0xff]  ;;  %v5473_v34 = vld [vmem:[#allocation52_spill] sm:$0xff] }
  0xb9   :  { %v271_v23 = vsel %vm116_vm0, %v5463_v29, %v5462_v19  ;;  %v5466_v62 = vrot.slane %v5465_v37, 1  ;;  %v5468_v61 = vrot.slane %v5467_v59, 1  ;;  %v369_v42 = vmul.f32 %v2392_v44, %v5469_v57  ;;  %1726 = vrot.lane.b32.xlu1 %v1718_v10, %s2445_s18  ;;  %v5472_v63 = vld [vmem:[#allocation49_spill] sm:$0xff]  ;;  %v5478_v37 = vld [vmem:[#allocation62_spill] sm:$0xff] }
  0xba   :  { %v385_v39 = vmul.f32 %v3503_v55, %v5470_v12  ;;  %v254_v28 = vadd.f32 %v251_v20, %v238_v49  ;;  %v313_v22 = vadd.f32 %v310_v36, %v297_v0  ;;  %v401_v27 = vmul.f32 %v3514_v25, %v5471_v58  ;;  %v5477_v49 = vld [vmem:[#allocation58_spill] sm:$0xff] }
  0xbb   :  { %v346_v45 = vsel %vm116_vm0, %v5468_v61, %v5466_v62  ;;  %v434_v8 = vmul.f32 %v3521_v9, %v5472_v63  ;;  %v372_v26 = vadd.f32 %v369_v42, %v359_v46  ;;  %v5474_v6 = vrot.slane %v5473_v34, 1  ;;  %v5480_v42 = vld [vmem:[#allocation65_spill] sm:$0xff] }
  0xbc   :  { %v5475_v5 = vrot.slane %v3358_v47, 1  ;;  %v444_v19 = vmul.f32 %v2392_v44, %v5476_v51  ;;  %v460_v29 = vmul.f32 %v3503_v55, %v5410_v17  ;;  %v3588_v20 = vmax.f32 %v201_v50, 0.0  ;;  %v5479_v47 = vld [vmem:[#allocation64_spill] sm:$0xff] }
  0xbd   :  { %v276_v36 = vadd.f32 %v271_v23, %v254_v28  ;;  %v329_v10 = vadd.f32 %v326_v24, %v313_v22  ;;  %v476_v0 = vmul.f32 %v3514_v25, %v5477_v49  ;;  %v388_v14 = vadd.f32 %v385_v39, %v372_v26 }
  0xbe   :  { %v421_v54 = vsel %vm116_vm0, %v5475_v5, %v5474_v6  ;;  %v447_v46 = vadd.f32 %v444_v19, %v434_v8  ;;  %v509_v62 = vmul.f32 %v3521_v9, %v5478_v37  ;;  %v519_v59 = vmul.f32 %v2392_v44, %v5479_v47  ;;  %v5491_v37 = vld [vmem:[#allocation112_spill] sm:$0xff] }
  0xbf   :  { %v3595_v61 = vmax.f32 %v276_v36, 0.0  ;;  %v351_v57 = vadd.f32 %v346_v45, %v329_v10  ;;  %v5481_v12 = vrot.slane %v5480_v42, 1  ;;  %v5482_v17 = vrot.slane %v3373_v1, 1  ;;  %v5487_v36 = vld [vmem:[#allocation90_spill] sm:$0xff] }
  0xc0   :  { %v535_v24 = vmul.f32 %v3503_v55, %v5421_v33  ;;  %v404_v50 = vadd.f32 %v401_v27, %v388_v14  ;;  %v463_v39 = vadd.f32 %v460_v29, %v447_v46  ;;  %v522_v28 = vadd.f32 %v519_v59, %v509_v62  ;;  %v5483_v33 = vld [vmem:[#allocation78_spill] sm:$0xff] }
  0xc1   :  { %v496_v23 = vsel %vm116_vm0, %v5482_v17, %v5481_v12  ;;  %v551_v22 = vmul.f32 %v3514_v25, %v5424_v53  ;;  %v3606_v58 = vmax.f32 %v351_v57, 0.0  ;;  %v584_v45 = vmul.f32 %v3521_v9, %v5426_v16  ;;  %v5492_v57 = vld [vmem:[#allocation113_spill] sm:$0xff] }
  0xc2   :  { %v594_v63 = vmul.f32 %v2392_v44, %v5428_v38  ;;  %v610_v1 = vmul.f32 %v3503_v55, %v5430_v3  ;;  %v426_v8 = vadd.f32 %v421_v54, %v404_v50  ;;  %v479_v26 = vadd.f32 %v476_v0, %v463_v39  ;;  %v5490_v0 = vld [vmem:[#allocation111_spill] sm:$0xff]  ;;  %v5494_v39 = vld [vmem:[#allocation18_spill] sm:$0xff] }
  0xc3   :  { %v538_v34 = vadd.f32 %v535_v24, %v522_v28  ;;  %v5484_v27 = vrot.slane %v5483_v33, 1  ;;  %v5485_v6 = vrot.slane %v3400_v13, 1  ;;  %v626_v51 = vmul.f32 %v3514_v25, %v5431_v41  ;;  %v5486_v41 = vld [vmem:[#allocation110_spill] sm:$0xff]  ;;  %v5495_v28 = vld [vmem:[#allocation115_spill] sm:$0xff]  ;;  %v5497_v33 = vld [vmem:[#allocation117_spill] sm:$0xff] }
  0xc4   :  { %v597_v53 = vadd.f32 %v594_v63, %v584_v45  ;;  %v664_v16 = vmul.f32 %v5432_v60, %v3556_v48  ;;  %v677_v38 = vmul.f32 %v5434_v31, %v3588_v20  ;;  %v3624_v55 = vmax.f32 %v426_v8, 0.0 }
  0xc5   :  { %v571_v5 = vsel %vm116_vm0, %v5485_v6, %v5484_v27  ;;  %v501_v3 = vadd.f32 %v496_v23, %v479_v26  ;;  %v554_v9 = vadd.f32 %v551_v22, %v538_v34  ;;  %v693_v44 = vmul.f32 %v3073_v15, %v3595_v61  ;;  %v5493_v23 = vld [vmem:[#allocation114_spill] sm:$0xff]  ;;  %v5496_v34 = vld [vmem:[#allocation116_spill] sm:$0xff] }
  0xc6   :  { %v613_v13 = vadd.f32 %v610_v1, %v597_v53  ;;  %v680_v54 = vadd.f32 %v677_v38, %v664_v16  ;;  %v709_v19 = vmul.f32 %v3083_v30, %v3606_v58  ;;  %v852_v25 = vmul.f32 %v5486_v41, %v3251_v2 }
  0xc7   :  { %v3632_v29 = vmax.f32 %v501_v3, 0.0  ;;  %v576_v60 = vadd.f32 %v571_v5, %v554_v9  ;;  %v5488_v31 = vrot.slane %v5487_v36, 1  ;;  %v5489_v10 = vrot.slane %v3442_v11, 1  ;;  %v5498_v9 = vld [vmem:[#allocation86_spill] sm:$0xff] }
  0xc8   :  { %v865_v15 = vmul.f32 %v5490_v0, %v3338_v21  ;;  %v629_v14 = vadd.f32 %v626_v51, %v613_v13  ;;  %v696_v46 = vadd.f32 %v693_v44, %v680_v54  ;;  %v725_v30 = vmul.f32 %v5438_v35, %v3624_v55  ;;  %v5499_v13 = vld [vmem:[#allocation87_spill] sm:$0xff] }
  0xc9   :  { %v646_v49 = vsel %vm116_vm0, %v5489_v10, %v5488_v31  ;;  %v881_v62 = vmul.f32 %v5491_v37, %v3347_v18  ;;  %v3645_v47 = vmax.f32 %v576_v60, 0.0  ;;  %v897_v42 = vmul.f32 %v5492_v57, %v3394_v32 }
  0xca   :  { %v868_v59 = vadd.f32 %v865_v15, %v852_v25  ;;  %v651_v11 = vadd.f32 %v646_v49, %v629_v14  ;;  %v712_v12 = vadd.f32 %v709_v19, %v696_v46  ;;  %v741_v17 = vmul.f32 %v3092_v43, %v3632_v29  ;;  %v5501_v49 = vld [vmem:[#allocation91_spill] sm:$0xff]  ;;  %v5502_v46 = vld [vmem:[#allocation92_spill] sm:$0xff] }
  0xcb   :  { %v913_v24 = vmul.f32 %v5493_v23, %v3417_v4  ;;  %v757_v35 = vmul.f32 %v5445_v7, %v3645_v47  ;;  %v929_v22 = vmul.f32 %v5495_v28, %v5494_v39  ;;  %v853_v45 = vmul.f32 %v5486_v41, %v3556_v48 }
  0xcc   :  { %v884_v50 = vadd.f32 %v881_v62, %v868_v59  ;;  %v3659_v63 = vmax.f32 %v651_v11, 0.0  ;;  %v728_v1 = vadd.f32 %v725_v30, %v712_v12  ;;  %v866_v8 = vmul.f32 %v5490_v0, %v3588_v20 }
  0xcd   :  { %v882_v43 = vmul.f32 %v5491_v37, %v3595_v61  ;;  %v945_v7 = vmul.f32 %v5496_v34, %v3446_v56  ;;  %v961_v27 = vmul.f32 %v5497_v33, %v3489_v40  ;;  %v898_v6 = vmul.f32 %v5492_v57, %v3606_v58  ;;  %v5503_v37 = vld [vmem:[#allocation93_spill] sm:$0xff] }
  0xce   :  { %v900_v26 = vadd.f32 %v897_v42, %v884_v50  ;;  %v744_v5 = vadd.f32 %v741_v17, %v728_v1  ;;  %v773_v53 = vmul.f32 %v3108_v52, %v3659_v63  ;;  %v869_v51 = vadd.f32 %v866_v8, %v853_v45  ;;  %v5500_v52 = vld [vmem:[#allocation89_spill] sm:$0xff]  ;;  %v5504_v17 = vld [vmem:[#allocation94_spill] sm:$0xff] }
  0xcf   :  { %v914_v16 = vmul.f32 %v5493_v23, %v3624_v55  ;;  %v930_v3 = vmul.f32 %v5495_v28, %v3632_v29  ;;  %v1041_v44 = vmul.f32 %v5498_v9, %v3556_v48  ;;  %v1054_v54 = vmul.f32 %v5499_v13, %v3588_v20 }
  0xd0   :  { %v916_v38 = vadd.f32 %v913_v24, %v900_v26  ;;  %v760_v19 = vadd.f32 %v757_v35, %v744_v5  ;;  %v885_v41 = vadd.f32 %v882_v43, %v869_v51  ;;  %v946_v25 = vmul.f32 %v5496_v34, %v3645_v47  ;;  %v5505_v24 = vld [vmem:[#allocation95_spill] sm:$0xff]  ;;  %v5506_v34 = vld [vmem:[#allocation118_spill] sm:$0xff] }
  0xd1   :  { %v1070_v60 = vmul.f32 %v5500_v52, %v3595_v61  ;;  %v962_v31 = vmul.f32 %v5497_v33, %v3659_v63  ;;  %v1057_v10 = vadd.f32 %v1054_v54, %v1041_v44  ;;  %v1086_v0 = vmul.f32 %v5501_v49, %v3606_v58 }
  0xd2   :  { %v932_v36 = vadd.f32 %v929_v22, %v916_v38  ;;  %v776_v15 = vadd.f32 %v773_v53, %v760_v19  ;;  %v901_v14 = vadd.f32 %v898_v6, %v885_v41  ;;  %v1102_v30 = vmul.f32 %v5502_v46, %v3624_v55  ;;  %v5508_v53 = vld [vmem:[#allocation120_spill] sm:$0xff]  ;;  %v5510_v41 = vld [vmem:[#allocation122_spill] sm:$0xff] }
  0xd3   :  { %v1118_v62 = vmul.f32 %v5503_v37, %v3632_v29  ;;  %v1073_v57 = vadd.f32 %v1070_v60, %v1057_v10  ;;  %v1040_v42 = vmul.f32 %v5498_v9, %v3251_v2  ;;  %v1053_v11 = vmul.f32 %v5499_v13, %v3338_v21  ;;  %v5509_v9 = vld [vmem:[#allocation121_spill] sm:$0xff] }
  0xd4   :  { %v948_v59 = vadd.f32 %v945_v7, %v932_v36  ;;  %783 = vrot.lane.b32.xlu0 %v776_v15, %s2445_s18  ;;  %v917_v12 = vadd.f32 %v914_v16, %v901_v14  ;;  %v1134_v23 = vmul.f32 %v5504_v17, %v3645_v47  ;;  %v1150_v35 = vmul.f32 %v5505_v24, %v3659_v63  ;;  %v5511_v36 = vld [vmem:[#allocation123_spill] sm:$0xff] }
  0xd5   :  { %v1069_v50 = vmul.f32 %v5500_v52, %v3347_v18  ;;  %v1089_v22 = vadd.f32 %v1086_v0, %v1073_v57  ;;  %v1056_v45 = vadd.f32 %v1053_v11, %v1040_v42  ;;  %v1085_v1 = vmul.f32 %v5501_v49, %v3394_v32 }
  0xd6   :  { %v964_v28 = vadd.f32 %v961_v27, %v948_v59  ;;  %v933_v8 = vadd.f32 %v930_v3, %v917_v12  ;;  %v1101_v43 = vmul.f32 %v5502_v46, %v3417_v4  ;;  %v1117_v26 = vmul.f32 %v5503_v37, %v5494_v39  ;;  %v5507_v27 = vld [vmem:[#allocation119_spill] sm:$0xff]  ;;  %v5513_v37 = vld [vmem:[#allocation125_spill] sm:$0xff] }
  0xd7   :  { %v1228_v7 = vmul.f32 %v5506_v34, %v3251_v2  ;;  %v1105_v33 = vadd.f32 %v1102_v30, %v1089_v22  ;;  %v1072_v6 = vadd.f32 %v1069_v50, %v1056_v45  ;;  %v1241_v5 = vmul.f32 %v5507_v27, %v3338_v21  ;;  %v5512_v30 = vld [vmem:[#allocation124_spill] sm:$0xff]  ;;  %v5514_v50 = vld [vmem:[#allocation101_spill] sm:$0xff]  ;;  %v5515_v22 = vld [vmem:[#allocation102_spill] sm:$0xff] }
  0xd8   :  { %970 = vrot.lane.b32.xlu1 %v964_v28, %s2445_s18  ;;  %v1257_v51 = vmul.f32 %v5508_v53, %v3347_v18  ;;  %v949_v16 = vadd.f32 %v946_v25, %v933_v8  ;;  %v1133_v38 = vmul.f32 %v5504_v17, %v3446_v56  ;;  %v1149_v3 = vmul.f32 %v5505_v24, %v3489_v40 }
  0xd9   :  { %v1273_v44 = vmul.f32 %v5509_v9, %v3394_v32  ;;  %v1121_v13 = vadd.f32 %v1118_v62, %v1105_v33  ;;  %v1088_v54 = vadd.f32 %v1085_v1, %v1072_v6  ;;  %v1244_v19 = vadd.f32 %v1241_v5, %v1228_v7  ;;  %v5517_v6 = vld [vmem:[#allocation105_spill] sm:$0xff] }
  0xda   :  { %v1289_v52 = vmul.f32 %v5510_v41, %v3417_v4  ;;  %v965_v60 = vadd.f32 %v962_v31, %v949_v16  ;;  %v1305_v10 = vmul.f32 %v5511_v36, %v5494_v39  ;;  %v1229_v25 = vmul.f32 %v5506_v34, %v3556_v48 }
  0xdb   :  { %v1242_v49 = vmul.f32 %v5507_v27, %v3588_v20  ;;  %v1137_v0 = vadd.f32 %v1134_v23, %v1121_v13  ;;  %v1104_v15 = vadd.f32 %v1101_v43, %v1088_v54  ;;  %v1260_v14 = vadd.f32 %v1257_v51, %v1244_v19  ;;  %v5516_v43 = vld [vmem:[#allocation104_spill] sm:$0xff]  ;;  %v5518_v51 = vld [vmem:[#allocation106_spill] sm:$0xff] }
  0xdc   :  { %v1258_v46 = vmul.f32 %v5508_v53, %v3595_v61  ;;  %972 = vrot.lane.b32.xlu0 %v965_v60, %s2445_s18  ;;  %v1321_v31 = vmul.f32 %v5512_v30, %v3446_v56  ;;  %v1337_v62 = vmul.f32 %v5513_v37, %v3489_v40  ;;  %v1274_v57 = vmul.f32 %v5509_v9, %v3606_v58  ;;  %v5521_v60 = vld [vmem:[#allocation109_spill] sm:$0xff] }
  0xdd   :  { %v1245_v59 = vadd.f32 %v1242_v49, %v1229_v25  ;;  %v1153_v42 = vadd.f32 %v1150_v35, %v1137_v0  ;;  %v1120_v11 = vadd.f32 %v1117_v26, %v1104_v15  ;;  %v1276_v12 = vadd.f32 %v1273_v44, %v1260_v14 }
  0xde   :  { %v1290_v17 = vmul.f32 %v5510_v41, %v3624_v55  ;;  %v1306_v24 = vmul.f32 %v5511_v36, %v3632_v29  ;;  %v1417_v28 = vmul.f32 %v5514_v50, %v3556_v48  ;;  %v1430_v45 = vmul.f32 %v5515_v22, %v3588_v20 }
  0xdf   :  { %v1261_v23 = vadd.f32 %v1258_v46, %v1245_v59  ;;  %1160 = vrot.lane.b32.xlu1 %v1153_v42, %s2445_s18  ;;  %v1136_v1 = vadd.f32 %v1133_v38, %v1120_v11  ;;  %v1292_v8 = vadd.f32 %v1289_v52, %v1276_v12  ;;  %v1322_v35 = vmul.f32 %v5512_v30, %v3645_v47  ;;  %v5519_v38 = vld [vmem:[#allocation107_spill] sm:$0xff]  ;;  %v5523_v11 = vld [vmem:[#allocation21_spill] sm:$0xff] }
  0xe0   :  { %v1446_v26 = vmul.f32 %v5516_v43, %v3595_v61  ;;  %v1338_v7 = vmul.f32 %v5513_v37, %v3659_v63  ;;  %v1433_v33 = vadd.f32 %v1430_v45, %v1417_v28  ;;  %v1462_v27 = vmul.f32 %v5517_v6, %v3606_v58 }
  0xe1   :  { %v1277_v34 = vadd.f32 %v1274_v57, %v1261_v23  ;;  %v1152_v5 = vadd.f32 %v1149_v3, %v1136_v1  ;;  %v1308_v53 = vadd.f32 %v1305_v10, %v1292_v8  ;;  %v1478_v16 = vmul.f32 %v5518_v51, %v3624_v55  ;;  %v5520_v3 = vld [vmem:[#allocation108_spill] sm:$0xff]  ;;  %v5524_v23 = vld [vmem:[#allocation22_spill] sm:$0xff] }
  0xe2   :  { %v1494_v9 = vmul.f32 %v5519_v38, %v3632_v29  ;;  %v1449_v13 = vadd.f32 %v1446_v26, %v1433_v33  ;;  %v1416_v54 = vmul.f32 %v5514_v50, %v3251_v2  ;;  %v1429_v19 = vmul.f32 %v5515_v22, %v3338_v21  ;;  %v5525_v50 = vld [vmem:[#allocation23_spill] sm:$0xff]  ;;  %v5527_v26 = vld [vmem:[#allocation29_spill] sm:$0xff] }
  0xe3   :  { %v1293_v44 = vadd.f32 %v1290_v17, %v1277_v34  ;;  %1158 = vrot.lane.b32.xlu0 %v1152_v5, %s2445_s18  ;;  %v1324_v41 = vadd.f32 %v1321_v31, %v1308_v53  ;;  %v1510_v52 = vmul.f32 %v5520_v3, %v3645_v47  ;;  %v1526_v36 = vmul.f32 %v5521_v60, %v3659_v63  ;;  %v5522_v31 = vld [vmem:[#allocation20_spill] sm:$0xff] }
  0xe4   :  { %v1445_v10 = vmul.f32 %v5516_v43, %v3347_v18  ;;  %v1465_v49 = vadd.f32 %v1462_v27, %v1449_v13  ;;  %v1432_v0 = vadd.f32 %v1429_v19, %v1416_v54  ;;  %v1461_v15 = vmul.f32 %v5517_v6, %v3394_v32 }
  0xe5   :  { %v1309_v25 = vadd.f32 %v1306_v24, %v1293_v44  ;;  %v1340_v14 = vadd.f32 %v1337_v62, %v1324_v41  ;;  %v1477_v46 = vmul.f32 %v5518_v51, %v3417_v4  ;;  %v1493_v30 = vmul.f32 %v5519_v38, %v5494_v39  ;;  %v5528_v51 = vld [vmem:[#allocation68_spill] sm:$0xff]  ;;  %v5529_v38 = vld [vmem:[#allocation31_spill] sm:$0xff] }
  0xe6   :  { %v1604_v37 = vmul.f32 %v5522_v31, %v3251_v2  ;;  %v1481_v57 = vadd.f32 %v1478_v16, %v1465_v49  ;;  %v1448_v42 = vadd.f32 %v1445_v10, %v1432_v0  ;;  %v1617_v12 = vmul.f32 %v5523_v11, %v3338_v21 }
  0xe7   :  { %v1325_v59 = vadd.f32 %v1322_v35, %v1309_v25  ;;  %1346 = vrot.lane.b32.xlu1 %v1340_v14, %s2445_s18  ;;  %v1509_v62 = vmul.f32 %v5520_v3, %v3446_v56  ;;  %v1525_v17 = vmul.f32 %v5521_v60, %v3489_v40  ;;  %v1633_v24 = vmul.f32 %v5524_v23, %v3347_v18  ;;  %v5526_v35 = vld [vmem:[#allocation55_spill] sm:$0xff] }
  0xe8   :  { %v1649_v28 = vmul.f32 %v5525_v50, %v3394_v32  ;;  %v1497_v45 = vadd.f32 %v1494_v9, %v1481_v57  ;;  %v1464_v1 = vadd.f32 %v1461_v15, %v1448_v42  ;;  %v1620_v8 = vadd.f32 %v1617_v12, %v1604_v37 }
  0xe9   :  { %v1341_v22 = vadd.f32 %v1338_v7, %v1325_v59  ;;  %v1665_v43 = vmul.f32 %v5526_v35, %v3417_v4  ;;  %v1681_v34 = vmul.f32 %v5527_v26, %v5494_v39  ;;  %v1605_v33 = vmul.f32 %v5522_v31, %v3556_v48 }
  0xea   :  { %v1618_v6 = vmul.f32 %v5523_v11, %v3588_v20  ;;  %v1513_v7 = vadd.f32 %v1510_v52, %v1497_v45  ;;  %v1480_v27 = vadd.f32 %v1477_v46, %v1464_v1  ;;  %v1636_v5 = vadd.f32 %v1633_v24, %v1620_v8 }
  0xeb   :  { %1348 = vrot.lane.b32.xlu0 %v1341_v22, %s2445_s18  ;;  %v1634_v53 = vmul.f32 %v5524_v23, %v3595_v61  ;;  %v1697_v16 = vmul.f32 %v5528_v51, %v3446_v56  ;;  %v1713_v9 = vmul.f32 %v5529_v38, %v3489_v40  ;;  %v1650_v13 = vmul.f32 %v5525_v50, %v3606_v58 }
  0xec   :  { %v1621_v44 = vadd.f32 %v1618_v6, %v1605_v33  ;;  %v1529_v54 = vadd.f32 %v1526_v36, %v1513_v7  ;;  %v1496_v19 = vadd.f32 %v1493_v30, %v1480_v27  ;;  %v1652_v41 = vadd.f32 %v1649_v28, %v1636_v5 }
  0xed   :  { %v1666_v3 = vmul.f32 %v5526_v35, %v3624_v55  ;;  %v1682_v60 = vmul.f32 %v5527_v26, %v3632_v29  ;;  %v3829_v10 = vstv %s3772_s2  ;;  %v3832_v25 = vstv %s3776_s29  ;;  %s3999_s2 = sld [smem:[#allocation5 + $0xa]] }
  0xee   :  { %v1637_v52 = vadd.f32 %v1634_v53, %v1621_v44  ;;  %1536 = vrot.lane.b32.xlu1 %v1529_v54, %s2445_s18  ;;  %v1512_v36 = vadd.f32 %v1509_v62, %v1496_v19  ;;  %v1668_v49 = vadd.f32 %v1665_v43, %v1652_v41  ;;  %v1793_v0 = vmul.f32 %v3829_v10, %v3556_v48  ;;  %s4005_s29 = sld [smem:[#allocation5 + $0xc]] }
  0xef   :  { %v1806_v15 = vmul.f32 %v3832_v25, %v3588_v20  ;;  %v3844_v46 = vstv %s3784_s30  ;;  %v3847_v30 = vstv %s3788_s4  ;;  %v3850_v31 = vstv %s3799_s5  ;;  %s4011_s30 = sld [smem:[#allocation5 + $0xe]] }
  0xf0   :  { %v1653_v14 = vadd.f32 %v1650_v13, %v1637_v52  ;;  %v1528_v37 = vadd.f32 %v1525_v17, %v1512_v36  ;;  %v1684_v59 = vadd.f32 %v1681_v34, %v1668_v49  ;;  %v1822_v42 = vmul.f32 %v3844_v46, %v3595_v61  ;;  %s4017_s4 = sld [smem:[#allocation5 + $0x40]] }
  0xf1   :  { %v1809_v57 = vadd.f32 %v1806_v15, %v1793_v0  ;;  %v1698_v12 = vmul.f32 %v5528_v51, %v3645_v47  ;;  %v1838_v62 = vmul.f32 %v3847_v30, %v3606_v58  ;;  %v3863_v23 = vstv %s3809_s6  ;;  %s4028_s5 = sld [smem:[#allocation5 + $0x42]] }
  0xf2   :  { %v1669_v11 = vadd.f32 %v1666_v3, %v1653_v14  ;;  %1534 = vrot.lane.b32.xlu0 %v1528_v37, %s2445_s18  ;;  %v1700_v17 = vadd.f32 %v1697_v16, %v1684_v59  ;;  %v1854_v50 = vmul.f32 %v3850_v31, %v3624_v55  ;;  %v3871_v28 = vstv %s3814_s7  ;;  %s4035_s6 = sld [smem:[#allocation5 + $0x44]] }
  0xf3   :  { %v1825_v24 = vadd.f32 %v1822_v42, %v1809_v57  ;;  %v1714_v45 = vmul.f32 %v5529_v38, %v3659_v63  ;;  %v3876_v1 = vstv %s3822_s8  ;;  %v1792_v8 = vmul.f32 %v3829_v10, %v3251_v2  ;;  %v5530_v42 = vld [vmem:[#allocation16_spill] sm:$0xff]  ;;  %s4044_s7 = sld [smem:[#allocation5 + $0x46]] }
  0xf4   :  { %v1685_v22 = vadd.f32 %v1682_v60, %v1669_v11  ;;  %v1716_v35 = vadd.f32 %v1713_v9, %v1700_v17  ;;  %v1870_v26 = vmul.f32 %v3863_v23, %v3632_v29  ;;  %v1805_v34 = vmul.f32 %v3832_v25, %v3338_v21  ;;  %s4050_s8 = sld [smem:[#allocation5 + $0x48]] }
  0xf5   :  { %v1841_v43 = vadd.f32 %v1838_v62, %v1825_v24  ;;  %v1886_v6 = vmul.f32 %v3871_v28, %v3645_v47  ;;  %v1821_v7 = vmul.f32 %v3844_v46, %v3347_v18  ;;  %v1902_v5 = vmul.f32 %v3876_v1, %v3659_v63 }
  0xf6   :  { %v1701_v33 = vadd.f32 %v1698_v12, %v1685_v22  ;;  %1722 = vrot.lane.b32.xlu1 %v1716_v35, %s2445_s18  ;;  %v1808_v53 = vadd.f32 %v1805_v34, %v1792_v8  ;;  %v1837_v51 = vmul.f32 %v3847_v30, %v3394_v32  ;;  %v1853_v38 = vmul.f32 %v3850_v31, %v3417_v4  ;;  %v5531_v22 = vld [vmem:[#allocation26_spill] sm:$0xff] }
  0xf7   :  { %v1857_v27 = vadd.f32 %v1854_v50, %v1841_v43  ;;  %v3902_v9 = vstv %s3834_s9  ;;  %v3905_v44 = vstv %s3841_s10  ;;  %v1869_v3 = vmul.f32 %v3863_v23, %v5494_v39  ;;  %v5532_v8 = vld [vmem:[#allocation38_spill] sm:$0xff]  ;;  %s4060_s9 = sld [smem:[#allocation5 + $0x4a]] }
  0xf8   :  { %v1717_v16 = vadd.f32 %v1714_v45, %v1701_v33  ;;  %v1824_v54 = vadd.f32 %v1821_v7, %v1808_v53  ;;  %v1980_v19 = vmul.f32 %v3902_v9, %v3251_v2  ;;  %v1993_v41 = vmul.f32 %v3905_v44, %v3338_v21  ;;  %s4071_s10 = sld [smem:[#allocation5 + $0x4c]] }
  0xf9   :  { %v1873_v13 = vadd.f32 %v1870_v26, %v1857_v27  ;;  %v2008_v52 = vstv %s3852_s11  ;;  %v3920_v60 = vstv %s3856_s12  ;;  %v3923_v36 = vstv %s3865_s13  ;;  %s4079_s11 = sld [smem:[#allocation5 + $0x4e]] }
  0xfa   :  { %1724 = vrot.lane.b32.xlu0 %v1717_v16, %s2445_s18  ;;  %v1840_v0 = vadd.f32 %v1837_v51, %v1824_v54  ;;  %v1996_v15 = vadd.f32 %v1993_v41, %v1980_v19  ;;  %v2009_v14 = vmul.f32 %v2008_v52, %v3347_v18  ;;  %v1885_v37 = vmul.f32 %v3871_v28, %v3446_v56  ;;  %v5534_v16 = vld [vmem:[#allocation63_spill] sm:$0xff]  ;;  %s4088_s12 = sld [smem:[#allocation5 + $0x10]] }
  0xfb   :  { %v1889_v49 = vadd.f32 %v1886_v6, %v1873_v13  ;;  %v2025_v59 = vmul.f32 %v3920_v60, %v3394_v32  ;;  %v3935_v57 = vstv %s3880_s14  ;;  %v1794_v11 = vmul.f32 %v3829_v10, %v5530_v42  ;;  %v5533_v6 = vld [vmem:[#allocation50_spill] sm:$0xff]  ;;  %s4097_s13 = sld [smem:[#allocation5 + $0x12]] }
  0xfc   :  { %v1856_v62 = vadd.f32 %v1853_v38, %v1840_v0  ;;  %v2012_v17 = vadd.f32 %v2009_v14, %v1996_v15  ;;  %v2041_v24 = vmul.f32 %v3923_v36, %v3417_v4  ;;  %v3946_v50 = vstv %s3890_s15  ;;  %v5536_v15 = vld [vmem:[#allocation88_spill] sm:$0xff]  ;;  %s4110_s14 = sld [smem:[#allocation5 + $0x14]] }
  0xfd   :  { %v1905_v12 = vadd.f32 %v1902_v5, %v1889_v49  ;;  %v1807_v45 = vmul.f32 %v3832_v25, %v5531_v22  ;;  %v1823_v35 = vmul.f32 %v3844_v46, %v5532_v8  ;;  %v1901_v43 = vmul.f32 %v3876_v1, %v3489_v40  ;;  %s4118_s15 = sld [smem:[#allocation5 + $0x16]] }
  0xfe   :  { %v1872_v10 = vadd.f32 %v1869_v3, %v1856_v62  ;;  %v2028_v26 = vadd.f32 %v2025_v59, %v2012_v17  ;;  %v2057_v34 = vmul.f32 %v3935_v57, %v5494_v39  ;;  %v3962_v33 = vstv %s3897_s16  ;;  %v5535_v3 = vld [vmem:[#allocation76_spill] sm:$0xff]  ;;  %v5537_v62 = vld [vmem:[#allocation97_spill] sm:$0xff]  ;;  %s4131_s16 = sld [smem:[#allocation5 + $0x18]] }
  0xff   :  { %1912 = vrot.lane.b32.xlu1 %v1905_v12, %s2445_s18  ;;  %v1810_v25 = vadd.f32 %v1807_v45, %v1794_v11  ;;  %v1839_v46 = vmul.f32 %v3847_v30, %v5533_v6  ;;  %v2073_v5 = vmul.f32 %v3946_v50, %v3446_v56  ;;  %v1982_v53 = vmul.f32 %v3902_v9, %v5530_v42 }
 0x100   :  { %v1888_v7 = vadd.f32 %v1885_v37, %v1872_v10  ;;  %v2044_v27 = vadd.f32 %v2041_v24, %v2028_v26  ;;  %v1855_v38 = vmul.f32 %v3850_v31, %v5534_v16  ;;  %v1995_v13 = vmul.f32 %v3905_v44, %v5531_v22 }
 0x101   :  { %v1826_v51 = vadd.f32 %v1823_v35, %v1810_v25  ;;  %v2011_v30 = vmul.f32 %v2008_v52, %v5532_v8  ;;  %v2089_v41 = vmul.f32 %v3962_v33, %v3489_v40  ;;  %v1871_v49 = vmul.f32 %v3863_v23, %v5535_v3 }
 0x102   :  { %v1904_v54 = vadd.f32 %v1901_v43, %v1888_v7  ;;  %v2060_v19 = vadd.f32 %v2057_v34, %v2044_v27  ;;  %v1887_v31 = vmul.f32 %v3871_v28, %v5536_v15  ;;  %v1998_v14 = vadd.f32 %v1995_v13, %v1982_v53 }
 0x103   :  { %v1842_v0 = vadd.f32 %v1839_v46, %v1826_v51  ;;  %v2027_v37 = vmul.f32 %v3920_v60, %v5533_v6  ;;  %v1981_v11 = vmul.f32 %v3902_v9, %v3556_v48  ;;  %v1994_v23 = vmul.f32 %v3905_v44, %v3588_v20 }
 0x104   :  { %1910 = vrot.lane.b32.xlu0 %v1904_v54, %s2445_s18  ;;  %v2076_v59 = vadd.f32 %v2073_v5, %v2060_v19  ;;  %v2010_v12 = vmul.f32 %v2008_v52, %v3595_v61  ;;  %v1903_v17 = vmul.f32 %v3876_v1, %v5537_v62  ;;  %v2014_v24 = vadd.f32 %v2011_v30, %v1998_v14 }
 0x105   :  { %v1858_v28 = vadd.f32 %v1855_v38, %v1842_v0  ;;  %v2043_v45 = vmul.f32 %v3923_v36, %v5534_v16  ;;  %v2059_v44 = vmul.f32 %v3935_v57, %v5535_v3  ;;  %v1997_v35 = vadd.f32 %v1994_v23, %v1981_v11 }
 0x106   :  { %v2092_v9 = vadd.f32 %v2089_v41, %v2076_v59  ;;  %v2026_v52 = vmul.f32 %v3920_v60, %v3606_v58  ;;  %v2030_v10 = vadd.f32 %v2027_v37, %v2014_v24  ;;  %v2075_v43 = vmul.f32 %v3946_v50, %v5536_v15 }
 0x107   :  { %v1874_v1 = vadd.f32 %v1871_v49, %v1858_v28  ;;  %v2091_v26 = vmul.f32 %v3962_v33, %v5537_v62  ;;  %v2013_v34 = vadd.f32 %v2010_v12, %v1997_v35  ;;  %v2042_v60 = vmul.f32 %v3923_v36, %v3624_v55 }
 0x108   :  { %2098 = vrot.lane.b32.xlu1 %v2092_v9, %s2445_s18  ;;  %v4023_v25 = vstv %s3913_s19  ;;  %v4026_v46 = vstv %s3925_s20  ;;  %v2046_v27 = vadd.f32 %v2043_v45, %v2030_v10  ;;  %v2058_v5 = vmul.f32 %v3935_v57, %v3632_v29  ;;  %s4151_s19 = sld [smem:[#allocation5 + $0x1c]] }
 0x109   :  { %5538 = vst [vmem:[#allocation24_spill] sm:$0xff] %v4026_v46  ;;  %v1890_v7 = vadd.f32 %v1887_v31, %v1874_v1  ;;  %v4033_v53 = vstv %s3907_s17  ;;  %v2029_v51 = vadd.f32 %v2026_v52, %v2013_v34  ;;  %v2074_v36 = vmul.f32 %v3946_v50, %v3645_v47  ;;  %s4141_s17 = sld [smem:[#allocation5 + $0x1a]] }
 0x10a   :  { %v1047_v38 = vmul.f32 %v4023_v25, %v5531_v22  ;;  %v4042_v13 = vstv %s3928_s0  ;;  %v2062_v54 = vadd.f32 %v2059_v44, %v2046_v27  ;;  %v2090_v57 = vmul.f32 %v3962_v33, %v3659_v63  ;;  %s4160_s20 = sld [smem:[#allocation5 + $0x1e]] }
 0x10b   :  { %5539 = vst [vmem:[#allocation30_spill] sm:$0xff] %v4042_v13  ;;  %v1906_v30 = vadd.f32 %v1903_v17, %v1890_v7  ;;  %v1063_v19 = vmul.f32 %v4026_v46, %v5532_v8  ;;  %v2045_v50 = vadd.f32 %v2042_v60, %v2029_v51  ;;  %v4053_v41 = vstv %s3939_s1  ;;  %s4169_s0 = sld [smem:[#allocation5 + $0x30]] }
 0x10c   :  { %5540 = vst [vmem:[#allocation32_spill] sm:$0xff] %v4053_v41  ;;  %v4056_v49 = vstv %s3943_s21  ;;  %v1037_v0 = vmul.f32 %v4033_v53, %v5530_v42  ;;  %v2078_v33 = vadd.f32 %v2075_v43, %v2062_v54  ;;  %v1079_v31 = vmul.f32 %v4042_v13, %v5533_v6  ;;  %s4176_s1 = sld [smem:[#allocation5 + $0x32]] }
 0x10d   :  { %5541 = vst [vmem:[#allocation34_spill] sm:$0xff] %v4056_v49  ;;  %1914 = vrot.lane.b32.xlu0 %v1906_v30, %s2445_s18  ;;  %v4066_v14 = vstv %s3952_s22  ;;  %v4069_v37 = vstv %s3959_s23  ;;  %v2061_v59 = vadd.f32 %v2058_v5, %v2045_v50  ;;  %v4074_v23 = vstv %s3972_s25  ;;  %s4187_s21 = sld [smem:[#allocation5 + $0x34]] }
 0x10e   :  { %5542 = vst [vmem:[#allocation33_spill] sm:$0xff] %v4066_v14  ;;  %5543 = vst [vmem:[#allocation35_spill] sm:$0xff] %v4069_v37  ;;  %v1050_v11 = vadd.f32 %v1047_v38, %v1037_v0  ;;  %v4077_v12 = vstv %s3979_s26  ;;  %v2094_v28 = vadd.f32 %v2091_v26, %v2078_v33  ;;  %v1095_v17 = vmul.f32 %v4053_v41, %v5534_v16  ;;  %s4195_s22 = sld [smem:[#allocation5 + $0x36]] }
 0x10f   :  { %v1111_v24 = vmul.f32 %v4056_v49, %v5535_v3  ;;  %v4086_v45 = vstv %s3985_s27  ;;  %v2077_v9 = vadd.f32 %v2074_v36, %v2061_v59  ;;  %v4092_v44 = vmul.f32 %v4066_v14, %v5536_v15  ;;  %s4206_s23 = sld [smem:[#allocation5 + $0x38]] }
 0x110   :  { %v1066_v35 = vadd.f32 %v1063_v19, %v1050_v11  ;;  %v4095_v52 = vstv %s3966_s24  ;;  %2102 = vrot.lane.b32.xlu1 %v2094_v28, %s2445_s18  ;;  %v4102_v1 = vmul.f32 %v4069_v37, %v5537_v62  ;;  %v670_v10 = vmul.f32 %v4074_v23, %v5531_v22  ;;  %s4218_s24 = sld [smem:[#allocation5 + $0x3a]] }
 0x111   :  { %v686_v43 = vmul.f32 %v4077_v12, %v5532_v8  ;;  %v702_v26 = vmul.f32 %v4086_v45, %v5533_v6  ;;  %v2093_v34 = vadd.f32 %v2090_v57, %v2077_v9  ;;  %v4113_v7 = vstv %s3991_s28  ;;  %s4232_s25 = sld [smem:[#allocation5 + $0x3c]] }
 0x112   :  { %v1082_v60 = vadd.f32 %v1079_v31, %v1066_v35  ;;  %v4116_v27 = vstv %s3999_s2  ;;  %v4121_v5 = vstv %s4005_s29  ;;  %v660_v51 = vmul.f32 %v4095_v52, %v5530_v42  ;;  %s4236_s26 = sld [smem:[#allocation5 + $0x3e]] }
 0x113   :  { %v4126_v36 = vstv %s4017_s4  ;;  %v4129_v38 = vstv %s4028_s5  ;;  %2100 = vrot.lane.b32.xlu0 %v2093_v34, %s2445_s18  ;;  %v4139_v19 = vstv %s4035_s6  ;;  %v718_v59 = vmul.f32 %v4113_v7, %v5534_v16  ;;  %s4260_s27 = sld [smem:[#allocation5 + $0x50]] }
 0x114   :  { %5544 = vst [vmem:[#allocation36_spill] sm:$0xff] %v4126_v36  ;;  %5545 = vst [vmem:[#allocation81_spill] sm:$0xff] %v4129_v38  ;;  %v1098_v30 = vadd.f32 %v1095_v17, %v1082_v60  ;;  %v1413_v54 = vmul.f32 %v4126_v36, %v5530_v42  ;;  %v1423_v57 = vmul.f32 %v4129_v38, %v5531_v22  ;;  %v4146_v33 = vstv %s4044_s7  ;;  %s4266_s28 = sld [smem:[#allocation5 + $0x52]] }
 0x115   :  { %5546 = vst [vmem:[#allocation41_spill] sm:$0xff] %v4139_v19  ;;  %v673_v50 = vadd.f32 %v670_v10, %v660_v51  ;;  %v1439_v0 = vmul.f32 %v4139_v19, %v5532_v8  ;;  %5547 = vst [vmem:[#allocation43_spill] sm:$0xff] %v4146_v33  ;;  %v4149_v31 = vstv %s4050_s8  ;;  %v4156_v11 = vstv %s4011_s30  ;;  %s4275_s2 = sld [smem:[#allocation5 + $0x54]] }
 0x116   :  { %5548 = vst [vmem:[#allocation44_spill] sm:$0xff] %v4149_v31  ;;  %v1426_v28 = vadd.f32 %v1423_v57, %v1413_v54  ;;  %v1455_v17 = vmul.f32 %v4146_v33, %v5533_v6  ;;  %v734_v9 = vmul.f32 %v4116_v27, %v5535_v3  ;;  %v750_v35 = vmul.f32 %v4121_v5, %v5536_v15  ;;  %s4281_s29 = sld [smem:[#allocation5 + $0x56]] }
 0x117   :  { %v689_v10 = vadd.f32 %v686_v43, %v673_v50  ;;  %v4167_v34 = vstv %s4060_s9  ;;  %v1114_v60 = vadd.f32 %v1111_v24, %v1098_v30  ;;  %v1471_v54 = vmul.f32 %v4149_v31, %v5534_v16  ;;  %s4293_s30 = sld [smem:[#allocation5 + $0x58]] }
 0x118   :  { %5549 = vst [vmem:[#allocation46_spill] sm:$0xff] %v4167_v34  ;;  %v1442_v51 = vadd.f32 %v1439_v0, %v1426_v28  ;;  %v4174_v57 = vstv %s4071_s10  ;;  %v4179_v19 = vstv %s4079_s11  ;;  %v4182_v43 = vstv %s4088_s12  ;;  %s4303_s4 = sld [smem:[#allocation5 + $0x5a]] }
 0x119   :  { %5550 = vst [vmem:[#allocation47_spill] sm:$0xff] %v4174_v57  ;;  %v705_v33 = vadd.f32 %v702_v26, %v689_v10  ;;  %5551 = vst [vmem:[#allocation53_spill] sm:$0xff] %v4179_v19  ;;  %v4185_v50 = vstv %s4097_s13  ;;  %v1487_v30 = vmul.f32 %v4167_v34, %v5535_v3  ;;  %v849_v0 = vmul.f32 %v4182_v43, %v5530_v42  ;;  %s4312_s5 = sld [smem:[#allocation5 + $0x5c]] }
 0x11a   :  { %v1458_v24 = vadd.f32 %v1455_v17, %v1442_v51  ;;  %v859_v28 = vmul.f32 %v4185_v50, %v5531_v22  ;;  %v4198_v10 = vstv %s4110_s14  ;;  %v4201_v31 = vstv %s4118_s15  ;;  %s4322_s6 = sld [smem:[#allocation5 + $0x5e]] }
 0x11b   :  { %v721_v26 = vadd.f32 %v718_v59, %v705_v33  ;;  %v4204_v38 = vstv %s4131_s16  ;;  %v1503_v51 = vmul.f32 %v4174_v57, %v5536_v15  ;;  %v875_v36 = vmul.f32 %v4198_v10, %v5532_v8  ;;  %s4614_s7 = sld [smem:[#allocation5 + $0x60]] }
 0x11c   :  { %v1474_v17 = vadd.f32 %v1471_v54, %v1458_v24  ;;  %v862_v34 = vadd.f32 %v859_v28, %v849_v0  ;;  %v1130_v33 = vadd.f32 %v4092_v44, %v1114_v60  ;;  %v891_v37 = vmul.f32 %v4201_v31, %v5533_v6  ;;  %v1163_v54 = vpop.permute.xlu0 %1162  ;;  %s4622_s8 = sld [smem:[#allocation5 + $0x62]] }
 0x11d   :  { %v737_v59 = vadd.f32 %v734_v9, %v721_v26  ;;  %v4216_v14 = vstv %s4141_s17  ;;  %v766_v24 = vmul.f32 %v4156_v11, %v5537_v62  ;;  %v907_v28 = vmul.f32 %v4204_v38, %v5534_v16  ;;  %s4632_s9 = sld [smem:[#allocation5 + $0x64]] }
 0x11e   :  { %v1490_v57 = vadd.f32 %v1487_v30, %v1474_v17  ;;  %v878_v0 = vadd.f32 %v875_v36, %v862_v34  ;;  %v1519_v9 = vmul.f32 %v4179_v19, %v5537_v62  ;;  %v4227_v60 = vstv %s4151_s19  ;;  %v786_v34 = vpop.permute.xlu1 %785  ;;  %s4640_s10 = sld [smem:[#allocation5 + $0x66]] }
 0x11f   :  { %v753_v44 = vadd.f32 %v750_v35, %v737_v59  ;;  %5552 = vst [vmem:[#allocation56_spill] sm:$0xff] %v4227_v60  ;;  %v4230_v26 = vstv %s4169_s0  ;;  %v923_v36 = vmul.f32 %v4216_v14, %v5535_v3  ;;  %v1146_v35 = vadd.f32 %v4102_v1, %v1130_v33  ;;  %s4647_s11 = sld [smem:[#allocation5 + $0x68]] }
 0x120   :  { %5553 = vst [vmem:[#allocation54_spill] sm:$0xff] %v4230_v26  ;;  %v1506_v49 = vadd.f32 %v1503_v51, %v1490_v57  ;;  %v894_v30 = vadd.f32 %v891_v37, %v878_v0  ;;  %v4240_v17 = vstv %s4160_s20  ;;  %v1225_v59 = vmul.f32 %v4230_v26, %v5530_v42  ;;  %v1539_v26 = vpop.permute.xlu0 %1538  ;;  %s4653_s12 = sld [smem:[#allocation5 + $0x6a]] }
 0x121   :  { %5554 = vst [vmem:[#allocation48_spill] sm:$0xff] %v4240_v17  ;;  %v4245_v19 = vstv %s4176_s1  ;;  %v769_v41 = vadd.f32 %v766_v24, %v753_v44  ;;  %v939_v37 = vmul.f32 %v4227_v60, %v5536_v15  ;;  %v4252_v0 = vstv %s4187_s21  ;;  %s4669_s13 = sld [smem:[#allocation5 + $0x6c]] }
 0x122   :  { %5555 = vst [vmem:[#allocation57_spill] sm:$0xff] %v4245_v19  ;;  %v910_v13 = vadd.f32 %v907_v28, %v894_v30  ;;  %v1235_v57 = vmul.f32 %v4245_v19, %v5531_v22  ;;  %v1522_v51 = vadd.f32 %v1519_v9, %v1506_v49  ;;  %5556 = vst [vmem:[#allocation59_spill] sm:$0xff] %v4252_v0  ;;  %v4255_v1 = vstv %s4195_s22  ;;  %s4682_s14 = sld [smem:[#allocation5 + $0x6e]]  ;;  %s2446_s22 = smov 126  }
 0x123   :  { %5557 = vst [vmem:[#allocation66_spill] sm:$0xff] %v4255_v1  ;;  %v4258_v33 = vstv %s4206_s23  ;;  %v955_v24 = vmul.f32 %v4240_v17, %v5537_v62  ;;  %v1251_v44 = vmul.f32 %v4252_v0, %v5532_v8  ;;  %v4268_v49 = vadd.f32 %v1163_v54, %v1146_v35  ;;  %v975_v54 = vpop.permute.xlu1 %974  ;;  %s4715_s15 = sld [smem:[#allocation5 + $0x70]] }
 0x124   :  { %v926_v46 = vadd.f32 %v923_v36, %v910_v13  ;;  %v1238_v28 = vadd.f32 %v1235_v57, %v1225_v59  ;;  %v1267_v9 = vmul.f32 %v4255_v1, %v5533_v6  ;;  %v4273_v30 = vstv %s4218_s24  ;;  %s4722_s16 = sld [smem:[#allocation5 + $0x72]] }
 0x125   :  { %v4277_v13 = vadd.f32 %v786_v34, %v769_v41  ;;  %v1283_v59 = vmul.f32 %v4258_v33, %v5534_v16  ;;  %v4283_v57 = vadd.f32 %v1539_v26, %v1522_v51  ;;  %v4286_v35 = vstv %s4232_s25  ;;  %s4728_s17 = sld [smem:[#allocation5 + $0x74]] }
 0x126   :  { %v942_v36 = vadd.f32 %v939_v37, %v926_v46  ;;  %v1254_v19 = vadd.f32 %v1251_v44, %v1238_v28  ;;  %5559 = vst [vmem:[#allocation61_spill] sm:$0xff] %v4286_v35  ;;  %v1299_v17 = vmul.f32 %v4273_v30, %v5535_v3  ;;  %v4291_v60 = vstv %s4236_s26  ;;  %s4745_s19 = sld [smem:[#allocation5 + $0x76]] }
 0x127   :  { %5558 = vst [vmem:[#allocation60_spill] sm:$0xff] %v4283_v57  ;;  %5560 = vst [vmem:[#allocation69_spill] sm:$0xff] %v4291_v60  ;;  %v668_v41 = vmul.f32 %v4074_v23, %v3338_v21  ;;  %v684_v28 = vmul.f32 %v4077_v12, %v3347_v18  ;;  %v700_v44 = vmul.f32 %v4086_v45, %v3394_v32  ;;  %v4329_v26 = vstv %s4275_s2  ;;  %s4757_s20 = sld [smem:[#allocation5 + $0x78]] }
 0x128   :  { %v958_v0 = vadd.f32 %v955_v24, %v942_v36  ;;  %v1270_v1 = vadd.f32 %v1267_v9, %v1254_v19  ;;  %v1315_v19 = vmul.f32 %v4286_v35, %v5536_v15  ;;  %v1331_v24 = vmul.f32 %v4291_v60, %v5537_v62  ;;  %5563 = vst [vmem:[#allocation72_spill] sm:$0xff] %v4329_v26  ;;  %s4776_s0 = sld [smem:[#allocation5 + $0x7a]] }
 0x129   :  { %v4317_v9 = vstv %s4260_s27  ;;  %v4320_v36 = vstv %s4266_s28  ;;  %v1627_v46 = vmul.f32 %v4329_v26, %v5532_v8  ;;  %v4335_v60 = vstv %s4281_s29  ;;  %s4804_s1 = sld [smem:[#allocation5 + $0x7c]] }
 0x12a   :  { %v4299_v34 = vadd.f32 %v975_v54, %v958_v0  ;;  %v1286_v37 = vadd.f32 %v1283_v59, %v1270_v1  ;;  %v658_v0 = vmul.f32 %v4095_v52, %v3251_v2  ;;  %5561 = vst [vmem:[#allocation67_spill] sm:$0xff] %v4317_v9  ;;  %5562 = vst [vmem:[#allocation70_spill] sm:$0xff] %v4320_v36  ;;  %v5565_v35 = vrot.slane %v4268_v49, 1  ;;  %s4821_s21 = sld [smem:[#allocation5 + $0x7e]] }
 0x12b   :  { %v1601_v54 = vmul.f32 %v4317_v9, %v5530_v42  ;;  %v1611_v51 = vmul.f32 %v4320_v36, %v5531_v22  ;;  %5564 = vst [vmem:[#allocation71_spill] sm:$0xff] %v4335_v60  ;;  %v716_v42 = vmul.f32 %v4113_v7, %v3417_v4  ;;  %v1643_v8 = vmul.f32 %v4335_v60, %v5533_v6 }
 0x12c   :  { %v1302_v1 = vadd.f32 %v1299_v17, %v1286_v37  ;;  %v671_v59 = vadd.f32 %v668_v41, %v658_v0  ;;  %v4340_v41 = vmax.f32 %v4268_v49, %v5565_v35  ;;  %v1351_v0 = vpop.permute.xlu1 %1350  ;;  %v5567_v17 = vrot.slane %v4277_v13, 1 }
 0x12d   :  { %v1614_v36 = vadd.f32 %v1611_v51, %v1601_v54  ;;  %v4352_v35 = vstv %s4293_s30  ;;  %v5569_v26 = vrot.slane %v4283_v57, 1  ;;  %v732_v51 = vmul.f32 %v4116_v27, %v5494_v39 }
 0x12e   :  { %v1318_v37 = vadd.f32 %v1315_v19, %v1302_v1  ;;  %5566 = vst [vmem:[#allocation73_spill] sm:$0xff] %v4340_v41  ;;  %v687_v22 = vadd.f32 %v684_v28, %v671_v59  ;;  %v4347_v19 = vmax.f32 %v4277_v13, %v5567_v17  ;;  %5568 = vst [vmem:[#allocation75_spill] sm:$0xff] %v4352_v35  ;;  %v5571_v54 = vrot.slane %v4299_v34, 1 }
 0x12f   :  { %v4357_v9 = vmax.f32 %v4283_v57, %v5569_v26  ;;  %v1630_v59 = vadd.f32 %v1627_v46, %v1614_v36  ;;  %v659_v6 = vmul.f32 %v4095_v52, %v3556_v48  ;;  %v1659_v57 = vmul.f32 %v4352_v35, %v5534_v16 }
 0x130   :  { %v1334_v1 = vadd.f32 %v1331_v24, %v1318_v37  ;;  %v703_v28 = vadd.f32 %v700_v44, %v687_v22  ;;  %v4364_v24 = vmax.f32 %v4299_v34, %v5571_v54  ;;  %v748_v37 = vmul.f32 %v4121_v5, %v3446_v56 }
 0x131   :  { %5570 = vst [vmem:[#allocation74_spill] sm:$0xff] %v4357_v9  ;;  %v4375_v60 = vstv %s4303_s4  ;;  %v669_v22 = vmul.f32 %v4074_v23, %v3588_v20  ;;  %v1646_v46 = vadd.f32 %v1643_v8, %v1630_v59  ;;  %v4380_v44 = vstv %s4312_s5 }
 0x132   :  { %v4366_v17 = vadd.f32 %v1351_v0, %v1334_v1  ;;  %v719_v26 = vadd.f32 %v716_v42, %v703_v28  ;;  %5572 = vst [vmem:[#allocation77_spill] sm:$0xff] %v4375_v60  ;;  %5573 = vst [vmem:[#allocation79_spill] sm:$0xff] %v4380_v44  ;;  %v4383_v36 = vstv %s4322_s6  ;;  %v685_v0 = vmul.f32 %v4077_v12, %v3595_v61 }
 0x133   :  { %5574 = vst [vmem:[#allocation80_spill] sm:$0xff] %v4383_v36  ;;  %v672_v42 = vadd.f32 %v669_v22, %v659_v6  ;;  %v701_v28 = vmul.f32 %v4086_v45, %v3606_v58  ;;  %v764_v23 = vmul.f32 %v4156_v11, %v3489_v40  ;;  %v1675_v12 = vmul.f32 %v4375_v60, %v5535_v3 }
 0x134   :  { %v735_v52 = vadd.f32 %v732_v51, %v719_v26  ;;  %v717_v6 = vmul.f32 %v4113_v7, %v3624_v55  ;;  %v1662_v51 = vadd.f32 %v1659_v57, %v1646_v46  ;;  %v1691_v45 = vmul.f32 %v4380_v44, %v5536_v15 }
 0x135   :  { %v688_v1 = vadd.f32 %v685_v0, %v672_v42  ;;  %v4404_v26 = vmul.f32 %v4383_v36, %v5537_v62  ;;  %v857_v22 = vmul.f32 %v4185_v50, %v3338_v21  ;;  %v5575_v8 = vrot.slane %v4366_v17, 1 }
 0x136   :  { %v751_v0 = vadd.f32 %v748_v37, %v735_v52  ;;  %v733_v7 = vmul.f32 %v4116_v27, %v3632_v29  ;;  %v873_v57 = vmul.f32 %v4198_v10, %v3347_v18  ;;  %v847_v46 = vmul.f32 %v4182_v43, %v3251_v2 }
 0x137   :  { %v4411_v54 = vmax.f32 %v4366_v17, %v5575_v8  ;;  %v704_v42 = vadd.f32 %v701_v28, %v688_v1  ;;  %v848_v59 = vmul.f32 %v4182_v43, %v3556_v48  ;;  %v858_v16 = vmul.f32 %v4185_v50, %v3588_v20  ;;  %v5584_v50 = vld [vmem:[#allocation54_spill] sm:$0xff] }
 0x138   :  { %v749_v37 = vmul.f32 %v4121_v5, %v3645_v47  ;;  %v765_v1 = vmul.f32 %v4156_v11, %v3659_v63  ;;  %v874_v27 = vmul.f32 %v4198_v10, %v3595_v61  ;;  %v889_v52 = vmul.f32 %v4201_v31, %v3394_v32  ;;  %v782_v5 = vpop.permute.xlu0 %781 }
 0x139   :  { %5576 = vst [vmem:[#allocation82_spill] sm:$0xff] %v4411_v54  ;;  %v720_v62 = vadd.f32 %v717_v6, %v704_v42  ;;  %v860_v28 = vadd.f32 %v857_v22, %v847_v46  ;;  %v861_v8 = vadd.f32 %v858_v16, %v848_v59  ;;  %v890_v43 = vmul.f32 %v4201_v31, %v3606_v58  ;;  %v5579_v46 = vld [vmem:[#allocation56_spill] sm:$0xff] }
 0x13a   :  { %v767_v6 = vadd.f32 %v764_v23, %v751_v0  ;;  %v1678_v42 = vadd.f32 %v1675_v12, %v1662_v51  ;;  %v905_v11 = vmul.f32 %v4204_v38, %v3417_v4  ;;  %v906_v10 = vmul.f32 %v4204_v38, %v3624_v55  ;;  %v5577_v51 = vld [vmem:[#allocation24_spill] sm:$0xff] }
 0x13b   :  { %v736_v15 = vadd.f32 %v733_v7, %v720_v62  ;;  %v876_v3 = vadd.f32 %v873_v57, %v860_v28  ;;  %v877_v9 = vadd.f32 %v874_v27, %v861_v8  ;;  %v921_v16 = vmul.f32 %v4216_v14, %v5494_v39  ;;  %v5578_v7 = vld [vmem:[#allocation30_spill] sm:$0xff]  ;;  %v5580_v28 = vld [vmem:[#allocation32_spill] sm:$0xff] }
 0x13c   :  { %v1036_v31 = vmul.f32 %v4033_v53, %v3556_v48  ;;  %v1046_v23 = vmul.f32 %v4023_v25, %v3588_v20  ;;  %v922_v12 = vmul.f32 %v4216_v14, %v3632_v29  ;;  %v1062_v22 = vmul.f32 %v5577_v51, %v3595_v61 }
 0x13d   :  { %v752_v36 = vadd.f32 %v749_v37, %v736_v15  ;;  %v892_v62 = vadd.f32 %v889_v52, %v876_v3  ;;  %v893_v59 = vadd.f32 %v890_v43, %v877_v9  ;;  %v4448_v0 = vadd.f32 %v782_v5, %v767_v6  ;;  %v5581_v43 = vld [vmem:[#allocation48_spill] sm:$0xff] }
 0x13e   :  { %v4450_v15 = vadd.f32 %v1691_v45, %v1678_v42  ;;  %v1049_v38 = vadd.f32 %v1046_v23, %v1036_v31  ;;  %v1078_v57 = vmul.f32 %v5578_v7, %v3606_v58  ;;  %v937_v37 = vmul.f32 %v5579_v46, %v3446_v56 }
 0x13f   :  { %v908_v27 = vadd.f32 %v905_v11, %v892_v62  ;;  %v909_v3 = vadd.f32 %v906_v10, %v893_v59  ;;  %v938_v9 = vmul.f32 %v5579_v46, %v3645_v47  ;;  %v768_v14 = vadd.f32 %v765_v1, %v752_v36  ;;  %v4469_v36 = vpop.permute.xlu1 %1726 }
 0x140   :  { %v1065_v52 = vadd.f32 %v1062_v22, %v1049_v38  ;;  %v1094_v8 = vmul.f32 %v5580_v28, %v3624_v55  ;;  %v1035_v45 = vmul.f32 %v4033_v53, %v3251_v2  ;;  %v953_v6 = vmul.f32 %v5581_v43, %v3489_v40  ;;  %v5582_v53 = vld [vmem:[#allocation34_spill] sm:$0xff] }
 0x141   :  { %v925_v42 = vadd.f32 %v922_v12, %v909_v3  ;;  %v1045_v5 = vmul.f32 %v4023_v25, %v3338_v21  ;;  %v1061_v11 = vmul.f32 %v5577_v51, %v3347_v18  ;;  %v954_v1 = vmul.f32 %v5581_v43, %v3659_v63  ;;  %v5583_v12 = vld [vmem:[#allocation33_spill] sm:$0xff] }
 0x142   :  { %v1081_v31 = vadd.f32 %v1078_v57, %v1065_v52  ;;  %v1110_v23 = vmul.f32 %v5582_v53, %v3632_v29  ;;  %v924_v59 = vadd.f32 %v921_v16, %v908_v27  ;;  %v1126_v22 = vmul.f32 %v5583_v12, %v3645_v47  ;;  %v5585_v57 = vld [vmem:[#allocation35_spill] sm:$0xff]  ;;  %v5586_v27 = vld [vmem:[#allocation57_spill] sm:$0xff] }
 0x143   :  { %v1048_v25 = vadd.f32 %v1045_v5, %v1035_v45  ;;  %v1077_v51 = vmul.f32 %v5578_v7, %v3394_v32  ;;  %v941_v46 = vadd.f32 %v938_v9, %v925_v42  ;;  %v1223_v10 = vmul.f32 %v5584_v50, %v3251_v2  ;;  %v5587_v9 = vld [vmem:[#allocation59_spill] sm:$0xff] }
 0x144   :  { %v1097_v3 = vadd.f32 %v1094_v8, %v1081_v31  ;;  %v1142_v52 = vmul.f32 %v5585_v57, %v3659_v63  ;;  %v1093_v16 = vmul.f32 %v5580_v28, %v3417_v4  ;;  %v1233_v54 = vmul.f32 %v5586_v27, %v3338_v21 }
 0x145   :  { %v1064_v43 = vadd.f32 %v1061_v11, %v1048_v25  ;;  %v1109_v7 = vmul.f32 %v5582_v53, %v5494_v39  ;;  %v940_v8 = vadd.f32 %v937_v37, %v924_v59  ;;  %v5589_v25 = vrot.slane %v4277_v13, 1 }
 0x146   :  { %v784_v62 = vpop.permute.xlu0 %783  ;;  %v1113_v5 = vadd.f32 %v1110_v23, %v1097_v3  ;;  %v1236_v31 = vadd.f32 %v1233_v54, %v1223_v10  ;;  %v957_v41 = vadd.f32 %v954_v1, %v941_v46  ;;  %v1125_v23 = vmul.f32 %v5583_v12, %v3446_v56 }
 0x147   :  { %v791_v38 = vadd.f32 %v784_v62, %v768_v14  ;;  %v1249_v14 = vmul.f32 %v5587_v9, %v3347_v18  ;;  %v1080_v42 = vadd.f32 %v1077_v51, %v1064_v43  ;;  %v5588_v62 = vld [vmem:[#allocation66_spill] sm:$0xff]  ;;  %v1281_v37 = vmul.f32 %v4258_v33, %v3417_v4 }
 0x148   :  { %v1265_v11 = vmul.f32 %v5588_v62, %v3394_v32  ;;  %v1129_v60 = vadd.f32 %v1126_v22, %v1113_v5  ;;  %v1141_v10 = vmul.f32 %v5585_v57, %v3489_v40  ;;  %v1224_v13 = vmul.f32 %v5584_v50, %v3556_v48 }
 0x149   :  { %v797_v45 = vrot.slane %v791_v38, 1  ;;  %v1096_v3 = vadd.f32 %v1093_v16, %v1080_v42  ;;  %v1252_v35 = vadd.f32 %v1249_v14, %v1236_v31  ;;  %v1234_v1 = vmul.f32 %v5586_v27, %v3588_v20  ;;  %v5590_v27 = vld [vmem:[#allocation61_spill] sm:$0xff] }
 0x14a   :  { %v971_v44 = vpop.permute.xlu1 %970  ;;  %v1145_v54 = vadd.f32 %v1142_v52, %v1129_v60  ;;  %v956_v46 = vadd.f32 %v953_v6, %v940_v8  ;;  %v1266_v57 = vmul.f32 %v5588_v62, %v3606_v58  ;;  %v1297_v50 = vmul.f32 %v4273_v30, %v5494_v39 }
 0x14b   :  { %v800_v28 = vsel %vm116_vm0, %v797_v45, %v5589_v25  ;;  %v1112_v51 = vadd.f32 %v1109_v7, %v1096_v3  ;;  %v1268_v12 = vadd.f32 %v1265_v11, %v1252_v35  ;;  %v1237_v60 = vadd.f32 %v1234_v1, %v1224_v13  ;;  %v5595_v13 = vld [vmem:[#allocation81_spill] sm:$0xff] }
 0x14c   :  { %v805_v53 = vmax.f32 %v791_v38, %v800_v28  ;;  %v1250_v38 = vmul.f32 %v5587_v9, %v3595_v61  ;;  %v1313_v5 = vmul.f32 %v5590_v27, %v3446_v56  ;;  %v1298_v8 = vmul.f32 %v4273_v30, %v3632_v29 }
 0x14d   :  { %v1128_v52 = vadd.f32 %v1125_v23, %v1112_v51  ;;  %v1284_v16 = vadd.f32 %v1281_v37, %v1268_v12  ;;  %v5591_v42 = vrot.slane %v4347_v19, 2  ;;  %v5592_v62 = vrot.slane %v4299_v34, 1 }
 0x14e   :  { %v812_v59 = vrot.slane %v805_v53, 2  ;;  %v973_v22 = vpop.permute.xlu0 %972  ;;  %v1253_v14 = vadd.f32 %v1250_v38, %v1237_v60  ;;  %v1314_v30 = vmul.f32 %v5590_v27, %v3645_v47  ;;  %v1422_v1 = vmul.f32 %v5595_v13, %v3588_v20  ;;  %v5597_v38 = vld [vmem:[#allocation69_spill] sm:$0xff] }
 0x14f   :  { %v4508_v43 = vadd.f32 %v973_v22, %v957_v41  ;;  %v1282_v41 = vmul.f32 %v4258_v33, %v3624_v55  ;;  %v1144_v9 = vadd.f32 %v1141_v10, %v1128_v52  ;;  %v5593_v33 = vrot.slane %v4448_v0, 1  ;;  %v5594_v10 = vld [vmem:[#allocation36_spill] sm:$0xff] }
 0x150   :  { %v815_v31 = vsel %vm810_vm1, %v812_v59, %v5591_v42  ;;  %v1269_v25 = vadd.f32 %v1266_v57, %v1253_v14  ;;  %v1300_v37 = vadd.f32 %v1297_v50, %v1284_v16  ;;  %v1710_v51 = vadd.f32 %v4404_v26, %v4450_v15  ;;  %v5599_v26 = vld [vmem:[#allocation43_spill] sm:$0xff] }
 0x151   :  { %v986_v35 = vrot.slane %v4508_v43, 1  ;;  %v1161_v7 = vpop.permute.xlu1 %1160  ;;  %v4529_v28 = vmax.f32 %v805_v53, %v815_v31  ;;  %v798_v23 = vsel %vm116_vm0, %v5593_v33, %v797_v45  ;;  %v1412_v53 = vmul.f32 %v5594_v10, %v3556_v48  ;;  %v5596_v45 = vld [vmem:[#allocation41_spill] sm:$0xff] }
 0x152   :  { %v1168_v6 = vadd.f32 %v1161_v7, %v1145_v54  ;;  %v804_v19 = vmax.f32 %v4448_v0, %v798_v23  ;;  %v1285_v34 = vadd.f32 %v1282_v41, %v1269_v25  ;;  %v1438_v22 = vmul.f32 %v5596_v45, %v3595_v61  ;;  %v5601_v23 = vld [vmem:[#allocation46_spill] sm:$0xff] }
 0x153   :  { %v989_v11 = vsel %vm116_vm0, %v986_v35, %v5592_v62  ;;  %824 = vrot.lane.b32.xlu1 %v4529_v28, %s2445_s18  ;;  %v1330_v60 = vmul.f32 %v5597_v38, %v3659_v63  ;;  %v5598_v57 = vrot.slane %v4268_v49, 1  ;;  %v1425_v27 = vadd.f32 %v1422_v1, %v1412_v53  ;;  %v5600_v62 = vld [vmem:[#allocation44_spill] sm:$0xff] }
 0x154   :  { %v1174_v3 = vrot.slane %v1168_v6, 1  ;;  %v4548_v12 = vmax.f32 %v4508_v43, %v989_v11  ;;  %v1301_v16 = vadd.f32 %v1298_v8, %v1285_v34  ;;  %v811_v50 = vrot.slane %v804_v19, 2  ;;  %v5607_v43 = vld [vmem:[#allocation72_spill] sm:$0xff] }
 0x155   :  { %v1159_v54 = vpop.permute.xlu0 %1158  ;;  %v979_v7 = vadd.f32 %v971_v44, %v956_v46  ;;  %v1316_v14 = vadd.f32 %v1313_v5, %v1300_v37  ;;  %v1329_v41 = vmul.f32 %v5597_v38, %v3489_v40  ;;  %v1454_v15 = vmul.f32 %v5599_v26, %v3606_v58 }
 0x156   :  { %v1167_v0 = vadd.f32 %v1159_v54, %v1144_v9  ;;  %v1177_v52 = vsel %vm116_vm0, %v1174_v3, %v5598_v57  ;;  %v1317_v42 = vadd.f32 %v1314_v30, %v1301_v16  ;;  %v813_v9 = vsel %vm810_vm1, %v811_v50, %v812_v59 }
 0x157   :  { %v1441_v31 = vadd.f32 %v1438_v22, %v1425_v27  ;;  %v1470_v49 = vmul.f32 %v5600_v62, %v3624_v55  ;;  %v4563_v11 = vadd.f32 %v4469_v36, %v1710_v51  ;;  %v4565_v8 = vmax.f32 %v1168_v6, %v1177_v52  ;;  %v5602_v22 = vld [vmem:[#allocation47_spill] sm:$0xff] }
 0x158   :  { %v1173_v44 = vrot.slane %v1167_v0, 1  ;;  %v4567_v46 = vmax.f32 %v804_v19, %v813_v9  ;;  %v1000_v5 = vrot.slane %v4548_v12, 2  ;;  %v1333_v25 = vadd.f32 %v1330_v60, %v1317_v42 }
 0x159   :  { %v1457_v33 = vadd.f32 %v1454_v15, %v1441_v31  ;;  %v1486_v37 = vmul.f32 %v5601_v23, %v3632_v29  ;;  %v985_v59 = vrot.slane %v979_v7, 1  ;;  %v1347_v30 = vpop.permute.xlu1 %1346  ;;  %v1411_v36 = vmul.f32 %v5594_v10, %v3251_v2 }
 0x15a   :  { %822 = vrot.lane.b32.xlu0 %v4567_v46, %s2445_s18  ;;  %v1421_v6 = vmul.f32 %v5595_v13, %v3338_v21  ;;  %v1437_v19 = vmul.f32 %v5596_v45, %v3347_v18  ;;  %v1332_v34 = vadd.f32 %v1329_v41, %v1316_v14  ;;  %v1502_v51 = vmul.f32 %v5602_v22, %v3645_v47  ;;  %v5603_v13 = vld [vmem:[#allocation53_spill] sm:$0xff] }
 0x15b   :  { %v1473_v1 = vadd.f32 %v1470_v49, %v1457_v33  ;;  %v1188_v38 = vrot.slane %v4565_v8, 2  ;;  %v1175_v60 = vsel %vm116_vm0, %v1173_v44, %v1174_v3  ;;  %v1453_v10 = vmul.f32 %v5599_v26, %v3394_v32  ;;  %v5605_v26 = vld [vmem:[#allocation67_spill] sm:$0xff] }
 0x15c   :  { %v1424_v57 = vadd.f32 %v1421_v6, %v1411_v36  ;;  %v1518_v16 = vmul.f32 %v5603_v13, %v3659_v63  ;;  %v1469_v45 = vmul.f32 %v5600_v62, %v3417_v4  ;;  %v5604_v50 = vrot.slane %v4364_v24, 2  ;;  %v5606_v62 = vld [vmem:[#allocation70_spill] sm:$0xff] }
 0x15d   :  { %v1349_v54 = vpop.permute.xlu0 %1348  ;;  %v1489_v52 = vadd.f32 %v1486_v37, %v1473_v1  ;;  %v987_v3 = vsel %vm116_vm0, %v985_v59, %v986_v35  ;;  %v1599_v15 = vmul.f32 %v5605_v26, %v3251_v2  ;;  %v1609_v24 = vmul.f32 %v5606_v62, %v3338_v21 }
 0x15e   :  { %v4580_v53 = vadd.f32 %v1349_v54, %v1333_v25  ;;  %v1003_v27 = vsel %vm810_vm1, %v1000_v5, %v5604_v50  ;;  %v1440_v14 = vadd.f32 %v1437_v19, %v1424_v57  ;;  %v993_v31 = vmax.f32 %v979_v7, %v987_v3 }
 0x15f   :  { %v4596_v41 = vmax.f32 %v4548_v12, %v1003_v27  ;;  %v1505_v9 = vadd.f32 %v1502_v51, %v1489_v52  ;;  %v4606_v49 = vadd.f32 %v1347_v30, %v1332_v34  ;;  %v1485_v12 = vmul.f32 %v5601_v23, %v5494_v39  ;;  %v5608_v23 = vld [vmem:[#allocation71_spill] sm:$0xff] }
 0x160   :  { %v1362_v42 = vrot.slane %v4580_v53, 1  ;;  %v1537_v44 = vpop.permute.xlu1 %1536  ;;  %v1456_v25 = vadd.f32 %v1453_v10, %v1440_v14  ;;  %v1625_v35 = vmul.f32 %v5607_v43, %v3347_v18  ;;  %v1181_v33 = vmax.f32 %v1167_v0, %v1175_v60 }
 0x161   :  { %1012 = vrot.lane.b32.xlu1 %v4596_v41, %s2445_s18  ;;  %v1521_v37 = vadd.f32 %v1518_v16, %v1505_v9  ;;  %v999_v59 = vrot.slane %v993_v31, 2  ;;  %v1612_v7 = vadd.f32 %v1609_v24, %v1599_v15  ;;  %v1501_v30 = vmul.f32 %v5602_v22, %v3446_v56 }
 0x162   :  { %v1472_v54 = vadd.f32 %v1469_v45, %v1456_v25  ;;  %v1517_v36 = vmul.f32 %v5603_v13, %v3489_v40  ;;  %v1641_v6 = vmul.f32 %v5608_v23, %v3394_v32  ;;  %v5609_v19 = vrot.slane %v4366_v17, 1  ;;  %v5610_v13 = vld [vmem:[#allocation75_spill] sm:$0xff] }
 0x163   :  { %v4629_v34 = vadd.f32 %v1537_v44, %v1521_v37  ;;  %v1001_v1 = vsel %vm810_vm1, %v999_v59, %v1000_v5  ;;  %v1628_v51 = vadd.f32 %v1625_v35, %v1612_v7  ;;  %v1600_v57 = vmul.f32 %v5605_v26, %v3556_v48 }
 0x164   :  { %v1365_v0 = vsel %vm116_vm0, %v1362_v42, %v5609_v19  ;;  %v1488_v22 = vadd.f32 %v1485_v12, %v1472_v54  ;;  %v4634_v60 = vmax.f32 %v993_v31, %v1001_v1  ;;  %v1610_v17 = vmul.f32 %v5606_v62, %v3588_v20  ;;  %v1535_v9 = vpop.permute.xlu0 %1534  ;;  %v5611_v31 = vld [vmem:[#allocation77_spill] sm:$0xff]  ;;  %v5614_v19 = vld [vmem:[#allocation79_spill] sm:$0xff] }
 0x165   :  { %v1740_v10 = vrot.slane %v4563_v11, 1  ;;  %v1187_v52 = vrot.slane %v1181_v33, 2  ;;  %v1657_v5 = vmul.f32 %v5610_v13, %v3417_v4  ;;  %v1626_v16 = vmul.f32 %v5607_v43, %v3595_v61  ;;  %v5612_v12 = vld [vmem:[#allocation73_spill] sm:$0xff] }
 0x166   :  { %v1504_v45 = vadd.f32 %v1501_v30, %v1488_v22  ;;  %1010 = vrot.lane.b32.xlu0 %v4634_v60, %s2445_s18  ;;  %v1644_v50 = vadd.f32 %v1641_v6, %v1628_v51  ;;  %v1613_v27 = vadd.f32 %v1610_v17, %v1600_v57  ;;  %v1642_v14 = vmul.f32 %v5608_v23, %v3606_v58  ;;  %v5615_v17 = vld [vmem:[#allocation60_spill] sm:$0xff] }
 0x167   :  { %v1361_v3 = vrot.slane %v4606_v49, 1  ;;  %v4657_v26 = vmax.f32 %v4580_v53, %v1365_v0  ;;  %v1550_v15 = vrot.slane %v4629_v34, 1  ;;  %v1673_v62 = vmul.f32 %v5611_v31, %v5494_v39 }
 0x168   :  { %v1520_v24 = vadd.f32 %v1517_v36, %v1504_v45  ;;  %v1629_v44 = vadd.f32 %v1626_v16, %v1613_v27  ;;  %v1658_v25 = vmul.f32 %v5610_v13, %v3624_v55  ;;  %v5613_v43 = vrot.slane %v5612_v12, 2 }
 0x169   :  { %v1674_v37 = vmul.f32 %v5611_v31, %v3632_v29  ;;  %v1189_v7 = vsel %vm810_vm1, %v1187_v52, %v1188_v38  ;;  %v4680_v54 = vstv %s4614_s7  ;;  %v1660_v36 = vadd.f32 %v1657_v5, %v1644_v50  ;;  %v5617_v5 = vld [vmem:[#allocation80_spill] sm:$0xff] }
 0x16a   :  { %v1191_v35 = vsel %vm810_vm1, %v1188_v38, %v5613_v43  ;;  %v1543_v30 = vadd.f32 %v1535_v9, %v1520_v24  ;;  %v1645_v23 = vadd.f32 %v1642_v14, %v1629_v44  ;;  %v4684_v6 = vmax.f32 %v1181_v33, %v1189_v7 }
 0x16b   :  { %v4674_v59 = vmax.f32 %v4565_v8, %v1191_v35  ;;  %v1690_v0 = vmul.f32 %v5614_v19, %v3645_v47  ;;  %v1788_v8 = vmul.f32 %v4680_v54, %v3556_v48  ;;  %v4693_v38 = vstv %s4622_s8 }
 0x16c   :  { %v4696_v1 = vstv %s4632_s9  ;;  %v1549_v51 = vrot.slane %v1543_v30, 1  ;;  %v1661_v22 = vadd.f32 %v1658_v25, %v1645_v23  ;;  %1198 = vrot.lane.b32.xlu0 %v4684_v6, %s2445_s18  ;;  %v1798_v33 = vmul.f32 %v4693_v38, %v3588_v20 }
 0x16d   :  { %1200 = vrot.lane.b32.xlu1 %v4674_v59, %s2445_s18  ;;  %v1814_v57 = vmul.f32 %v4696_v1, %v3595_v61  ;;  %v5616_v52 = vrot.slane %v5615_v17, 1  ;;  %v1706_v16 = vmul.f32 %v5617_v5, %v3659_v63  ;;  %v4710_v45 = vstv %s4640_s10 }
 0x16e   :  { %v4713_v50 = vstv %s4647_s11  ;;  %v1677_v27 = vadd.f32 %v1674_v37, %v1661_v22  ;;  %v1801_v14 = vadd.f32 %v1798_v33, %v1788_v8  ;;  %v1830_v9 = vmul.f32 %v4710_v45, %v3606_v58 }
 0x16f   :  { %v1553_v13 = vsel %vm116_vm0, %v1550_v15, %v5616_v52  ;;  %v4720_v31 = vstv %s4653_s12  ;;  %v1376_v24 = vrot.slane %v4657_v26, 2  ;;  %v1551_v44 = vsel %vm116_vm0, %v1549_v51, %v1550_v15 }
 0x170   :  { %v1676_v25 = vadd.f32 %v1673_v62, %v1660_v36  ;;  %v1689_v12 = vmul.f32 %v5614_v19, %v3446_v56  ;;  %v1693_v43 = vadd.f32 %v1690_v0, %v1677_v27  ;;  %v1817_v35 = vadd.f32 %v1814_v57, %v1801_v14  ;;  %v1725_v19 = vpop.permute.xlu0 %1724  ;;  %v5618_v27 = vld [vmem:[#allocation82_spill] sm:$0xff] }
 0x171   :  { %v1846_v37 = vmul.f32 %v4713_v50, %v3624_v55  ;;  %v4733_v7 = vstv %s4669_s13  ;;  %v4736_v23 = vmax.f32 %v4629_v34, %v1553_v13  ;;  %v1705_v8 = vmul.f32 %v5617_v5, %v3489_v40 }
 0x172   :  { %v1862_v15 = vmul.f32 %v4720_v31, %v3632_v29  ;;  %v4743_v62 = vstv %s4682_s14  ;;  %v1709_v36 = vadd.f32 %v1706_v16, %v1693_v43  ;;  %v1833_v0 = vadd.f32 %v1830_v9, %v1817_v35 }
 0x173   :  { %v1787_v51 = vmul.f32 %v4680_v54, %v3251_v2  ;;  %v1797_v34 = vmul.f32 %v4693_v38, %v3338_v21  ;;  %v4751_v22 = vmax.f32 %v1543_v30, %v1551_v44  ;;  %v1692_v33 = vadd.f32 %v1689_v12, %v1676_v25 }
 0x174   :  { %v1878_v57 = vmul.f32 %v4733_v7, %v3645_v47  ;;  %v1813_v17 = vmul.f32 %v4696_v1, %v3347_v18  ;;  %v1849_v52 = vadd.f32 %v1846_v37, %v1833_v0  ;;  %v1894_v13 = vmul.f32 %v4743_v62, %v3659_v63 }
 0x175   :  { %v1800_v5 = vadd.f32 %v1797_v34, %v1787_v51  ;;  %v1829_v30 = vmul.f32 %v4710_v45, %v3394_v32  ;;  %v4763_v16 = vadd.f32 %v1725_v19, %v1709_v36  ;;  %v5619_v14 = vrot.slane %v5618_v27, 2  ;;  %v1723_v36 = vpop.permute.xlu1 %1722 }
 0x176   :  { %v1363_v44 = vsel %vm116_vm0, %v1361_v3, %v1362_v42  ;;  %v4774_v25 = vstv %s4715_s15  ;;  %v1865_v12 = vadd.f32 %v1862_v15, %v1849_v52  ;;  %v1845_v35 = vmul.f32 %v4713_v50, %v3417_v4 }
 0x177   :  { %v1379_v9 = vsel %vm810_vm1, %v1376_v24, %v5619_v14  ;;  %v1816_v43 = vadd.f32 %v1813_v17, %v1800_v5  ;;  %v1369_v53 = vmax.f32 %v4606_v49, %v1363_v44  ;;  %v1975_v19 = vmul.f32 %v4774_v25, %v3251_v2 }
 0x178   :  { %v4781_v37 = vmax.f32 %v4657_v26, %v1379_v9  ;;  %v4787_v42 = vstv %s4722_s16  ;;  %v4790_v3 = vstv %s4728_s17  ;;  %v1881_v0 = vadd.f32 %v1878_v57, %v1865_v12 }
 0x179   :  { %v1832_v15 = vadd.f32 %v1829_v30, %v1816_v43  ;;  %v1861_v51 = vmul.f32 %v4720_v31, %v5494_v39  ;;  %v1985_v26 = vmul.f32 %v4787_v42, %v3338_v21  ;;  %v5259_v49 = vrot.slane %v4763_v16, 1 }
 0x17a   :  { %1388 = vrot.lane.b32.xlu1 %v4781_v37, %s2445_s18  ;;  %v1375_v34 = vrot.slane %v1369_v53, 2  ;;  %v2001_v2 = vmul.f32 %v4790_v3, %v3347_v18  ;;  %v4802_v17 = vstv %s4745_s19  ;;  %v1877_v52 = vmul.f32 %v4733_v7, %v3446_v56 }
 0x17b   :  { %v1848_v57 = vadd.f32 %v1845_v35, %v1832_v15  ;;  %v1988_v5 = vadd.f32 %v1985_v26, %v1975_v19  ;;  %v2017_v30 = vmul.f32 %v4802_v17, %v3394_v32  ;;  %v4813_v21 = vmax.f32 %v4563_v11, %v1740_v10 }
 0x17c   :  { %v1708_v27 = vadd.f32 %v1705_v8, %v1692_v33  ;;  %v1377_v18 = vsel %vm810_vm1, %v1375_v34, %v1376_v24  ;;  %v4817_v14 = vstv %s4757_s20  ;;  %v1897_v9 = vadd.f32 %v1894_v13, %v1881_v0  ;;  %v1913_v8 = vpop.permute.xlu1 %1912  ;;  %v5622_v34 = vld [vmem:[#allocation38_spill] sm:$0xff] }
 0x17d   :  { %v1864_v44 = vadd.f32 %v1861_v51, %v1848_v57  ;;  %v4819_v12 = vmax.f32 %v1369_v53, %v1377_v18  ;;  %v2004_v43 = vadd.f32 %v2001_v2, %v1988_v5  ;;  %v1564_v35 = vrot.slane %v4736_v23, 2  ;;  %v5621_v51 = vld [vmem:[#allocation26_spill] sm:$0xff] }
 0x17e   :  { %v1741_v32 = vsel %vm116_vm0, %v5259_v49, %v1740_v10  ;;  %v1893_v24 = vmul.f32 %v4743_v62, %v3489_v40  ;;  %v4832_v33 = vstv %s4776_s0  ;;  %v1563_v13 = vrot.slane %v4751_v22, 2  ;;  %v5620_v10 = vld [vmem:[#allocation16_spill] sm:$0xff]  ;;  %v5623_v18 = vld [vmem:[#allocation50_spill] sm:$0xff] }
 0x17f   :  { %v1880_v53 = vadd.f32 %v1877_v52, %v1864_v44  ;;  %1386 = vrot.lane.b32.xlu0 %v4819_v12, %s2445_s18  ;;  %v2020_v19 = vadd.f32 %v2017_v30, %v2004_v43  ;;  %v2033_v11 = vmul.f32 %v4817_v14, %v3417_v4  ;;  %v1754_v0 = vrot.slane %v4813_v21, 2  ;;  %v1911_v44 = vpop.permute.xlu0 %1910 }
 0x180   :  { %v1789_v15 = vmul.f32 %v4680_v54, %v5620_v10  ;;  %v1799_v26 = vmul.f32 %v4693_v38, %v5621_v51  ;;  %v1815_v2 = vmul.f32 %v4696_v1, %v5622_v34  ;;  %v1731_v57 = vadd.f32 %v1723_v36, %v1708_v27  ;;  %v5624_v1 = vld [vmem:[#allocation63_spill] sm:$0xff]  ;;  %v5625_v27 = vld [vmem:[#allocation74_spill] sm:$0xff] }
 0x181   :  { %v4847_v52 = vmax.f32 %v4763_v16, %v1741_v32  ;;  %v4849_v5 = vadd.f32 %v1913_v8, %v1897_v9  ;;  %v2049_v4 = vmul.f32 %v4832_v33, %v5494_v39  ;;  %v1896_v30 = vadd.f32 %v1893_v24, %v1880_v53 }
 0x182   :  { %v4854_v21 = vstv %s4804_s1  ;;  %v1802_v54 = vadd.f32 %v1799_v26, %v1789_v15  ;;  %v1831_v38 = vmul.f32 %v4710_v45, %v5623_v18  ;;  %v2036_v43 = vadd.f32 %v2033_v11, %v2020_v19 }
 0x183   :  { %v1847_v36 = vmul.f32 %v4713_v50, %v5624_v1  ;;  %v5626_v32 = vrot.slane %v5625_v27, 2  ;;  %v1565_v8 = vsel %vm810_vm1, %v1563_v13, %v1564_v35  ;;  %v1977_v45 = vmul.f32 %v4774_v25, %v5620_v10 }
 0x184   :  { %v1818_v49 = vadd.f32 %v1815_v2, %v1802_v54  ;;  %v4868_v24 = vmax.f32 %v4751_v22, %v1565_v8  ;;  %v1737_v53 = vrot.slane %v1731_v57, 1  ;;  %v2080_v19 = vstv %s4821_s21 }
 0x185   :  { %v1567_v9 = vsel %vm810_vm1, %v1564_v35, %v5626_v32  ;;  %v1987_v50 = vmul.f32 %v4787_v42, %v5621_v51  ;;  %v2003_v11 = vmul.f32 %v4790_v3, %v5622_v34  ;;  %v1752_v35 = vrot.slane %v4847_v52, 2 }
 0x186   :  { %v4865_v39 = vmax.f32 %v4736_v23, %v1567_v9  ;;  %v1919_v13 = vadd.f32 %v1911_v44, %v1896_v30  ;;  %v1834_v15 = vadd.f32 %v1831_v38, %v1818_v49  ;;  %v5627_v23 = vld [vmem:[#allocation76_spill] sm:$0xff]  ;;  %1574 = vrot.lane.b32.xlu0 %v4868_v24, %s2445_s18  ;;  %v1926_v22 = vrot.slane %v4849_v5, 1 }
 0x187   :  { %v1863_v26 = vmul.f32 %v4720_v31, %v5627_v23  ;;  %v2065_v10 = vmul.f32 %v4854_v21, %v3446_v56  ;;  %v1990_v51 = vadd.f32 %v1987_v50, %v1977_v45  ;;  %v2019_v34 = vmul.f32 %v4802_v17, %v5623_v18  ;;  %v5628_v31 = vld [vmem:[#allocation88_spill] sm:$0xff]  ;;  %v5629_v18 = vld [vmem:[#allocation97_spill] sm:$0xff] }
 0x188   :  { %1576 = vrot.lane.b32.xlu1 %v4865_v39, %s2445_s18  ;;  %v2052_v2 = vadd.f32 %v2049_v4, %v2036_v43  ;;  %v2081_v49 = vmul.f32 %v2080_v19, %v3489_v40  ;;  %v1850_v30 = vadd.f32 %v1847_v36, %v1834_v15  ;;  %v1879_v54 = vmul.f32 %v4733_v7, %v5628_v31 }
 0x189   :  { %v2006_v38 = vadd.f32 %v2003_v11, %v1990_v51  ;;  %v2035_v44 = vmul.f32 %v4817_v14, %v5624_v1  ;;  %v1976_v27 = vmul.f32 %v4774_v25, %v3556_v48  ;;  %v1986_v56 = vmul.f32 %v4787_v42, %v3588_v20  ;;  %v2099_v25 = vpop.permute.xlu1 %2098  ;;  %v1915_v42 = vpop.permute.xlu0 %1914 }
 0x18a   :  { %v1925_v32 = vrot.slane %v1919_v13, 1  ;;  %v1866_v9 = vadd.f32 %v1863_v26, %v1850_v30  ;;  %v1895_v4 = vmul.f32 %v4743_v62, %v5629_v18  ;;  %v2002_v40 = vmul.f32 %v4790_v3, %v3595_v61 }
 0x18b   :  { %v2022_v43 = vadd.f32 %v2019_v34, %v2006_v38  ;;  %v2051_v7 = vmul.f32 %v4832_v33, %v5627_v23  ;;  %v1989_v36 = vadd.f32 %v1986_v56, %v1976_v27  ;;  %v2018_v1 = vmul.f32 %v4802_v17, %v3606_v58 }
 0x18c   :  { %v2068_v48 = vadd.f32 %v2065_v10, %v2052_v2  ;;  %v1882_v8 = vadd.f32 %v1879_v54, %v1866_v9  ;;  %v2067_v20 = vmul.f32 %v4854_v21, %v5628_v31  ;;  %v2034_v62 = vmul.f32 %v4817_v14, %v3624_v55 }
 0x18d   :  { %v2038_v45 = vadd.f32 %v2035_v44, %v2022_v43  ;;  %v2005_v61 = vadd.f32 %v2002_v40, %v1989_v36  ;;  %v1755_v3 = vsel %vm810_vm1, %v1752_v35, %v1754_v0  ;;  %v5630_v50 = vrot.slane %v4763_v16, 1  ;;  %v2103_v30 = vpop.permute.xlu1 %2102 }
 0x18e   :  { %v1927_v58 = vsel %vm116_vm0, %v1925_v32, %v1926_v22  ;;  %v1898_v17 = vadd.f32 %v1895_v4, %v1882_v8  ;;  %v4916_v15 = vmax.f32 %v4847_v52, %v1755_v3  ;;  %v2083_v10 = vmul.f32 %v2080_v19, %v5629_v18 }
 0x18f   :  { %v1739_v11 = vsel %vm116_vm0, %v1737_v53, %v5630_v50  ;;  %v2054_v26 = vadd.f32 %v2051_v7, %v2038_v45  ;;  %v2021_v55 = vadd.f32 %v2018_v1, %v2005_v61  ;;  %v2050_v14 = vmul.f32 %v4832_v33, %v3632_v29 }
 0x190   :  { %v1745_v23 = vmax.f32 %v1731_v57, %v1739_v11  ;;  %v1921_v51 = vadd.f32 %v1915_v42, %v1898_v17  ;;  %1764 = vrot.lane.b32.xlu1 %v4916_v15, %s2445_s18  ;;  %v2066_v34 = vmul.f32 %v4854_v21, %v3645_v47  ;;  %v1933_v52 = vmax.f32 %v1919_v13, %v1927_v58 }
 0x191   :  { %v2070_v0 = vadd.f32 %v2067_v20, %v2054_v26  ;;  %v2037_v53 = vadd.f32 %v2034_v62, %v2021_v55  ;;  %v2084_v2 = vadd.f32 %v2081_v49, %v2068_v48  ;;  %v2082_v29 = vmul.f32 %v2080_v19, %v3659_v63  ;;  %v2101_v49 = vpop.permute.xlu0 %2100 }
 0x192   :  { %v1751_v16 = vrot.slane %v1745_v23, 2  ;;  %v1928_v57 = vrot.slane %v1921_v51, 1 }
 0x193   :  { %v2086_v54 = vadd.f32 %v2083_v10, %v2070_v0  ;;  %v2053_v38 = vadd.f32 %v2050_v14, %v2037_v53  ;;  %v2107_v21 = vadd.f32 %v2099_v25, %v2084_v2 }
 0x194   :  { %v1753_v31 = vsel %vm810_vm1, %v1751_v16, %v1752_v35  ;;  %v1935_v44 = vmax.f32 %v1921_v51, %v1928_v57  ;;  %v1929_v27 = vsel %vm116_vm0, %v1926_v22, %v1928_v57  ;;  %v1939_v35 = vrot.slane %v1933_v52, 2 }
 0x195   :  { %v4927_v33 = vmax.f32 %v1745_v23, %v1753_v31  ;;  %v2109_v56 = vadd.f32 %v2103_v30, %v2086_v54  ;;  %v2069_v32 = vadd.f32 %v2066_v34, %v2053_v38  ;;  %v1934_v47 = vmax.f32 %v4849_v5, %v1929_v27 }
 0x196   :  { %v1942_v13 = vrot.slane %v1935_v44, 2  ;;  %v2113_v36 = vrot.slane %v2107_v21, 1 }
 0x197   :  { %1762 = vrot.lane.b32.xlu0 %v4927_v33, %s2445_s18  ;;  %v2116_v9 = vrot.slane %v2109_v56, 1  ;;  %v2085_v18 = vadd.f32 %v2082_v29, %v2069_v32  ;;  %v1940_v4 = vrot.slane %v1934_v47, 2 }
 0x199   :  { %v2108_v63 = vadd.f32 %v2101_v49, %v2085_v18  ;;  %v1943_v19 = vsel %vm810_vm1, %v1940_v4, %v1942_v13  ;;  %v1941_v40 = vsel %vm810_vm1, %v1939_v35, %v1940_v4  ;;  %v2123_v22 = vmax.f32 %v2109_v56, %v2116_v9 }
 0x19a   :  { %v1947_v43 = vmax.f32 %v1934_v47, %v1943_v19  ;;  %v1946_v7 = vmax.f32 %v1933_v52, %v1941_v40 }
 0x19b   :  { %v2114_v1 = vrot.slane %v2108_v63, 1  ;;  %v2130_v25 = vrot.slane %v2123_v22, 2 }
 0x19c   :  { %1952 = vrot.lane.b32.xlu1 %v1947_v43, %s2445_s18  ;;  %1950 = vrot.lane.b32.xlu0 %v1946_v7, %s2445_s18 }
 0x19d   :  { %v2117_v5 = vsel %vm116_vm0, %v2114_v1, %v2116_v9  ;;  %v2115_v48 = vsel %vm116_vm0, %v2113_v36, %v2114_v1 }
 0x19e   :  { %v2122_v8 = vmax.f32 %v2108_v63, %v2117_v5  ;;  %v2121_v20 = vmax.f32 %v2107_v21, %v2115_v48 }
 0x1a0   :  { %v2128_v62 = vrot.slane %v2122_v8, 2  ;;  %v2127_v42 = vrot.slane %v2121_v20, 2 }
 0x1a2   :  { %v2131_v45 = vsel %vm810_vm1, %v2128_v62, %v2130_v25  ;;  %v2129_v61 = vsel %vm810_vm1, %v2127_v42, %v2128_v62 }
 0x1a3   :  { %v2135_v3 = vmax.f32 %v2122_v8, %v2131_v45  ;;  %v2134_v50 = vmax.f32 %v2121_v20, %v2129_v61 }
 0x1a5   :  { %2140 = vrot.lane.b32.xlu1 %v2135_v3, %s2445_s18  ;;  %2138 = vrot.lane.b32.xlu0 %v2134_v50, %s2445_s18  ;;  %s2447_s18 = smov [#allocation7]  }
 0x1a6   :  { %s2166_s23 = sshll.u32 %s2447_s18, 4  ;;  %s2167_s23 = int_to_ptr.vmem [resolvable:$true] %s2166_s23 }
 0x1a7   :  { %s2417_s24 = scalar_lea.vmem %s2167_s23, 2048  ;;  %p2422_p11 = scmp.lt.s32.totalorder %s2167_s23, %s2167_s23 }
 0x1a8   :  { %p2418_p10 = scmp.ne.s32.totalorder %s2167_s23, %s2417_s24  ;;  %p2423_p12 = scmp.lt.s32.totalorder %s2417_s24, %s2417_s24 }
 0x1aa   :  { %p2424_p13 = por %p2423_p12, %p2422_p11 }
 0x1ac   :  { %p2425_p0 = pnand %p2424_p13, %p2418_p10 }
 0x1c5   :  { %v825_v11 = vpop.permute.xlu1 %824 }
 0x1c6   :  { %v829_v58 = vmax.f32 %v4529_v28, %v825_v11 }
 0x1c8   :  { %834 = vrot.lane.b32.xlu1 %v829_v58, %s2446_s22 }
 0x1cc   :  { %v823_v17 = vpop.permute.xlu0 %822 }
 0x1cd   :  { %v828_v23 = vmax.f32 %v4567_v46, %v823_v17 }
 0x1cf   :  { %832 = vrot.lane.b32.xlu0 %v828_v23, %s2446_s22 }
 0x1d3   :  { %v1013_v26 = vpop.permute.xlu1 %1012 }
 0x1d4   :  { %v1017_v10 = vmax.f32 %v4596_v41, %v1013_v26 }
 0x1d6   :  { %1022 = vrot.lane.b32.xlu1 %v1017_v10, %s2446_s22 }
 0x1d8   :  { %v1011_v55 = vpop.permute.xlu0 %1010 }
 0x1d9   :  { %v1016_v14 = vmax.f32 %v4634_v60, %v1011_v55 }
 0x1db   :  { %1020 = vrot.lane.b32.xlu0 %v1016_v14, %s2446_s22 }
 0x1de   :  { %v1199_v16 = vpop.permute.xlu0 %1198 }
 0x1df   :  { %v1201_v51 = vpop.permute.xlu1 %1200  ;;  %v1204_v0 = vmax.f32 %v4684_v6, %v1199_v16 }
 0x1e0   :  { %v1205_v28 = vmax.f32 %v4674_v59, %v1201_v51 }
 0x1e1   :  { %1208 = vrot.lane.b32.xlu0 %v1204_v0, %s2446_s22 }
 0x1e2   :  { %1210 = vrot.lane.b32.xlu1 %v1205_v28, %s2446_s22 }
 0x1ec   :  { %v1389_v46 = vpop.permute.xlu1 %1388 }
 0x1ed   :  { %v1393_v41 = vmax.f32 %v4781_v37, %v1389_v46 }
 0x1ef   :  { %1398 = vrot.lane.b32.xlu1 %v1393_v41, %s2446_s22 }
 0x1f1   :  { %v1387_v53 = vpop.permute.xlu0 %1386 }
 0x1f2   :  { %v1392_v60 = vmax.f32 %v4819_v12, %v1387_v53 }
 0x1f4   :  { %1396 = vrot.lane.b32.xlu0 %v1392_v60, %s2446_s22 }
 0x1f8   :  { %v1575_v52 = vpop.permute.xlu0 %1574 }
 0x1f9   :  { %v1580_v6 = vmax.f32 %v4868_v24, %v1575_v52 }
 0x1fa   :  { %v1577_v34 = vpop.permute.xlu1 %1576 }
 0x1fb   :  { %v1581_v59 = vmax.f32 %v4865_v39, %v1577_v34  ;;  %1584 = vrot.lane.b32.xlu0 %v1580_v6, %s2446_s22 }
 0x1fd   :  { %1586 = vrot.lane.b32.xlu1 %v1581_v59, %s2446_s22 }
 0x202   :  { %v1765_v2 = vpop.permute.xlu1 %1764 }
 0x203   :  { %v1769_v37 = vmax.f32 %v4916_v15, %v1765_v2 }
 0x205   :  { %1774 = vrot.lane.b32.xlu1 %v1769_v37, %s2446_s22 }
 0x209   :  { %v1763_v57 = vpop.permute.xlu0 %1762 }
 0x20a   :  { %v1768_v12 = vmax.f32 %v4927_v33, %v1763_v57 }
 0x20c   :  { %1772 = vrot.lane.b32.xlu0 %v1768_v12, %s2446_s22 }
 0x20e   :  { %v1953_v30 = vpop.permute.xlu1 %1952  ;;  %v1951_v31 = vpop.permute.xlu0 %1950 }
 0x20f   :  { %v4967_v54 = vmax.f32 %v1947_v43, %v1953_v30  ;;  %v4969_v39 = vmax.f32 %v1946_v7, %v1951_v31 }
 0x211   :  { %1962 = vrot.lane.b32.xlu1 %v4967_v54, %s2446_s22  ;;  %1960 = vrot.lane.b32.xlu0 %v4969_v39, %s2446_s22 }
 0x217   :  { %v2141_v24 = vpop.permute.xlu1 %2140  ;;  %v2139_v15 = vpop.permute.xlu0 %2138 }
 0x218   :  { %v4975_v38 = vmax.f32 %v2135_v3, %v2141_v24  ;;  %v4977_v29 = vmax.f32 %v2134_v50, %v2139_v15 }
 0x21a   :  { %2150 = vrot.lane.b32.xlu1 %v4975_v38, %s2446_s22  ;;  %2148 = vrot.lane.b32.xlu0 %v4977_v29, %s2446_s22 }
 0x23a   :  { %v835_v33 = vpop.permute.xlu1 %834 }
 0x23b   :  { %v839_v44 = vmax.f32 %v829_v58, %v835_v33 }
 0x23d   :  { %v841_v27 = vmax.f32 %v839_v44, 0.0 }
 0x23f   :  { %844 = vst.msk [vmem:[#allocation7 + $0x8] sm:$0xff] %vm842_vm2, %v841_v27 }
 0x241   :  { %v833_v56 = vpop.permute.xlu0 %832 }
 0x242   :  { %v838_v32 = vmax.f32 %v828_v23, %v833_v56 }
 0x244   :  { %v840_v47 = vmax.f32 %v838_v32, 0.0 }
 0x246   :  { %843 = vst.msk [vmem:[#allocation7] sm:$0xff] %vm842_vm2, %v840_v47 }
 0x248   :  { %v1023_v21 = vpop.permute.xlu1 %1022 }
 0x249   :  { %v1027_v13 = vmax.f32 %v1017_v10, %v1023_v21 }
 0x24b   :  { %v1029_v49 = vmax.f32 %v1027_v13, 0.0 }
 0x24d   :  { %1032 = vst.msk [vmem:[#allocation7 + $0x18] sm:$0xff] %vm842_vm2, %v1029_v49  ;;  %v1021_v35 = vpop.permute.xlu0 %1020 }
 0x24e   :  { %v1026_v9 = vmax.f32 %v1016_v14, %v1021_v35 }
 0x250   :  { %v1028_v18 = vmax.f32 %v1026_v9, 0.0 }
 0x252   :  { %1031 = vst.msk [vmem:[#allocation7 + $0x10] sm:$0xff] %vm842_vm2, %v1028_v18 }
 0x253   :  { %v1209_v19 = vpop.permute.xlu0 %1208 }
 0x254   :  { %v1211_v4 = vpop.permute.xlu1 %1210  ;;  %v1214_v40 = vmax.f32 %v1204_v0, %v1209_v19 }
 0x255   :  { %v1215_v63 = vmax.f32 %v1205_v28, %v1211_v4 }
 0x256   :  { %v1216_v43 = vmax.f32 %v1214_v40, 0.0 }
 0x257   :  { %v1217_v22 = vmax.f32 %v1215_v63, 0.0 }
 0x258   :  { %1219 = vst.msk [vmem:[#allocation7 + $0x20] sm:$0xff] %vm842_vm2, %v1216_v43 }
 0x259   :  { %1220 = vst.msk [vmem:[#allocation7 + $0x28] sm:$0xff] %vm842_vm2, %v1217_v22 }
 0x261   :  { %v1399_v7 = vpop.permute.xlu1 %1398 }
 0x262   :  { %v1403_v36 = vmax.f32 %v1393_v41, %v1399_v7 }
 0x264   :  { %v1405_v1 = vmax.f32 %v1403_v36, 0.0 }
 0x266   :  { %1408 = vst.msk [vmem:[#allocation7 + $0x38] sm:$0xff] %vm842_vm2, %v1405_v1  ;;  %v1397_v5 = vpop.permute.xlu0 %1396 }
 0x267   :  { %v1402_v48 = vmax.f32 %v1392_v60, %v1397_v5 }
 0x269   :  { %v1404_v25 = vmax.f32 %v1402_v48, 0.0 }
 0x26b   :  { %1407 = vst.msk [vmem:[#allocation7 + $0x30] sm:$0xff] %vm842_vm2, %v1404_v25 }
 0x26d   :  { %v1585_v20 = vpop.permute.xlu0 %1584 }
 0x26e   :  { %v1590_v42 = vmax.f32 %v1580_v6, %v1585_v20 }
 0x26f   :  { %v1587_v8 = vpop.permute.xlu1 %1586 }
 0x270   :  { %v1591_v62 = vmax.f32 %v1581_v59, %v1587_v8  ;;  %v1592_v61 = vmax.f32 %v1590_v42, 0.0 }
 0x272   :  { %v1593_v45 = vmax.f32 %v1591_v62, 0.0  ;;  %1595 = vst.msk [vmem:[#allocation7 + $0x40] sm:$0xff] %vm842_vm2, %v1592_v61 }
 0x274   :  { %1596 = vst.msk [vmem:[#allocation7 + $0x48] sm:$0xff] %vm842_vm2, %v1593_v45 }
 0x277   :  { %v1775_v3 = vpop.permute.xlu1 %1774 }
 0x278   :  { %v1779_v50 = vmax.f32 %v1769_v37, %v1775_v3 }
 0x27a   :  { %v1781_v11 = vmax.f32 %v1779_v50, 0.0 }
 0x27c   :  { %1784 = vst.msk [vmem:[#allocation7 + $0x58] sm:$0xff] %vm842_vm2, %v1781_v11 }
 0x27e   :  { %v1773_v58 = vpop.permute.xlu0 %1772 }
 0x27f   :  { %v1778_v17 = vmax.f32 %v1768_v12, %v1773_v58 }
 0x281   :  { %v1780_v23 = vmax.f32 %v1778_v17, 0.0 }
 0x283   :  { %1783 = vst.msk [vmem:[#allocation7 + $0x50] sm:$0xff] %vm842_vm2, %v1780_v23  ;;  %v1963_v26 = vpop.permute.xlu1 %1962  ;;  %v1961_v10 = vpop.permute.xlu0 %1960 }
 0x284   :  { %v1967_v55 = vmax.f32 %v4967_v54, %v1963_v26  ;;  %v1966_v14 = vmax.f32 %v4969_v39, %v1961_v10 }
 0x286   :  { %v1969_v51 = vmax.f32 %v1967_v55, 0.0  ;;  %v1968_v28 = vmax.f32 %v1966_v14, 0.0 }
 0x288   :  { %1972 = vst.msk [vmem:[#allocation7 + $0x68] sm:$0xff] %vm842_vm2, %v1969_v51  ;;  %1971 = vst.msk [vmem:[#allocation7 + $0x60] sm:$0xff] %vm842_vm2, %v1968_v28 }
 0x28c   :  { %v2151_v16 = vpop.permute.xlu1 %2150  ;;  %v2149_v0 = vpop.permute.xlu0 %2148 }
 0x28d   :  { %v2155_v46 = vmax.f32 %v4975_v38, %v2151_v16  ;;  %v2154_v41 = vmax.f32 %v4977_v29, %v2149_v0 }
 0x28f   :  { %v2157_v53 = vmax.f32 %v2155_v46, 0.0  ;;  %v2156_v60 = vmax.f32 %v2154_v41, 0.0 }
 0x291   :  { %2160 = vst.msk [vmem:[#allocation7 + $0x78] sm:$0xff] %vm842_vm2, %v2157_v53  ;;  %2159 = vst.msk [vmem:[#allocation7 + $0x70] sm:$0xff] %vm842_vm2, %v2156_v60 }
 0x292   :  { %2428 = shalt.err (!%p2425_p0)
}
 0x293   :  { %s2448_s25 = smov 128   ;;  %s2449_s26 = smov 8  }
 0x294   :  { %2172 = dma.vmem_to_hbm [thread:$0]  %s2167_s23, 2048, %s5009_s3, [#allocation3], %s2448_s25, %s2448_s25, %s2449_s26  }
 0x295   :  { %2441 = dma.done.wait [#allocation3], 2048  }
 0x296   :  { %2442 = vsyncadd [#allocation3], 4294965248 }
 0x297   :  { %2176 = vsyncpa [#allocation3], 1 }
 0x298   :  { %2177 = vsyncpa [#allocation4], 1 }
 0x299   :  { %2178 = vsyncpa [#allocation6], 1 }

</bundles_post_ra>
